<compile_context>
chip_gen: v7x
topology: tpu7x:2x2x1
jax: 0.10.0
libtpu: 0.0.40
codegen_flags: <defaults>
</compile_context>

<pallas_src>
import functools

import jax
import jax.numpy as jnp
from jax.experimental import pallas as pl
from jax.experimental.pallas import tpu as pltpu

LANE = 128
TM_MAX = 1024                              # bigger M tiles amortize grid-step overhead
VMEM_LIMIT_BYTES = 48 * 1024 * 1024        # headroom under v7x's 64 MiB physical VMEM
FUSED_Y_SCRATCH_BUDGET = 24 * 1024 * 1024  # max resident conv-output scratch for fusion
BN_EPS = 1e-5
LRELU_SLOPE = 0.2


def _round_up(x, m):
    return (x + m - 1) // m * m


def _choose_tm(m):
    # Multiple of 16 (bf16 sublane pack); as big as possible up to TM_MAX.
    return min(TM_MAX, _round_up(m, 16))


# ---------------------------------------------------------------------------
# Pallas kernels
# ---------------------------------------------------------------------------
def conv_bias_lrelu_kernel(p_ref, w_ref, b_ref, o_ref):
    """One M-tile: (patches @ W) + bias + LeakyReLU, f32 accumulate on MXU."""
    acc = jnp.dot(p_ref[...], w_ref[...], preferred_element_type=jnp.float32)
    acc = acc + b_ref[...]
    o_ref[...] = jnp.where(acc >= 0, acc, LRELU_SLOPE * acc).astype(o_ref.dtype)


def conv_bn_lrelu_fused_kernel(p_ref, w_ref, g_ref, b_ref, o_ref,
                               y_scr, s_scr, q_scr, sc_scr, sh_scr,
                               *, m_total, eps):
    """Fully fused Conv + BatchNorm(batch stats) + LeakyReLU.

    grid = (2, n_tiles): pass 0 computes conv tiles into a persistent VMEM
    scratch and accumulates per-channel sum / sum-of-squares; pass 1 computes
    scale/shift once, then normalizes each resident tile and stores bf16.
    """
    pss = pl.program_id(0)
    i = pl.program_id(1)

    @pl.when((pss == 0) & (i == 0))
    def _():
        s_scr[...] = jnp.zeros_like(s_scr)
        q_scr[...] = jnp.zeros_like(q_scr)

    @pl.when(pss == 0)
    def _():
        acc = jnp.dot(p_ref[...], w_ref[...], preferred_element_type=jnp.float32)
        y_scr[i] = acc
        # Zero-padded M rows contribute exactly 0 (conv has no bias here), so
        # dividing by the *real* M later is exact.
        s_scr[...] += jnp.sum(acc, axis=0, keepdims=True)
        q_scr[...] += jnp.sum(acc * acc, axis=0, keepdims=True)

    @pl.when((pss == 1) & (i == 0))
    def _():
        inv_m = 1.0 / m_total
        mean = s_scr[...] * inv_m
        var = jnp.maximum(q_scr[...] * inv_m - mean * mean, 0.0)
        scale = g_ref[...] * jax.lax.rsqrt(var + eps)
        sc_scr[...] = scale
        sh_scr[...] = b_ref[...] - mean * scale

    @pl.when(pss == 1)
    def _():
        z = y_scr[i] * sc_scr[...] + sh_scr[...]
        o_ref[...] = jnp.where(z >= 0, z, LRELU_SLOPE * z).astype(o_ref.dtype)


def conv_partial_stats_kernel(p_ref, w_ref, y_ref, s_ref, q_ref):
    """Fallback pass 1 (large M): matmul tile -> bf16 HBM + per-tile partial
    sums, so the M axis can be 'parallel' (v7x 2-TC shardable)."""
    acc = jnp.dot(p_ref[...], w_ref[...], preferred_element_type=jnp.float32)
    y_ref[...] = acc.astype(y_ref.dtype)
    s_ref[...] = jnp.sum(acc, axis=0, keepdims=True)
    q_ref[...] = jnp.sum(acc * acc, axis=0, keepdims=True)


def scale_shift_lrelu_kernel(y_ref, sc_ref, sh_ref, o_ref):
    """Fallback pass 2: one FMA + select per element with precomputed BN rows."""
    z = y_ref[...].astype(jnp.float32) * sc_ref[...] + sh_ref[...]
    o_ref[...] = jnp.where(z >= 0, z, LRELU_SLOPE * z).astype(o_ref.dtype)


# ---------------------------------------------------------------------------
# Glue: im2col (NHWC, pure slicing / reshape) + operand prep
# ---------------------------------------------------------------------------
def im2col_nhwc(x, k, stride, pad):
    """x: [N, H, W, C] -> patches [N*OH*OW, k*k*C] with (kh, kw, c) ordering."""
    N, H, W, C = x.shape
    xp = jnp.pad(x, ((0, 0), (pad, pad), (pad, pad), (0, 0)))
    OH = (H + 2 * pad - k) // stride + 1
    OW = (W + 2 * pad - k) // stride + 1
    cols = [xp[:, i:i + stride * OH:stride, j:j + stride * OW:stride, :]
            for i in range(k) for j in range(k)]
    patches = jnp.concatenate(cols, axis=-1)                # [N, OH, OW, k*k*C]
    return patches.reshape(N * OH * OW, k * k * C), OH, OW


def _prep_conv_operands(x_nhwc, weight, stride, pad):
    """bf16 cast + channel pad (-> lane-dense K) BEFORE im2col, then tile setup."""
    OC, C, KH, KW = weight.shape
    Cp = _round_up(C, 8)                     # KH*KW*Cp is a multiple of 128 for 4x4
    x = jnp.pad(x_nhwc.astype(jnp.bfloat16),
                ((0, 0), (0, 0), (0, 0), (0, Cp - C)))
    patches, OH, OW = im2col_nhwc(x, KH, stride, pad)
    M, K = patches.shape                     # K = KH*KW*Cp, already lane-dense
    OCp = _round_up(OC, LANE)
    TM = _choose_tm(M)
    Mp = _round_up(M, TM)
    if Mp != M:
        patches = jnp.pad(patches, ((0, Mp - M), (0, 0)))
    w = weight.transpose(2, 3, 1, 0)         # (KH, KW, C, OC)
    w = jnp.pad(w, ((0, 0), (0, 0), (0, Cp - C), (0, OCp - OC)))
    w = w.reshape(K, OCp).astype(jnp.bfloat16)
    dims = dict(M=M, OC=OC, Mp=Mp, K=K, OCp=OCp, TM=TM, OH=OH, OW=OW)
    return patches, w, dims


def _pad_row(v, OCp):
    v = v.astype(jnp.float32).reshape(1, -1)
    return jnp.pad(v, ((0, 0), (0, OCp - v.shape[1])))


# ---------------------------------------------------------------------------
# Layer wrappers
# ---------------------------------------------------------------------------
def conv_bias_lrelu(x_nhwc, weight, bias):
    N = x_nhwc.shape[0]
    p, w, d = _prep_conv_operands(x_nhwc, weight, stride=2, pad=1)
    M, OC, Mp, K, OCp, TM = d["M"], d["OC"], d["Mp"], d["K"], d["OCp"], d["TM"]
    b2d = _pad_row(bias, OCp)
    out = pl.pallas_call(
        conv_bias_lrelu_kernel,
        out_shape=jax.ShapeDtypeStruct((Mp, OCp), jnp.bfloat16),
        grid=(Mp // TM,),
        in_specs=[pl.BlockSpec((TM, K), lambda i: (i, 0)),
                  pl.BlockSpec((K, OCp), lambda i: (0, 0)),    # weight resident
                  pl.BlockSpec((1, OCp), lambda i: (0, 0))],
        out_specs=pl.BlockSpec((TM, OCp), lambda i: (i, 0)),
        compiler_params=pltpu.CompilerParams(
            dimension_semantics=("parallel",),
            vmem_limit_bytes=VMEM_LIMIT_BYTES),
    )(p, w, b2d)
    return out[:M, :OC].reshape(N, d["OH"], d["OW"], OC)


def conv_bn_lrelu(x_nhwc, weight, gamma, beta):
    N = x_nhwc.shape[0]
    p, w, d = _prep_conv_operands(x_nhwc, weight, stride=2, pad=1)
    M, OC, Mp, K, OCp, TM = d["M"], d["OC"], d["Mp"], d["K"], d["OCp"], d["TM"]
    n_tiles = Mp // TM
    g2d, b2d = _pad_row(gamma, OCp), _pad_row(beta, OCp)

    y_scratch_bytes = n_tiles * TM * OCp * 4
    if y_scratch_bytes <= FUSED_Y_SCRATCH_BUDGET:
        # Fully fused: conv output never touches HBM.
        out = pl.pallas_call(
            functools.partial(conv_bn_lrelu_fused_kernel,
                              m_total=float(M), eps=BN_EPS),
            out_shape=jax.ShapeDtypeStruct((Mp, OCp), jnp.bfloat16),
            grid=(2, n_tiles),
            in_specs=[
                # Patches only needed in pass 0; pass 1 pins block 0 (no refetch churn).
                pl.BlockSpec((TM, K), lambda pss, i: (i * (1 - pss), 0)),
                pl.BlockSpec((K, OCp), lambda pss, i: (0, 0)),   # weight resident
                pl.BlockSpec((1, OCp), lambda pss, i: (0, 0)),   # gamma
                pl.BlockSpec((1, OCp), lambda pss, i: (0, 0)),   # beta
            ],
            # Output written only in pass 1; pass-0 steps all map to block 0 so
            # no garbage block is ever flushed to HBM.
            out_specs=pl.BlockSpec((TM, OCp), lambda pss, i: (pss * i, 0)),
            scratch_shapes=[pltpu.VMEM((n_tiles, TM, OCp), jnp.float32),  # resident conv out
                            pltpu.VMEM((1, OCp), jnp.float32),            # sum
                            pltpu.VMEM((1, OCp), jnp.float32),            # sum of squares
                            pltpu.VMEM((1, OCp), jnp.float32),            # BN scale
                            pltpu.VMEM((1, OCp), jnp.float32)],           # BN shift
            compiler_params=pltpu.CompilerParams(
                dimension_semantics=("arbitrary", "arbitrary"),
                vmem_limit_bytes=VMEM_LIMIT_BYTES),
        )(p, w, g2d, b2d)
    else:
        # Fallback for very large M: 2-pass, bf16 y, per-tile partial stats so
        # the M axis stays "parallel" (v7x 2-TC shardable); stats reduced in glue.
        y, s_part, q_part = pl.pallas_call(
            conv_partial_stats_kernel,
            out_shape=(jax.ShapeDtypeStruct((Mp, OCp), jnp.bfloat16),
                       jax.ShapeDtypeStruct((n_tiles, OCp), jnp.float32),
                       jax.ShapeDtypeStruct((n_tiles, OCp), jnp.float32)),
            grid=(n_tiles,),
            in_specs=[pl.BlockSpec((TM, K), lambda i: (i, 0)),
                      pl.BlockSpec((K, OCp), lambda i: (0, 0))],
            out_specs=(pl.BlockSpec((TM, OCp), lambda i: (i, 0)),
                       pl.BlockSpec((1, OCp), lambda i: (i, 0)),
                       pl.BlockSpec((1, OCp), lambda i: (i, 0))),
            compiler_params=pltpu.CompilerParams(
                dimension_semantics=("parallel",),
                vmem_limit_bytes=VMEM_LIMIT_BYTES),
        )(p, w)
        mean = jnp.sum(s_part, axis=0, keepdims=True) / M
        var = jnp.maximum(jnp.sum(q_part, axis=0, keepdims=True) / M - mean * mean, 0.0)
        scale = g2d * jax.lax.rsqrt(var + BN_EPS)
        shift = b2d - mean * scale
        out = pl.pallas_call(
            scale_shift_lrelu_kernel,
            out_shape=jax.ShapeDtypeStruct((Mp, OCp), jnp.bfloat16),
            grid=(n_tiles,),
            in_specs=[pl.BlockSpec((TM, OCp), lambda i: (i, 0)),
                      pl.BlockSpec((1, OCp), lambda i: (0, 0)),
                      pl.BlockSpec((1, OCp), lambda i: (0, 0))],
            out_specs=pl.BlockSpec((TM, OCp), lambda i: (i, 0)),
            compiler_params=pltpu.CompilerParams(
                dimension_semantics=("parallel",),
                vmem_limit_bytes=VMEM_LIMIT_BYTES),
        )(y, scale, shift)

    return out[:M, :OC].reshape(N, d["OH"], d["OW"], OC)


def final_conv_sigmoid(x_nhwc, weight, bias):
    # OC=1, M=batch: lane width 1 means fully masked stores and launch overhead
    # exceeds the work -> plain jnp dot + sigmoid.
    N = x_nhwc.shape[0]
    OC, C, KH, KW = weight.shape
    patches, OH, OW = im2col_nhwc(x_nhwc.astype(jnp.float32), KH, 2, 0)
    w2d = weight.transpose(2, 3, 1, 0).reshape(KH * KW * C, OC).astype(jnp.float32)
    out = jax.nn.sigmoid(patches @ w2d + bias.astype(jnp.float32))
    return out.reshape(N, OH, OW, OC).transpose(0, 3, 1, 2)   # -> NCHW


# ---------------------------------------------------------------------------
# Discriminator: parameters + forward
# ---------------------------------------------------------------------------
def init_params(key, channels_img, features_d):
    fd = features_d
    shapes = [
        # (weight shape, has_bias)
        ((fd,     channels_img, 4, 4), True),
        ((fd * 2, fd,           4, 4), False),
        ((fd * 4, fd * 2,       4, 4), False),
        ((fd * 8, fd * 4,       4, 4), False),
        ((1,      fd * 8,       4, 4), True),
    ]
    params = []
    for wshape, has_bias in shapes:
        key, kw, kb = jax.random.split(key, 3)
        oc = wshape[0]
        w = 0.05 * jax.random.normal(kw, wshape, dtype=jnp.float32)
        if has_bias:
            b = 0.05 * jax.random.normal(kb, (oc,), dtype=jnp.float32)
            g = jnp.ones((oc,), jnp.float32)        # unused in bias layers
        else:
            b = jnp.zeros((oc,), jnp.float32)       # BatchNorm beta
            g = jnp.ones((oc,), jnp.float32)        # BatchNorm gamma
        params.append((w, b, g))
    return params


def discriminator_forward(params, x_nchw):
    x = x_nchw.transpose(0, 2, 3, 1)                 # NHWC once, at the edge
    # Block 1: Conv(s=2,p=1) + LeakyReLU(0.2)
    w, b, _ = params[0]
    x = conv_bias_lrelu(x, w, b)
    # Blocks 2-4: Conv(no bias) + BatchNorm2d(batch stats) + LeakyReLU(0.2)
    for idx in (1, 2, 3):
        w, beta, gamma = params[idx]
        x = conv_bn_lrelu(x, w, gamma, beta)
    # Final: Conv(s=2,p=0) + Sigmoid
    w, b, _ = params[4]
    return final_conv_sigmoid(x, w, b)               # [N, 1, 1, 1]


if __name__ == "__main__":
    key = jax.random.PRNGKey(0)
    kx, kp = jax.random.split(key)

    batch, channels_img, features_d = 2, 3, 8
    # DCGAN discriminator expects 64x64 inputs (so the final 4x4 conv -> 1x1).
    x = jax.random.normal(kx, (batch, channels_img, 64, 64), dtype=jnp.float32)
    params = init_params(kp, channels_img, features_d)

    fwd = jax.jit(discriminator_forward)
    out = jax.block_until_ready(fwd(params, x))

    assert out.shape == (batch, 1, 1, 1), out.shape
    assert bool(jnp.all((out >= 0.0) & (out <= 1.0)))
    print("KERNEL_OK")
</pallas_src>

<mosaic_0001>
module attributes {stable_mosaic.version = 11 : i64} {
  func.func @conv_bias_lrelu_kernel(%arg0: i32, %arg1: memref<1024x128xbf16, #tpu.memory_space<vmem>>, %arg2: memref<128x128xbf16, #tpu.memory_space<vmem>>, %arg3: memref<1x128xf32, #tpu.memory_space<vmem>>, %arg4: memref<1024x128xbf16, #tpu.memory_space<vmem>>) attributes {dimension_semantics = [#tpu.dimension_semantics<parallel>], iteration_bounds = array<i64: 2>, scalar_prefetch = 0 : i64, scratch_operands = 0 : i64, tpu.core_type = #tpu.core_type<tc>, window_params = [{transform_indices = @transform_0, window_bounds = array<i64: 1024, 128>}, {pipeline_mode = #tpu.pipeline_mode<synchronous>, transform_indices = @transform_1, window_bounds = array<i64: 128, 128>}, {pipeline_mode = #tpu.pipeline_mode<synchronous>, transform_indices = @transform_2, window_bounds = array<i64: 1, 128>}, {transform_indices = @transform_3, window_bounds = array<i64: 1024, 128>}]} {
    %c0 = arith.constant 0 : index
    %c0_0 = arith.constant 0 : index
    %0 = vector.load %arg1[%c0, %c0_0] : memref<1024x128xbf16, #tpu.memory_space<vmem>>, vector<1024x128xbf16>
    %c0_1 = arith.constant 0 : index
    %c0_2 = arith.constant 0 : index
    %1 = vector.load %arg2[%c0_1, %c0_2] : memref<128x128xbf16, #tpu.memory_space<vmem>>, vector<128x128xbf16>
    %cst = arith.constant dense<0.000000e+00> : vector<1024x128xf32>
    %2 = tpu.matmul %0, %1, %cst {dimension_numbers = #tpu.dot_dimension_numbers<[1], [0], [0], [1], [0, 0, 1, 1], [], []>} : vector<1024x128xbf16>, vector<128x128xbf16>, vector<1024x128xf32> -> vector<1024x128xf32>
    %c0_3 = arith.constant 0 : index
    %c0_4 = arith.constant 0 : index
    %3 = vector.load %arg3[%c0_3, %c0_4] : memref<1x128xf32, #tpu.memory_space<vmem>>, vector<1x128xf32>
    %4 = vector.broadcast %3 : vector<1x128xf32> to vector<1024x128xf32>
    %5 = arith.addf %2, %4 : vector<1024x128xf32>
    %cst_5 = arith.constant 0.000000e+00 : f32
    %6 = vector.broadcast %cst_5 : f32 to vector<1024x128xf32>
    %7 = arith.cmpf oge, %5, %6 : vector<1024x128xf32>
    %cst_6 = arith.constant 2.000000e-01 : f32
    %8 = vector.broadcast %cst_6 : f32 to vector<1024x128xf32>
    %9 = arith.mulf %8, %5 : vector<1024x128xf32>
    %10 = arith.select %7, %5, %9 : vector<1024x128xi1>, vector<1024x128xf32>
    %11 = arith.truncf %10 : vector<1024x128xf32> to vector<1024x128xbf16>
    %c0_7 = arith.constant 0 : index
    %c0_8 = arith.constant 0 : index
    %12 = vector.load %arg4[%c0_7, %c0_8] : memref<1024x128xbf16, #tpu.memory_space<vmem>>, vector<1024x128xbf16>
    tpu.vector_store %arg4[%c0_7, %c0_8], %11 {strides = array<i32>} : memref<1024x128xbf16, #tpu.memory_space<vmem>>, vector<1024x128xbf16>,
    return
  }
  func.func @transform_0(%arg0: i32) -> (i32, i32) {
    %c0_i32 = arith.constant 0 : i32
    %c0_i32_0 = arith.constant 0 : i32
    return %arg0, %c0_i32 : i32, i32
  }
  func.func @transform_1(%arg0: i32) -> (i32, i32) {
    %c0_i32 = arith.constant 0 : i32
    %c0_i32_0 = arith.constant 0 : i32
    %c0_i32_1 = arith.constant 0 : i32
    return %c0_i32, %c0_i32_0 : i32, i32
  }
  func.func @transform_2(%arg0: i32) -> (i32, i32) {
    %c0_i32 = arith.constant 0 : i32
    %c0_i32_0 = arith.constant 0 : i32
    %c0_i32_1 = arith.constant 0 : i32
    return %c0_i32, %c0_i32_0 : i32, i32
  }
  func.func @transform_3(%arg0: i32) -> (i32, i32) {
    %c0_i32 = arith.constant 0 : i32
    %c0_i32_0 = arith.constant 0 : i32
    return %arg0, %c0_i32 : i32, i32
  }
}

module attributes {stable_mosaic.version = 11 : i64} {
  func.func @conv_bn_lrelu_fused_kernel(%arg0: i32, %arg1: i32, %arg2: memref<512x128xbf16, #tpu.memory_space<vmem>>, %arg3: memref<128x128xbf16, #tpu.memory_space<vmem>>, %arg4: memref<1x128xf32, #tpu.memory_space<vmem>>, %arg5: memref<1x128xf32, #tpu.memory_space<vmem>>, %arg6: memref<512x128xbf16, #tpu.memory_space<vmem>>, %arg7: memref<1x512x128xf32, #tpu.memory_space<vmem>>, %arg8: memref<1x128xf32, #tpu.memory_space<vmem>>, %arg9: memref<1x128xf32, #tpu.memory_space<vmem>>, %arg10: memref<1x128xf32, #tpu.memory_space<vmem>>, %arg11: memref<1x128xf32, #tpu.memory_space<vmem>>) attributes {dimension_semantics = [#tpu.dimension_semantics<arbitrary>, #tpu.dimension_semantics<arbitrary>], iteration_bounds = array<i64: 2, 1>, scalar_prefetch = 0 : i64, scratch_operands = 5 : i64, tpu.core_type = #tpu.core_type<tc>, window_params = [{transform_indices = @transform_0, window_bounds = array<i64: 512, 128>}, {pipeline_mode = #tpu.pipeline_mode<synchronous>, transform_indices = @transform_1, window_bounds = array<i64: 128, 128>}, {pipeline_mode = #tpu.pipeline_mode<synchronous>, transform_indices = @transform_2, window_bounds = array<i64: 1, 128>}, {pipeline_mode = #tpu.pipeline_mode<synchronous>, transform_indices = @transform_3, window_bounds = array<i64: 1, 128>}, {transform_indices = @transform_4, window_bounds = array<i64: 512, 128>}]} {
    %c0_i32 = arith.constant 0 : i32
    %0 = arith.cmpi eq, %arg0, %c0_i32 : i32
    %c0_i32_0 = arith.constant 0 : i32
    %1 = arith.cmpi eq, %arg1, %c0_i32_0 : i32
    %2 = arith.andi %0, %1 : i1
    %3 = arith.extui %2 : i1 to i32
    %c0_i32_1 = arith.constant 0 : i32
    %4 = arith.cmpi ne, %3, %c0_i32_1 : i32
    scf.if %4 {
      %cst = arith.constant 0.000000e+00 : f32
      %16 = vector.broadcast %cst : f32 to vector<1x128xf32>
      %c0 = arith.constant 0 : index
      %c0_8 = arith.constant 0 : index
      %17 = vector.load %arg8[%c0, %c0_8] : memref<1x128xf32, #tpu.memory_space<vmem>>, vector<1x128xf32>
      tpu.vector_store %arg8[%c0, %c0_8], %16 {strides = array<i32>} : memref<1x128xf32, #tpu.memory_space<vmem>>, vector<1x128xf32>,
      %cst_9 = arith.constant 0.000000e+00 : f32
      %18 = vector.broadcast %cst_9 : f32 to vector<1x128xf32>
      %c0_10 = arith.constant 0 : index
      %c0_11 = arith.constant 0 : index
      %19 = vector.load %arg9[%c0_10, %c0_11] : memref<1x128xf32, #tpu.memory_space<vmem>>, vector<1x128xf32>
      tpu.vector_store %arg9[%c0_10, %c0_11], %18 {strides = array<i32>} : memref<1x128xf32, #tpu.memory_space<vmem>>, vector<1x128xf32>,
    } else {
    }
    %c0_i32_2 = arith.constant 0 : i32
    %5 = arith.cmpi eq, %arg0, %c0_i32_2 : i32
    %6 = arith.extui %5 : i1 to i32
    %c0_i32_3 = arith.constant 0 : i32
    %7 = arith.cmpi ne, %6, %c0_i32_3 : i32
    scf.if %7 {
      %c0 = arith.constant 0 : index
      %c0_8 = arith.constant 0 : index
      %16 = vector.load %arg2[%c0, %c0_8] : memref<512x128xbf16, #tpu.memory_space<vmem>>, vector<512x128xbf16>
      %c0_9 = arith.constant 0 : index
      %c0_10 = arith.constant 0 : index
      %17 = vector.load %arg3[%c0_9, %c0_10] : memref<128x128xbf16, #tpu.memory_space<vmem>>, vector<128x128xbf16>
      %cst = arith.constant dense<0.000000e+00> : vector<512x128xf32>
      %18 = tpu.matmul %16, %17, %cst {dimension_numbers = #tpu.dot_dimension_numbers<[1], [0], [0], [1], [0, 0, 1, 1], [], []>} : vector<512x128xbf16>, vector<128x128xbf16>, vector<512x128xf32> -> vector<512x128xf32>
      %19 = arith.index_cast %arg1 : i32 to index
      %c0_11 = arith.constant 0 : index
      %c0_12 = arith.constant 0 : index
      %20 = vector.load %arg7[%19, %c0_11, %c0_12] : memref<1x512x128xf32, #tpu.memory_space<vmem>>, vector<1x512x128xf32>
      %21 = vector.shape_cast %20 : vector<1x512x128xf32> to vector<512x128xf32>
      %22 = vector.shape_cast %18 : vector<512x128xf32> to vector<1x512x128xf32>
      tpu.vector_store %arg7[%19, %c0_11, %c0_12], %22 {strides = array<i32>} : memref<1x512x128xf32, #tpu.memory_space<vmem>>, vector<1x512x128xf32>,
      %c0_13 = arith.constant 0 : index
      %c0_14 = arith.constant 0 : index
      %23 = vector.load %arg8[%c0_13, %c0_14] : memref<1x128xf32, #tpu.memory_space<vmem>>, vector<1x128xf32>
      %cst_15 = arith.constant dense<0.000000e+00> : vector<128xf32>
      %24 = vector.multi_reduction <add>, %18, %cst_15 [0] : vector<512x128xf32> to vector<128xf32>
      %25 = vector.shape_cast %24 : vector<128xf32> to vector<1x128xf32>
      %26 = arith.addf %23, %25 : vector<1x128xf32>
      %c0_16 = arith.constant 0 : index
      %c0_17 = arith.constant 0 : index
      %27 = vector.load %arg8[%c0_16, %c0_17] : memref<1x128xf32, #tpu.memory_space<vmem>>, vector<1x128xf32>
      tpu.vector_store %arg8[%c0_16, %c0_17], %26 {strides = array<i32>} : memref<1x128xf32, #tpu.memory_space<vmem>>, vector<1x128xf32>,
      %c0_18 = arith.constant 0 : index
      %c0_19 = arith.constant 0 : index
      %28 = vector.load %arg9[%c0_18, %c0_19] : memref<1x128xf32, #tpu.memory_space<vmem>>, vector<1x128xf32>
      %29 = arith.mulf %18, %18 : vector<512x128xf32>
      %cst_20 = arith.constant dense<0.000000e+00> : vector<128xf32>
      %30 = vector.multi_reduction <add>, %29, %cst_20 [0] : vector<512x128xf32> to vector<128xf32>
      %31 = vector.shape_cast %30 : vector<128xf32> to vector<1x128xf32>
      %32 = arith.addf %28, %31 : vector<1x128xf32>
      %c0_21 = arith.constant 0 : index
      %c0_22 = arith.constant 0 : index
      %33 = vector.load %arg9[%c0_21, %c0_22] : memref<1x128xf32, #tpu.memory_space<vmem>>, vector<1x128xf32>
      tpu.vector_store %arg9[%c0_21, %c0_22], %32 {strides = array<i32>} : memref<1x128xf32, #tpu.memory_space<vmem>>, vector<1x128xf32>,
    } else {
    }
    %c1_i32 = arith.constant 1 : i32
    %8 = arith.cmpi eq, %arg0, %c1_i32 : i32
    %c0_i32_4 = arith.constant 0 : i32
    %9 = arith.cmpi eq, %arg1, %c0_i32_4 : i32
    %10 = arith.andi %8, %9 : i1
    %11 = arith.extui %10 : i1 to i32
    %c0_i32_5 = arith.constant 0 : i32
    %12 = arith.cmpi ne, %11, %c0_i32_5 : i32
    scf.if %12 {
      %c0 = arith.constant 0 : index
      %c0_8 = arith.constant 0 : index
      %16 = vector.load %arg8[%c0, %c0_8] : memref<1x128xf32, #tpu.memory_space<vmem>>, vector<1x128xf32>
      %cst = arith.constant 0.001953125 : f32
      %17 = vector.broadcast %cst : f32 to vector<1x128xf32>
      %18 = arith.mulf %16, %17 : vector<1x128xf32>
      %c0_9 = arith.constant 0 : index
      %c0_10 = arith.constant 0 : index
      %19 = vector.load %arg9[%c0_9, %c0_10] : memref<1x128xf32, #tpu.memory_space<vmem>>, vector<1x128xf32>
      %cst_11 = arith.constant 0.001953125 : f32
      %20 = vector.broadcast %cst_11 : f32 to vector<1x128xf32>
      %21 = arith.mulf %19, %20 : vector<1x128xf32>
      %22 = arith.mulf %18, %18 : vector<1x128xf32>
      %23 = arith.subf %21, %22 : vector<1x128xf32>
      %cst_12 = arith.constant 0.000000e+00 : f32
      %24 = vector.broadcast %cst_12 : f32 to vector<1x128xf32>
      %25 = arith.maximumf %23, %24 : vector<1x128xf32>
      %c0_13 = arith.constant 0 : index
      %c0_14 = arith.constant 0 : index
      %26 = vector.load %arg4[%c0_13, %c0_14] : memref<1x128xf32, #tpu.memory_space<vmem>>, vector<1x128xf32>
      %cst_15 = arith.constant 9.99999974E-6 : f32
      %27 = vector.broadcast %cst_15 : f32 to vector<1x128xf32>
      %28 = arith.addf %25, %27 : vector<1x128xf32>
      %29 = math.rsqrt %28 : vector<1x128xf32>
      %30 = arith.mulf %26, %29 : vector<1x128xf32>
      %c0_16 = arith.constant 0 : index
      %c0_17 = arith.constant 0 : index
      %31 = vector.load %arg10[%c0_16, %c0_17] : memref<1x128xf32, #tpu.memory_space<vmem>>, vector<1x128xf32>
      tpu.vector_store %arg10[%c0_16, %c0_17], %30 {strides = array<i32>} : memref<1x128xf32, #tpu.memory_space<vmem>>, vector<1x128xf32>,
      %c0_18 = arith.constant 0 : index
      %c0_19 = arith.constant 0 : index
      %32 = vector.load %arg5[%c0_18, %c0_19] : memref<1x128xf32, #tpu.memory_space<vmem>>, vector<1x128xf32>
      %33 = arith.mulf %18, %30 : vector<1x128xf32>
      %34 = arith.subf %32, %33 : vector<1x128xf32>
      %c0_20 = arith.constant 0 : index
      %c0_21 = arith.constant 0 : index
      %35 = vector.load %arg11[%c0_20, %c0_21] : memref<1x128xf32, #tpu.memory_space<vmem>>, vector<1x128xf32>
      tpu.vector_store %arg11[%c0_20, %c0_21], %34 {strides = array<i32>} : memref<1x128xf32, #tpu.memory_space<vmem>>, vector<1x128xf32>,
    } else {
    }
    %c1_i32_6 = arith.constant 1 : i32
    %13 = arith.cmpi eq, %arg0, %c1_i32_6 : i32
    %14 = arith.extui %13 : i1 to i32
    %c0_i32_7 = arith.constant 0 : i32
    %15 = arith.cmpi ne, %14, %c0_i32_7 : i32
    scf.if %15 {
      %16 = arith.index_cast %arg1 : i32 to index
      %c0 = arith.constant 0 : index
      %c0_8 = arith.constant 0 : index
      %17 = vector.load %arg7[%16, %c0, %c0_8] : memref<1x512x128xf32, #tpu.memory_space<vmem>>, vector<1x512x128xf32>
      %18 = vector.shape_cast %17 : vector<1x512x128xf32> to vector<512x128xf32>
      %c0_9 = arith.constant 0 : index
      %c0_10 = arith.constant 0 : index
      %19 = vector.load %arg10[%c0_9, %c0_10] : memref<1x128xf32, #tpu.memory_space<vmem>>, vector<1x128xf32>
      %20 = vector.broadcast %19 : vector<1x128xf32> to vector<512x128xf32>
      %21 = arith.mulf %18, %20 : vector<512x128xf32>
      %c0_11 = arith.constant 0 : index
      %c0_12 = arith.constant 0 : index
      %22 = vector.load %arg11[%c0_11, %c0_12] : memref<1x128xf32, #tpu.memory_space<vmem>>, vector<1x128xf32>
      %23 = vector.broadcast %22 : vector<1x128xf32> to vector<512x128xf32>
      %24 = arith.addf %21, %23 : vector<512x128xf32>
      %cst = arith.constant 0.000000e+00 : f32
      %25 = vector.broadcast %cst : f32 to vector<512x128xf32>
      %26 = arith.cmpf oge, %24, %25 : vector<512x128xf32>
      %cst_13 = arith.constant 2.000000e-01 : f32
      %27 = vector.broadcast %cst_13 : f32 to vector<512x128xf32>
      %28 = arith.mulf %27, %24 : vector<512x128xf32>
      %29 = arith.select %26, %24, %28 : vector<512x128xi1>, vector<512x128xf32>
      %30 = arith.truncf %29 : vector<512x128xf32> to vector<512x128xbf16>
      %c0_14 = arith.constant 0 : index
      %c0_15 = arith.constant 0 : index
      %31 = vector.load %arg6[%c0_14, %c0_15] : memref<512x128xbf16, #tpu.memory_space<vmem>>, vector<512x128xbf16>
      tpu.vector_store %arg6[%c0_14, %c0_15], %30 {strides = array<i32>} : memref<512x128xbf16, #tpu.memory_space<vmem>>, vector<512x128xbf16>,
    } else {
    }
    return
  }
  func.func @transform_0(%arg0: i32, %arg1: i32) -> (i32, i32) {
    %c1_i32 = arith.constant 1 : i32
    %0 = arith.subi %c1_i32, %arg0 : i32
    %1 = arith.muli %arg1, %0 : i32
    %c0_i32 = arith.constant 0 : i32
    %c0_i32_0 = arith.constant 0 : i32
    return %1, %c0_i32 : i32, i32
  }
  func.func @transform_1(%arg0: i32, %arg1: i32) -> (i32, i32) {
    %c0_i32 = arith.constant 0 : i32
    %c0_i32_0 = arith.constant 0 : i32
    %c0_i32_1 = arith.constant 0 : i32
    return %c0_i32, %c0_i32_0 : i32, i32
  }
  func.func @transform_2(%arg0: i32, %arg1: i32) -> (i32, i32) {
    %c0_i32 = arith.constant 0 : i32
    %c0_i32_0 = arith.constant 0 : i32
    %c0_i32_1 = arith.constant 0 : i32
    return %c0_i32, %c0_i32_0 : i32, i32
  }
  func.func @transform_3(%arg0: i32, %arg1: i32) -> (i32, i32) {
    %c0_i32 = arith.constant 0 : i32
    %c0_i32_0 = arith.constant 0 : i32
    %c0_i32_1 = arith.constant 0 : i32
    return %c0_i32, %c0_i32_0 : i32, i32
  }
  func.func @transform_4(%arg0: i32, %arg1: i32) -> (i32, i32) {
    %0 = arith.muli %arg0, %arg1 : i32
    %c0_i32 = arith.constant 0 : i32
    %c0_i32_0 = arith.constant 0 : i32
    return %0, %c0_i32 : i32, i32
  }
}

module attributes {stable_mosaic.version = 11 : i64} {
  func.func @conv_bn_lrelu_fused_kernel(%arg0: i32, %arg1: i32, %arg2: memref<128x256xbf16, #tpu.memory_space<vmem>>, %arg3: memref<256x128xbf16, #tpu.memory_space<vmem>>, %arg4: memref<1x128xf32, #tpu.memory_space<vmem>>, %arg5: memref<1x128xf32, #tpu.memory_space<vmem>>, %arg6: memref<128x128xbf16, #tpu.memory_space<vmem>>, %arg7: memref<1x128x128xf32, #tpu.memory_space<vmem>>, %arg8: memref<1x128xf32, #tpu.memory_space<vmem>>, %arg9: memref<1x128xf32, #tpu.memory_space<vmem>>, %arg10: memref<1x128xf32, #tpu.memory_space<vmem>>, %arg11: memref<1x128xf32, #tpu.memory_space<vmem>>) attributes {dimension_semantics = [#tpu.dimension_semantics<arbitrary>, #tpu.dimension_semantics<arbitrary>], iteration_bounds = array<i64: 2, 1>, scalar_prefetch = 0 : i64, scratch_operands = 5 : i64, tpu.core_type = #tpu.core_type<tc>, window_params = [{transform_indices = @transform_0, window_bounds = array<i64: 128, 256>}, {pipeline_mode = #tpu.pipeline_mode<synchronous>, transform_indices = @transform_1, window_bounds = array<i64: 256, 128>}, {pipeline_mode = #tpu.pipeline_mode<synchronous>, transform_indices = @transform_2, window_bounds = array<i64: 1, 128>}, {pipeline_mode = #tpu.pipeline_mode<synchronous>, transform_indices = @transform_3, window_bounds = array<i64: 1, 128>}, {transform_indices = @transform_4, window_bounds = array<i64: 128, 128>}]} {
    %c0_i32 = arith.constant 0 : i32
    %0 = arith.cmpi eq, %arg0, %c0_i32 : i32
    %c0_i32_0 = arith.constant 0 : i32
    %1 = arith.cmpi eq, %arg1, %c0_i32_0 : i32
    %2 = arith.andi %0, %1 : i1
    %3 = arith.extui %2 : i1 to i32
    %c0_i32_1 = arith.constant 0 : i32
    %4 = arith.cmpi ne, %3, %c0_i32_1 : i32
    scf.if %4 {
      %cst = arith.constant 0.000000e+00 : f32
      %16 = vector.broadcast %cst : f32 to vector<1x128xf32>
      %c0 = arith.constant 0 : index
      %c0_8 = arith.constant 0 : index
      %17 = vector.load %arg8[%c0, %c0_8] : memref<1x128xf32, #tpu.memory_space<vmem>>, vector<1x128xf32>
      tpu.vector_store %arg8[%c0, %c0_8], %16 {strides = array<i32>} : memref<1x128xf32, #tpu.memory_space<vmem>>, vector<1x128xf32>,
      %cst_9 = arith.constant 0.000000e+00 : f32
      %18 = vector.broadcast %cst_9 : f32 to vector<1x128xf32>
      %c0_10 = arith.constant 0 : index
      %c0_11 = arith.constant 0 : index
      %19 = vector.load %arg9[%c0_10, %c0_11] : memref<1x128xf32, #tpu.memory_space<vmem>>, vector<1x128xf32>
      tpu.vector_store %arg9[%c0_10, %c0_11], %18 {strides = array<i32>} : memref<1x128xf32, #tpu.memory_space<vmem>>, vector<1x128xf32>,
    } else {
    }
    %c0_i32_2 = arith.constant 0 : i32
    %5 = arith.cmpi eq, %arg0, %c0_i32_2 : i32
    %6 = arith.extui %5 : i1 to i32
    %c0_i32_3 = arith.constant 0 : i32
    %7 = arith.cmpi ne, %6, %c0_i32_3 : i32
    scf.if %7 {
      %c0 = arith.constant 0 : index
      %c0_8 = arith.constant 0 : index
      %16 = vector.load %arg2[%c0, %c0_8] : memref<128x256xbf16, #tpu.memory_space<vmem>>, vector<128x256xbf16>
      %c0_9 = arith.constant 0 : index
      %c0_10 = arith.constant 0 : index
      %17 = vector.load %arg3[%c0_9, %c0_10] : memref<256x128xbf16, #tpu.memory_space<vmem>>, vector<256x128xbf16>
      %cst = arith.constant dense<0.000000e+00> : vector<128x128xf32>
      %18 = tpu.matmul %16, %17, %cst {dimension_numbers = #tpu.dot_dimension_numbers<[1], [0], [0], [1], [0, 0, 1, 1], [], []>} : vector<128x256xbf16>, vector<256x128xbf16>, vector<128x128xf32> -> vector<128x128xf32>
      %19 = arith.index_cast %arg1 : i32 to index
      %c0_11 = arith.constant 0 : index
      %c0_12 = arith.constant 0 : index
      %20 = vector.load %arg7[%19, %c0_11, %c0_12] : memref<1x128x128xf32, #tpu.memory_space<vmem>>, vector<1x128x128xf32>
      %21 = vector.shape_cast %20 : vector<1x128x128xf32> to vector<128x128xf32>
      %22 = vector.shape_cast %18 : vector<128x128xf32> to vector<1x128x128xf32>
      tpu.vector_store %arg7[%19, %c0_11, %c0_12], %22 {strides = array<i32>} : memref<1x128x128xf32, #tpu.memory_space<vmem>>, vector<1x128x128xf32>,
      %c0_13 = arith.constant 0 : index
      %c0_14 = arith.constant 0 : index
      %23 = vector.load %arg8[%c0_13, %c0_14] : memref<1x128xf32, #tpu.memory_space<vmem>>, vector<1x128xf32>
      %cst_15 = arith.constant dense<0.000000e+00> : vector<128xf32>
      %24 = vector.multi_reduction <add>, %18, %cst_15 [0] : vector<128x128xf32> to vector<128xf32>
      %25 = vector.shape_cast %24 : vector<128xf32> to vector<1x128xf32>
      %26 = arith.addf %23, %25 : vector<1x128xf32>
      %c0_16 = arith.constant 0 : index
      %c0_17 = arith.constant 0 : index
      %27 = vector.load %arg8[%c0_16, %c0_17] : memref<1x128xf32, #tpu.memory_space<vmem>>, vector<1x128xf32>
      tpu.vector_store %arg8[%c0_16, %c0_17], %26 {strides = array<i32>} : memref<1x128xf32, #tpu.memory_space<vmem>>, vector<1x128xf32>,
      %c0_18 = arith.constant 0 : index
      %c0_19 = arith.constant 0 : index
      %28 = vector.load %arg9[%c0_18, %c0_19] : memref<1x128xf32, #tpu.memory_space<vmem>>, vector<1x128xf32>
      %29 = arith.mulf %18, %18 : vector<128x128xf32>
      %cst_20 = arith.constant dense<0.000000e+00> : vector<128xf32>
      %30 = vector.multi_reduction <add>, %29, %cst_20 [0] : vector<128x128xf32> to vector<128xf32>
      %31 = vector.shape_cast %30 : vector<128xf32> to vector<1x128xf32>
      %32 = arith.addf %28, %31 : vector<1x128xf32>
      %c0_21 = arith.constant 0 : index
      %c0_22 = arith.constant 0 : index
      %33 = vector.load %arg9[%c0_21, %c0_22] : memref<1x128xf32, #tpu.memory_space<vmem>>, vector<1x128xf32>
      tpu.vector_store %arg9[%c0_21, %c0_22], %32 {strides = array<i32>} : memref<1x128xf32, #tpu.memory_space<vmem>>, vector<1x128xf32>,
    } else {
    }
    %c1_i32 = arith.constant 1 : i32
    %8 = arith.cmpi eq, %arg0, %c1_i32 : i32
    %c0_i32_4 = arith.constant 0 : i32
    %9 = arith.cmpi eq, %arg1, %c0_i32_4 : i32
    %10 = arith.andi %8, %9 : i1
    %11 = arith.extui %10 : i1 to i32
    %c0_i32_5 = arith.constant 0 : i32
    %12 = arith.cmpi ne, %11, %c0_i32_5 : i32
    scf.if %12 {
      %c0 = arith.constant 0 : index
      %c0_8 = arith.constant 0 : index
      %16 = vector.load %arg8[%c0, %c0_8] : memref<1x128xf32, #tpu.memory_space<vmem>>, vector<1x128xf32>
      %cst = arith.constant 7.812500e-03 : f32
      %17 = vector.broadcast %cst : f32 to vector<1x128xf32>
      %18 = arith.mulf %16, %17 : vector<1x128xf32>
      %c0_9 = arith.constant 0 : index
      %c0_10 = arith.constant 0 : index
      %19 = vector.load %arg9[%c0_9, %c0_10] : memref<1x128xf32, #tpu.memory_space<vmem>>, vector<1x128xf32>
      %cst_11 = arith.constant 7.812500e-03 : f32
      %20 = vector.broadcast %cst_11 : f32 to vector<1x128xf32>
      %21 = arith.mulf %19, %20 : vector<1x128xf32>
      %22 = arith.mulf %18, %18 : vector<1x128xf32>
      %23 = arith.subf %21, %22 : vector<1x128xf32>
      %cst_12 = arith.constant 0.000000e+00 : f32
      %24 = vector.broadcast %cst_12 : f32 to vector<1x128xf32>
      %25 = arith.maximumf %23, %24 : vector<1x128xf32>
      %c0_13 = arith.constant 0 : index
      %c0_14 = arith.constant 0 : index
      %26 = vector.load %arg4[%c0_13, %c0_14] : memref<1x128xf32, #tpu.memory_space<vmem>>, vector<1x128xf32>
      %cst_15 = arith.constant 9.99999974E-6 : f32
      %27 = vector.broadcast %cst_15 : f32 to vector<1x128xf32>
      %28 = arith.addf %25, %27 : vector<1x128xf32>
      %29 = math.rsqrt %28 : vector<1x128xf32>
      %30 = arith.mulf %26, %29 : vector<1x128xf32>
      %c0_16 = arith.constant 0 : index
      %c0_17 = arith.constant 0 : index
      %31 = vector.load %arg10[%c0_16, %c0_17] : memref<1x128xf32, #tpu.memory_space<vmem>>, vector<1x128xf32>
      tpu.vector_store %arg10[%c0_16, %c0_17], %30 {strides = array<i32>} : memref<1x128xf32, #tpu.memory_space<vmem>>, vector<1x128xf32>,
      %c0_18 = arith.constant 0 : index
      %c0_19 = arith.constant 0 : index
      %32 = vector.load %arg5[%c0_18, %c0_19] : memref<1x128xf32, #tpu.memory_space<vmem>>, vector<1x128xf32>
      %33 = arith.mulf %18, %30 : vector<1x128xf32>
      %34 = arith.subf %32, %33 : vector<1x128xf32>
      %c0_20 = arith.constant 0 : index
      %c0_21 = arith.constant 0 : index
      %35 = vector.load %arg11[%c0_20, %c0_21] : memref<1x128xf32, #tpu.memory_space<vmem>>, vector<1x128xf32>
      tpu.vector_store %arg11[%c0_20, %c0_21], %34 {strides = array<i32>} : memref<1x128xf32, #tpu.memory_space<vmem>>, vector<1x128xf32>,
    } else {
    }
    %c1_i32_6 = arith.constant 1 : i32
    %13 = arith.cmpi eq, %arg0, %c1_i32_6 : i32
    %14 = arith.extui %13 : i1 to i32
    %c0_i32_7 = arith.constant 0 : i32
    %15 = arith.cmpi ne, %14, %c0_i32_7 : i32
    scf.if %15 {
      %16 = arith.index_cast %arg1 : i32 to index
      %c0 = arith.constant 0 : index
      %c0_8 = arith.constant 0 : index
      %17 = vector.load %arg7[%16, %c0, %c0_8] : memref<1x128x128xf32, #tpu.memory_space<vmem>>, vector<1x128x128xf32>
      %18 = vector.shape_cast %17 : vector<1x128x128xf32> to vector<128x128xf32>
      %c0_9 = arith.constant 0 : index
      %c0_10 = arith.constant 0 : index
      %19 = vector.load %arg10[%c0_9, %c0_10] : memref<1x128xf32, #tpu.memory_space<vmem>>, vector<1x128xf32>
      %20 = vector.broadcast %19 : vector<1x128xf32> to vector<128x128xf32>
      %21 = arith.mulf %18, %20 : vector<128x128xf32>
      %c0_11 = arith.constant 0 : index
      %c0_12 = arith.constant 0 : index
      %22 = vector.load %arg11[%c0_11, %c0_12] : memref<1x128xf32, #tpu.memory_space<vmem>>, vector<1x128xf32>
      %23 = vector.broadcast %22 : vector<1x128xf32> to vector<128x128xf32>
      %24 = arith.addf %21, %23 : vector<128x128xf32>
      %cst = arith.constant 0.000000e+00 : f32
      %25 = vector.broadcast %cst : f32 to vector<128x128xf32>
      %26 = arith.cmpf oge, %24, %25 : vector<128x128xf32>
      %cst_13 = arith.constant 2.000000e-01 : f32
      %27 = vector.broadcast %cst_13 : f32 to vector<128x128xf32>
      %28 = arith.mulf %27, %24 : vector<128x128xf32>
      %29 = arith.select %26, %24, %28 : vector<128x128xi1>, vector<128x128xf32>
      %30 = arith.truncf %29 : vector<128x128xf32> to vector<128x128xbf16>
      %c0_14 = arith.constant 0 : index
      %c0_15 = arith.constant 0 : index
      %31 = vector.load %arg6[%c0_14, %c0_15] : memref<128x128xbf16, #tpu.memory_space<vmem>>, vector<128x128xbf16>
      tpu.vector_store %arg6[%c0_14, %c0_15], %30 {strides = array<i32>} : memref<128x128xbf16, #tpu.memory_space<vmem>>, vector<128x128xbf16>,
    } else {
    }
    return
  }
  func.func @transform_0(%arg0: i32, %arg1: i32) -> (i32, i32) {
    %c1_i32 = arith.constant 1 : i32
    %0 = arith.subi %c1_i32, %arg0 : i32
    %1 = arith.muli %arg1, %0 : i32
    %c0_i32 = arith.constant 0 : i32
    %c0_i32_0 = arith.constant 0 : i32
    return %1, %c0_i32 : i32, i32
  }
  func.func @transform_1(%arg0: i32, %arg1: i32) -> (i32, i32) {
    %c0_i32 = arith.constant 0 : i32
    %c0_i32_0 = arith.constant 0 : i32
    %c0_i32_1 = arith.constant 0 : i32
    return %c0_i32, %c0_i32_0 : i32, i32
  }
  func.func @transform_2(%arg0: i32, %arg1: i32) -> (i32, i32) {
    %c0_i32 = arith.constant 0 : i32
    %c0_i32_0 = arith.constant 0 : i32
    %c0_i32_1 = arith.constant 0 : i32
    return %c0_i32, %c0_i32_0 : i32, i32
  }
  func.func @transform_3(%arg0: i32, %arg1: i32) -> (i32, i32) {
    %c0_i32 = arith.constant 0 : i32
    %c0_i32_0 = arith.constant 0 : i32
    %c0_i32_1 = arith.constant 0 : i32
    return %c0_i32, %c0_i32_0 : i32, i32
  }
  func.func @transform_4(%arg0: i32, %arg1: i32) -> (i32, i32) {
    %0 = arith.muli %arg0, %arg1 : i32
    %c0_i32 = arith.constant 0 : i32
    %c0_i32_0 = arith.constant 0 : i32
    return %0, %c0_i32 : i32, i32
  }
}

module attributes {stable_mosaic.version = 11 : i64} {
  func.func @conv_bn_lrelu_fused_kernel(%arg0: i32, %arg1: i32, %arg2: memref<32x512xbf16, #tpu.memory_space<vmem>>, %arg3: memref<512x128xbf16, #tpu.memory_space<vmem>>, %arg4: memref<1x128xf32, #tpu.memory_space<vmem>>, %arg5: memref<1x128xf32, #tpu.memory_space<vmem>>, %arg6: memref<32x128xbf16, #tpu.memory_space<vmem>>, %arg7: memref<1x32x128xf32, #tpu.memory_space<vmem>>, %arg8: memref<1x128xf32, #tpu.memory_space<vmem>>, %arg9: memref<1x128xf32, #tpu.memory_space<vmem>>, %arg10: memref<1x128xf32, #tpu.memory_space<vmem>>, %arg11: memref<1x128xf32, #tpu.memory_space<vmem>>) attributes {dimension_semantics = [#tpu.dimension_semantics<arbitrary>, #tpu.dimension_semantics<arbitrary>], iteration_bounds = array<i64: 2, 1>, scalar_prefetch = 0 : i64, scratch_operands = 5 : i64, tpu.core_type = #tpu.core_type<tc>, window_params = [{transform_indices = @transform_0, window_bounds = array<i64: 32, 512>}, {pipeline_mode = #tpu.pipeline_mode<synchronous>, transform_indices = @transform_1, window_bounds = array<i64: 512, 128>}, {pipeline_mode = #tpu.pipeline_mode<synchronous>, transform_indices = @transform_2, window_bounds = array<i64: 1, 128>}, {pipeline_mode = #tpu.pipeline_mode<synchronous>, transform_indices = @transform_3, window_bounds = array<i64: 1, 128>}, {transform_indices = @transform_4, window_bounds = array<i64: 32, 128>}]} {
    %c0_i32 = arith.constant 0 : i32
    %0 = arith.cmpi eq, %arg0, %c0_i32 : i32
    %c0_i32_0 = arith.constant 0 : i32
    %1 = arith.cmpi eq, %arg1, %c0_i32_0 : i32
    %2 = arith.andi %0, %1 : i1
    %3 = arith.extui %2 : i1 to i32
    %c0_i32_1 = arith.constant 0 : i32
    %4 = arith.cmpi ne, %3, %c0_i32_1 : i32
    scf.if %4 {
      %cst = arith.constant 0.000000e+00 : f32
      %16 = vector.broadcast %cst : f32 to vector<1x128xf32>
      %c0 = arith.constant 0 : index
      %c0_8 = arith.constant 0 : index
      %17 = vector.load %arg8[%c0, %c0_8] : memref<1x128xf32, #tpu.memory_space<vmem>>, vector<1x128xf32>
      tpu.vector_store %arg8[%c0, %c0_8], %16 {strides = array<i32>} : memref<1x128xf32, #tpu.memory_space<vmem>>, vector<1x128xf32>,
      %cst_9 = arith.constant 0.000000e+00 : f32
      %18 = vector.broadcast %cst_9 : f32 to vector<1x128xf32>
      %c0_10 = arith.constant 0 : index
      %c0_11 = arith.constant 0 : index
      %19 = vector.load %arg9[%c0_10, %c0_11] : memref<1x128xf32, #tpu.memory_space<vmem>>, vector<1x128xf32>
      tpu.vector_store %arg9[%c0_10, %c0_11], %18 {strides = array<i32>} : memref<1x128xf32, #tpu.memory_space<vmem>>, vector<1x128xf32>,
    } else {
    }
    %c0_i32_2 = arith.constant 0 : i32
    %5 = arith.cmpi eq, %arg0, %c0_i32_2 : i32
    %6 = arith.extui %5 : i1 to i32
    %c0_i32_3 = arith.constant 0 : i32
    %7 = arith.cmpi ne, %6, %c0_i32_3 : i32
    scf.if %7 {
      %c0 = arith.constant 0 : index
      %c0_8 = arith.constant 0 : index
      %16 = vector.load %arg2[%c0, %c0_8] : memref<32x512xbf16, #tpu.memory_space<vmem>>, vector<32x512xbf16>
      %c0_9 = arith.constant 0 : index
      %c0_10 = arith.constant 0 : index
      %17 = vector.load %arg3[%c0_9, %c0_10] : memref<512x128xbf16, #tpu.memory_space<vmem>>, vector<512x128xbf16>
      %cst = arith.constant dense<0.000000e+00> : vector<32x128xf32>
      %18 = tpu.matmul %16, %17, %cst {dimension_numbers = #tpu.dot_dimension_numbers<[1], [0], [0], [1], [0, 0, 1, 1], [], []>} : vector<32x512xbf16>, vector<512x128xbf16>, vector<32x128xf32> -> vector<32x128xf32>
      %19 = arith.index_cast %arg1 : i32 to index
      %c0_11 = arith.constant 0 : index
      %c0_12 = arith.constant 0 : index
      %20 = vector.load %arg7[%19, %c0_11, %c0_12] : memref<1x32x128xf32, #tpu.memory_space<vmem>>, vector<1x32x128xf32>
      %21 = vector.shape_cast %20 : vector<1x32x128xf32> to vector<32x128xf32>
      %22 = vector.shape_cast %18 : vector<32x128xf32> to vector<1x32x128xf32>
      tpu.vector_store %arg7[%19, %c0_11, %c0_12], %22 {strides = array<i32>} : memref<1x32x128xf32, #tpu.memory_space<vmem>>, vector<1x32x128xf32>,
      %c0_13 = arith.constant 0 : index
      %c0_14 = arith.constant 0 : index
      %23 = vector.load %arg8[%c0_13, %c0_14] : memref<1x128xf32, #tpu.memory_space<vmem>>, vector<1x128xf32>
      %cst_15 = arith.constant dense<0.000000e+00> : vector<128xf32>
      %24 = vector.multi_reduction <add>, %18, %cst_15 [0] : vector<32x128xf32> to vector<128xf32>
      %25 = vector.shape_cast %24 : vector<128xf32> to vector<1x128xf32>
      %26 = arith.addf %23, %25 : vector<1x128xf32>
      %c0_16 = arith.constant 0 : index
      %c0_17 = arith.constant 0 : index
      %27 = vector.load %arg8[%c0_16, %c0_17] : memref<1x128xf32, #tpu.memory_space<vmem>>, vector<1x128xf32>
      tpu.vector_store %arg8[%c0_16, %c0_17], %26 {strides = array<i32>} : memref<1x128xf32, #tpu.memory_space<vmem>>, vector<1x128xf32>,
      %c0_18 = arith.constant 0 : index
      %c0_19 = arith.constant 0 : index
      %28 = vector.load %arg9[%c0_18, %c0_19] : memref<1x128xf32, #tpu.memory_space<vmem>>, vector<1x128xf32>
      %29 = arith.mulf %18, %18 : vector<32x128xf32>
      %cst_20 = arith.constant dense<0.000000e+00> : vector<128xf32>
      %30 = vector.multi_reduction <add>, %29, %cst_20 [0] : vector<32x128xf32> to vector<128xf32>
      %31 = vector.shape_cast %30 : vector<128xf32> to vector<1x128xf32>
      %32 = arith.addf %28, %31 : vector<1x128xf32>
      %c0_21 = arith.constant 0 : index
      %c0_22 = arith.constant 0 : index
      %33 = vector.load %arg9[%c0_21, %c0_22] : memref<1x128xf32, #tpu.memory_space<vmem>>, vector<1x128xf32>
      tpu.vector_store %arg9[%c0_21, %c0_22], %32 {strides = array<i32>} : memref<1x128xf32, #tpu.memory_space<vmem>>, vector<1x128xf32>,
    } else {
    }
    %c1_i32 = arith.constant 1 : i32
    %8 = arith.cmpi eq, %arg0, %c1_i32 : i32
    %c0_i32_4 = arith.constant 0 : i32
    %9 = arith.cmpi eq, %arg1, %c0_i32_4 : i32
    %10 = arith.andi %8, %9 : i1
    %11 = arith.extui %10 : i1 to i32
    %c0_i32_5 = arith.constant 0 : i32
    %12 = arith.cmpi ne, %11, %c0_i32_5 : i32
    scf.if %12 {
      %c0 = arith.constant 0 : index
      %c0_8 = arith.constant 0 : index
      %16 = vector.load %arg8[%c0, %c0_8] : memref<1x128xf32, #tpu.memory_space<vmem>>, vector<1x128xf32>
      %cst = arith.constant 3.125000e-02 : f32
      %17 = vector.broadcast %cst : f32 to vector<1x128xf32>
      %18 = arith.mulf %16, %17 : vector<1x128xf32>
      %c0_9 = arith.constant 0 : index
      %c0_10 = arith.constant 0 : index
      %19 = vector.load %arg9[%c0_9, %c0_10] : memref<1x128xf32, #tpu.memory_space<vmem>>, vector<1x128xf32>
      %cst_11 = arith.constant 3.125000e-02 : f32
      %20 = vector.broadcast %cst_11 : f32 to vector<1x128xf32>
      %21 = arith.mulf %19, %20 : vector<1x128xf32>
      %22 = arith.mulf %18, %18 : vector<1x128xf32>
      %23 = arith.subf %21, %22 : vector<1x128xf32>
      %cst_12 = arith.constant 0.000000e+00 : f32
      %24 = vector.broadcast %cst_12 : f32 to vector<1x128xf32>
      %25 = arith.maximumf %23, %24 : vector<1x128xf32>
      %c0_13 = arith.constant 0 : index
      %c0_14 = arith.constant 0 : index
      %26 = vector.load %arg4[%c0_13, %c0_14] : memref<1x128xf32, #tpu.memory_space<vmem>>, vector<1x128xf32>
      %cst_15 = arith.constant 9.99999974E-6 : f32
      %27 = vector.broadcast %cst_15 : f32 to vector<1x128xf32>
      %28 = arith.addf %25, %27 : vector<1x128xf32>
      %29 = math.rsqrt %28 : vector<1x128xf32>
      %30 = arith.mulf %26, %29 : vector<1x128xf32>
      %c0_16 = arith.constant 0 : index
      %c0_17 = arith.constant 0 : index
      %31 = vector.load %arg10[%c0_16, %c0_17] : memref<1x128xf32, #tpu.memory_space<vmem>>, vector<1x128xf32>
      tpu.vector_store %arg10[%c0_16, %c0_17], %30 {strides = array<i32>} : memref<1x128xf32, #tpu.memory_space<vmem>>, vector<1x128xf32>,
      %c0_18 = arith.constant 0 : index
      %c0_19 = arith.constant 0 : index
      %32 = vector.load %arg5[%c0_18, %c0_19] : memref<1x128xf32, #tpu.memory_space<vmem>>, vector<1x128xf32>
      %33 = arith.mulf %18, %30 : vector<1x128xf32>
      %34 = arith.subf %32, %33 : vector<1x128xf32>
      %c0_20 = arith.constant 0 : index
      %c0_21 = arith.constant 0 : index
      %35 = vector.load %arg11[%c0_20, %c0_21] : memref<1x128xf32, #tpu.memory_space<vmem>>, vector<1x128xf32>
      tpu.vector_store %arg11[%c0_20, %c0_21], %34 {strides = array<i32>} : memref<1x128xf32, #tpu.memory_space<vmem>>, vector<1x128xf32>,
    } else {
    }
    %c1_i32_6 = arith.constant 1 : i32
    %13 = arith.cmpi eq, %arg0, %c1_i32_6 : i32
    %14 = arith.extui %13 : i1 to i32
    %c0_i32_7 = arith.constant 0 : i32
    %15 = arith.cmpi ne, %14, %c0_i32_7 : i32
    scf.if %15 {
      %16 = arith.index_cast %arg1 : i32 to index
      %c0 = arith.constant 0 : index
      %c0_8 = arith.constant 0 : index
      %17 = vector.load %arg7[%16, %c0, %c0_8] : memref<1x32x128xf32, #tpu.memory_space<vmem>>, vector<1x32x128xf32>
      %18 = vector.shape_cast %17 : vector<1x32x128xf32> to vector<32x128xf32>
      %c0_9 = arith.constant 0 : index
      %c0_10 = arith.constant 0 : index
      %19 = vector.load %arg10[%c0_9, %c0_10] : memref<1x128xf32, #tpu.memory_space<vmem>>, vector<1x128xf32>
      %20 = vector.broadcast %19 : vector<1x128xf32> to vector<32x128xf32>
      %21 = arith.mulf %18, %20 : vector<32x128xf32>
      %c0_11 = arith.constant 0 : index
      %c0_12 = arith.constant 0 : index
      %22 = vector.load %arg11[%c0_11, %c0_12] : memref<1x128xf32, #tpu.memory_space<vmem>>, vector<1x128xf32>
      %23 = vector.broadcast %22 : vector<1x128xf32> to vector<32x128xf32>
      %24 = arith.addf %21, %23 : vector<32x128xf32>
      %cst = arith.constant 0.000000e+00 : f32
      %25 = vector.broadcast %cst : f32 to vector<32x128xf32>
      %26 = arith.cmpf oge, %24, %25 : vector<32x128xf32>
      %cst_13 = arith.constant 2.000000e-01 : f32
      %27 = vector.broadcast %cst_13 : f32 to vector<32x128xf32>
      %28 = arith.mulf %27, %24 : vector<32x128xf32>
      %29 = arith.select %26, %24, %28 : vector<32x128xi1>, vector<32x128xf32>
      %30 = arith.truncf %29 : vector<32x128xf32> to vector<32x128xbf16>
      %c0_14 = arith.constant 0 : index
      %c0_15 = arith.constant 0 : index
      %31 = vector.load %arg6[%c0_14, %c0_15] : memref<32x128xbf16, #tpu.memory_space<vmem>>, vector<32x128xbf16>
      tpu.vector_store %arg6[%c0_14, %c0_15], %30 {strides = array<i32>} : memref<32x128xbf16, #tpu.memory_space<vmem>>, vector<32x128xbf16>,
    } else {
    }
    return
  }
  func.func @transform_0(%arg0: i32, %arg1: i32) -> (i32, i32) {
    %c1_i32 = arith.constant 1 : i32
    %0 = arith.subi %c1_i32, %arg0 : i32
    %1 = arith.muli %arg1, %0 : i32
    %c0_i32 = arith.constant 0 : i32
    %c0_i32_0 = arith.constant 0 : i32
    return %1, %c0_i32 : i32, i32
  }
  func.func @transform_1(%arg0: i32, %arg1: i32) -> (i32, i32) {
    %c0_i32 = arith.constant 0 : i32
    %c0_i32_0 = arith.constant 0 : i32
    %c0_i32_1 = arith.constant 0 : i32
    return %c0_i32, %c0_i32_0 : i32, i32
  }
  func.func @transform_2(%arg0: i32, %arg1: i32) -> (i32, i32) {
    %c0_i32 = arith.constant 0 : i32
    %c0_i32_0 = arith.constant 0 : i32
    %c0_i32_1 = arith.constant 0 : i32
    return %c0_i32, %c0_i32_0 : i32, i32
  }
  func.func @transform_3(%arg0: i32, %arg1: i32) -> (i32, i32) {
    %c0_i32 = arith.constant 0 : i32
    %c0_i32_0 = arith.constant 0 : i32
    %c0_i32_1 = arith.constant 0 : i32
    return %c0_i32, %c0_i32_0 : i32, i32
  }
  func.func @transform_4(%arg0: i32, %arg1: i32) -> (i32, i32) {
    %0 = arith.muli %arg0, %arg1 : i32
    %c0_i32 = arith.constant 0 : i32
    %c0_i32_0 = arith.constant 0 : i32
    return %0, %c0_i32 : i32, i32
  }
}

</mosaic_0001>

<bundles_post_ra>
// kernel: discriminator_forward.4
= control target key start
LH: loop header
LB: loop body
LE: loop exit
PB: predicated region body
PF: predicated region fallthrough
CT: control target
= control target key end

     0   :  { %s3447_s12 = smov 0   ;;  %s3900_s0 = inlined_call_operand.vmem [shape: bf16[2048,128], index: 0, kind: input, shape index: {}]   ;;  %s3901_s1 = inlined_call_operand.vmem [shape: bf16[128,128], index: 1, kind: input, shape index: {}]   ;;  %s3902_s2 = inlined_call_operand.vmem [shape: f32[1,128], index: 2, kind: input, shape index: {}]   ;;  %s3903_s3 = inlined_call_operand.vmem [shape: bf16[2048,128], index: 3, kind: output, shape index: {}]  }
   0x1 LB: > { %s2383_s13 = sadd.s32 4294967295, %s3425_s12   ;;  %p2387_p0 = scmp.ge.s32.totalorder %s3425_s12, 1  ;;  %s3425_s12 = sphi %s3447_s12, %s13_s12  }
   0x2   : > { %p138_p1 = scmp.lt.s32.totalorder %s3425_s12, 3 }
   0x4   : > { %p139_p2 = pnand %p2387_p0, %p138_p1 }
   0x5   : > { %v3346_v0 = vld [vmem:[%s3901_s1] sm:$0xff] (!%p139_p2)   ;;  %s2388_s16 = sshll.u32 (!%p139_p2), %s2383_s13, 7  ;;  %v3347_v1 = vld [vmem:[%s3901_s1 + $0x8] sm:$0xff] (!%p139_p2)   ;;  %v3348_v2 = vld [vmem:[%s3901_s1 + $0x10] sm:$0xff] (!%p139_p2)  }
   0x6   : > { %142 = sbr.rel (%p139_p2) target bundleno = 399 (0x18f), region = 32  ;;  %p163_p3 = scmp.lt.s32.totalorder (!%p139_p2), %s2388_s16, 255  ;;  %3178 = vmatprep.subr.bf16.mxu0 (!%p139_p2), %v3346_v0  ;;  %3322 = vmatprep.subr.bf16.mxu1 (!%p139_p2), %v3346_v0  ;;  %v3349_v3 = vld [vmem:[%s3901_s1 + $0x18] sm:$0xff] (!%p139_p2)   ;;  %v3350_v6 = vld [vmem:[%s3901_s1 + $0x20] sm:$0xff] (!%p139_p2)   ;;  %v3351_v7 = vld [vmem:[%s3901_s1 + $0x28] sm:$0xff] (!%p139_p2)  }
   0x7   : > { %3179 = vmatpush3.bf16.msra.mxu0 (!%p139_p2), %v3346_v0  ;;  %3330 = vmatpush3.bf16.msra.mxu1 (!%p139_p2), %v3346_v0  ;;  %v3352_v8 = vld [vmem:[%s3901_s1 + $0x30] sm:$0xff] (!%p139_p2)   ;;  %v3353_v9 = vld [vmem:[%s3901_s1 + $0x38] sm:$0xff] (!%p139_p2)  }
   0x8   : > { %3180 = vmatprep.subr.bf16.mxu0 (!%p139_p2), %v3347_v1  ;;  %3323 = vmatprep.subr.bf16.mxu1 (!%p139_p2), %v3347_v1 }
   0xb   : > { %3181 = vmatpush3.bf16.msra.mxu0 (!%p139_p2), %v3347_v1  ;;  %3331 = vmatpush3.bf16.msra.mxu1 (!%p139_p2), %v3347_v1 }
   0xc   : > { %3182 = vmatprep.subr.bf16.mxu0 (!%p139_p2), %v3348_v2  ;;  %3324 = vmatprep.subr.bf16.mxu1 (!%p139_p2), %v3348_v2 }
   0xd   : > { %s3905_s16 = smov (!%p163_p3, %s2388_s16), 255 }
   0xe   : > { %s2389_s21 = sshll.u32 %s3905_s16, 2 }
   0xf   : > { %s3472_s24 = scalar_lea.vmem %s3900_s0, %s2389_s21  ;;  %3183 = vmatpush3.bf16.msra.mxu0 %v3348_v2  ;;  %3332 = vmatpush3.bf16.msra.mxu1 %v3348_v2  ;;  %s3573_s13 = scalar_lea.vmem %s3903_s3, %s2389_s21 }
  0x10   : > { %v3354_v4 = vld [vmem:[%s3472_s24] sm:$0xff]   ;;  %3184 = vmatprep.subr.bf16.mxu0 %v3349_v3  ;;  %3325 = vmatprep.subr.bf16.mxu1 %v3349_v3  ;;  %v3356_v10 = vld [vmem:[%s3472_s24 + $0x8] sm:$0xff]   ;;  %v3358_v12 = vld [vmem:[%s3472_s24 + $0x10] sm:$0xff]  }
  0x11   : > { %v3355_v5 = vld [vmem:[%s3472_s24 + $0x100] sm:$0xff]   ;;  %3194 = vmatprep.mubr.bf16.mxu0 %v3354_v4  ;;  %v3357_v11 = vld [vmem:[%s3472_s24 + $0x108] sm:$0xff]   ;;  %v3359_v13 = vld [vmem:[%s3472_s24 + $0x110] sm:$0xff]  }
  0x12   : > { %3258 = vmatprep.mubr.bf16.mxu1 %v3355_v5  ;;  %v3360_v14 = vld [vmem:[%s3472_s24 + $0x18] sm:$0xff]   ;;  %v3362_v16 = vld [vmem:[%s3472_s24 + $0x20] sm:$0xff]   ;;  %v3364_v18 = vld [vmem:[%s3472_s24 + $0x28] sm:$0xff]  }
  0x13   : > { %3185 = vmatpush3.bf16.msra.mxu0 %v3349_v3  ;;  %3333 = vmatpush3.bf16.msra.mxu1 %v3349_v3  ;;  %v3361_v15 = vld [vmem:[%s3472_s24 + $0x118] sm:$0xff]   ;;  %v3363_v17 = vld [vmem:[%s3472_s24 + $0x120] sm:$0xff]   ;;  %v3365_v19 = vld [vmem:[%s3472_s24 + $0x128] sm:$0xff]  }
  0x14   : > { %3186 = vmatprep.subr.bf16.mxu0 %v3350_v6  ;;  %3326 = vmatprep.subr.bf16.mxu1 %v3350_v6  ;;  %v3366_v20 = vld [vmem:[%s3472_s24 + $0x30] sm:$0xff]   ;;  %v3368_v22 = vld [vmem:[%s3472_s24 + $0x38] sm:$0xff]   ;;  %v3370_v24 = vld [vmem:[%s3472_s24 + $0x40] sm:$0xff]  }
  0x15   : > { %v3367_v21 = vld [vmem:[%s3472_s24 + $0x130] sm:$0xff]   ;;  %v3369_v23 = vld [vmem:[%s3472_s24 + $0x138] sm:$0xff]   ;;  %v3371_v25 = vld [vmem:[%s3472_s24 + $0x140] sm:$0xff]  }
  0x16   : > { %v3372_v26 = vld [vmem:[%s3472_s24 + $0x48] sm:$0xff]   ;;  %v3374_v28 = vld [vmem:[%s3472_s24 + $0x50] sm:$0xff]   ;;  %v3376_v30 = vld [vmem:[%s3472_s24 + $0x58] sm:$0xff]  }
  0x17   : > { %3187 = vmatpush3.bf16.msra.mxu0 %v3350_v6  ;;  %3334 = vmatpush3.bf16.msra.mxu1 %v3350_v6  ;;  %v3373_v27 = vld [vmem:[%s3472_s24 + $0x148] sm:$0xff]   ;;  %v3375_v29 = vld [vmem:[%s3472_s24 + $0x150] sm:$0xff]   ;;  %v3377_v31 = vld [vmem:[%s3472_s24 + $0x158] sm:$0xff]  }
  0x18   : > { %3188 = vmatprep.subr.bf16.mxu0 %v3351_v7  ;;  %3327 = vmatprep.subr.bf16.mxu1 %v3351_v7  ;;  %v3378_v32 = vld [vmem:[%s3472_s24 + $0x60] sm:$0xff]   ;;  %v3380_v34 = vld [vmem:[%s3472_s24 + $0x68] sm:$0xff]   ;;  %v3382_v36 = vld [vmem:[%s3472_s24 + $0x70] sm:$0xff]  }
  0x19   : > { %v3379_v33 = vld [vmem:[%s3472_s24 + $0x160] sm:$0xff]   ;;  %v3381_v35 = vld [vmem:[%s3472_s24 + $0x168] sm:$0xff]   ;;  %v3383_v37 = vld [vmem:[%s3472_s24 + $0x170] sm:$0xff]  }
  0x1a   : > { %v3384_v38 = vld [vmem:[%s3472_s24 + $0x78] sm:$0xff]   ;;  %v3386_v40 = vld [vmem:[%s3472_s24 + $0x80] sm:$0xff]   ;;  %v3388_v42 = vld [vmem:[%s3472_s24 + $0x88] sm:$0xff]  }
  0x1b   : > { %3189 = vmatpush3.bf16.msra.mxu0 %v3351_v7  ;;  %3335 = vmatpush3.bf16.msra.mxu1 %v3351_v7  ;;  %v3385_v39 = vld [vmem:[%s3472_s24 + $0x178] sm:$0xff]   ;;  %v3387_v41 = vld [vmem:[%s3472_s24 + $0x180] sm:$0xff]   ;;  %v3389_v43 = vld [vmem:[%s3472_s24 + $0x188] sm:$0xff]  }
  0x1c   : > { %3190 = vmatprep.subr.bf16.mxu0 %v3352_v8  ;;  %3328 = vmatprep.subr.bf16.mxu1 %v3352_v8  ;;  %v3390_v44 = vld [vmem:[%s3472_s24 + $0x90] sm:$0xff]   ;;  %v3392_v46 = vld [vmem:[%s3472_s24 + $0x98] sm:$0xff]   ;;  %v3394_v48 = vld [vmem:[%s3472_s24 + $0xa0] sm:$0xff]  }
  0x1d   : > { %v3391_v45 = vld [vmem:[%s3472_s24 + $0x190] sm:$0xff]   ;;  %v3393_v47 = vld [vmem:[%s3472_s24 + $0x198] sm:$0xff]   ;;  %v3395_v49 = vld [vmem:[%s3472_s24 + $0x1a0] sm:$0xff]  }
  0x1e   : > { %v3396_v50 = vld [vmem:[%s3472_s24 + $0xa8] sm:$0xff]   ;;  %v3398_v52 = vld [vmem:[%s3472_s24 + $0xb0] sm:$0xff]   ;;  %v3400_v54 = vld [vmem:[%s3472_s24 + $0xb8] sm:$0xff]  }
  0x1f   : > { %3191 = vmatpush3.bf16.msra.mxu0 %v3352_v8  ;;  %3336 = vmatpush3.bf16.msra.mxu1 %v3352_v8  ;;  %v3397_v51 = vld [vmem:[%s3472_s24 + $0x1a8] sm:$0xff]   ;;  %v3399_v53 = vld [vmem:[%s3472_s24 + $0x1b0] sm:$0xff]   ;;  %v3401_v55 = vld [vmem:[%s3472_s24 + $0x1b8] sm:$0xff]  }
  0x20   : > { %3192 = vmatprep.subr.bf16.mxu0 %v3353_v9  ;;  %3329 = vmatprep.subr.bf16.mxu1 %v3353_v9  ;;  %v3402_v56 = vld [vmem:[%s3472_s24 + $0xc0] sm:$0xff]   ;;  %v3404_v58 = vld [vmem:[%s3472_s24 + $0xc8] sm:$0xff]   ;;  %v3406_v60 = vld [vmem:[%s3472_s24 + $0xd0] sm:$0xff]  }
  0x21   : > { %v3403_v57 = vld [vmem:[%s3472_s24 + $0x1c0] sm:$0xff]   ;;  %v3405_v59 = vld [vmem:[%s3472_s24 + $0x1c8] sm:$0xff]   ;;  %v3407_v61 = vld [vmem:[%s3472_s24 + $0x1d0] sm:$0xff]  }
  0x22   : > { %v3408_v62 = vld [vmem:[%s3472_s24 + $0xd8] sm:$0xff]   ;;  %v3410_v0 = vld [vmem:[%s3472_s24 + $0xe0] sm:$0xff]   ;;  %v3412_v2 = vld [vmem:[%s3472_s24 + $0xe8] sm:$0xff]  }
  0x23   : > { %3193 = vmatpush3.bf16.msra.mxu0 %v3353_v9  ;;  %3337 = vmatpush3.bf16.msra.mxu1 %v3353_v9  ;;  %v3409_v63 = vld [vmem:[%s3472_s24 + $0x1d8] sm:$0xff]   ;;  %v3411_v1 = vld [vmem:[%s3472_s24 + $0x1e0] sm:$0xff]   ;;  %v3413_v3 = vld [vmem:[%s3472_s24 + $0x1e8] sm:$0xff]  }
  0x24   : > { %v3414_v4 = vld [vmem:[%s3472_s24 + $0xf0] sm:$0xff]   ;;  %v3416_v6 = vld [vmem:[%s3472_s24 + $0xf8] sm:$0xff]   ;;  %v3556_v8 = vld [vmem:[%s3902_s2] ss:$0 sm:$0xff] }
  0x25   : > { %v3415_v5 = vld [vmem:[%s3472_s24 + $0x1f0] sm:$0xff]   ;;  %v3417_v7 = vld [vmem:[%s3472_s24 + $0x1f8] sm:$0xff]  }
  0x26   : > { %3195 = vmatmul.mubr.bf16.vlgmr.msra.gmra.mrb[0].mxu0 %v3356_v10  ;;  %3259 = vmatmul.mubr.bf16.vlgmr.msra.gmra.mrb[0].mxu1 %v3357_v11 }
  0x27   : > { %3198 = vmatprep.mubr.bf16.mxu0 %v3358_v12  ;;  %3262 = vmatprep.mubr.bf16.mxu1 %v3359_v13 }
  0x2e   : > { %3199 = vmatmul.mubr.bf16.gmra.mrb[4].mxu0 %v3360_v14  ;;  %3263 = vmatmul.mubr.bf16.gmra.mrb[4].mxu1 %v3361_v15 }
  0x2f   : > { %3202 = vmatprep.mubr.bf16.mxu0 %v3362_v16  ;;  %3266 = vmatprep.mubr.bf16.mxu1 %v3363_v17 }
  0x36   : > { %3203 = vmatmul.mubr.bf16.gmra.mrb[8].mxu0 %v3364_v18  ;;  %3267 = vmatmul.mubr.bf16.gmra.mrb[8].mxu1 %v3365_v19 }
  0x37   : > { %3206 = vmatprep.mubr.bf16.mxu0 %v3366_v20  ;;  %3270 = vmatprep.mubr.bf16.mxu1 %v3367_v21 }
  0x3e   : > { %3207 = vmatmul.mubr.bf16.gmra.mrb[12].mxu0 %v3368_v22  ;;  %3271 = vmatmul.mubr.bf16.gmra.mrb[12].mxu1 %v3369_v23 }
  0x3f   : > { %3210 = vmatprep.mubr.bf16.mxu0 %v3370_v24  ;;  %3274 = vmatprep.mubr.bf16.mxu1 %v3371_v25 }
  0x46   : > { %3211 = vmatmul.mubr.bf16.gmra.mrb[16].mxu0 %v3372_v26  ;;  %3275 = vmatmul.mubr.bf16.gmra.mrb[16].mxu1 %v3373_v27 }
  0x47   : > { %3214 = vmatprep.mubr.bf16.mxu0 %v3374_v28  ;;  %3278 = vmatprep.mubr.bf16.mxu1 %v3375_v29 }
  0x4e   : > { %3215 = vmatmul.mubr.bf16.gmra.mrb[20].mxu0 %v3376_v30  ;;  %3279 = vmatmul.mubr.bf16.gmra.mrb[20].mxu1 %v3377_v31 }
  0x4f   : > { %3218 = vmatprep.mubr.bf16.mxu0 %v3378_v32  ;;  %3282 = vmatprep.mubr.bf16.mxu1 %v3379_v33 }
  0x56   : > { %3219 = vmatmul.mubr.bf16.gmra.mrb[24].mxu0 %v3380_v34  ;;  %3283 = vmatmul.mubr.bf16.gmra.mrb[24].mxu1 %v3381_v35 }
  0x57   : > { %3222 = vmatprep.mubr.bf16.mxu0 %v3382_v36  ;;  %3286 = vmatprep.mubr.bf16.mxu1 %v3383_v37 }
  0x5e   : > { %3223 = vmatmul.mubr.bf16.gmra.mrb[28].mxu0 %v3384_v38  ;;  %3287 = vmatmul.mubr.bf16.gmra.mrb[28].mxu1 %v3385_v39 }
  0x5f   : > { %3226 = vmatprep.mubr.bf16.mxu0 %v3386_v40  ;;  %3290 = vmatprep.mubr.bf16.mxu1 %v3387_v41 }
  0x66   : > { %3227 = vmatmul.mubr.bf16.gmra.mrb[32].mxu0 %v3388_v42  ;;  %3291 = vmatmul.mubr.bf16.gmra.mrb[32].mxu1 %v3389_v43 }
  0x67   : > { %3230 = vmatprep.mubr.bf16.mxu0 %v3390_v44  ;;  %3294 = vmatprep.mubr.bf16.mxu1 %v3391_v45 }
  0x6e   : > { %3231 = vmatmul.mubr.bf16.gmra.mrb[36].mxu0 %v3392_v46  ;;  %3295 = vmatmul.mubr.bf16.gmra.mrb[36].mxu1 %v3393_v47 }
  0x6f   : > { %3234 = vmatprep.mubr.bf16.mxu0 %v3394_v48  ;;  %3298 = vmatprep.mubr.bf16.mxu1 %v3395_v49 }
  0x76   : > { %3235 = vmatmul.mubr.bf16.gmra.mrb[40].mxu0 %v3396_v50  ;;  %3299 = vmatmul.mubr.bf16.gmra.mrb[40].mxu1 %v3397_v51 }
  0x77   : > { %3238 = vmatprep.mubr.bf16.mxu0 %v3398_v52  ;;  %3302 = vmatprep.mubr.bf16.mxu1 %v3399_v53 }
  0x7e   : > { %3239 = vmatmul.mubr.bf16.gmra.mrb[44].mxu0 %v3400_v54  ;;  %3303 = vmatmul.mubr.bf16.gmra.mrb[44].mxu1 %v3401_v55 }
  0x7f   : > { %3242 = vmatprep.mubr.bf16.mxu0 %v3402_v56  ;;  %3306 = vmatprep.mubr.bf16.mxu1 %v3403_v57 }
  0x86   : > { %3243 = vmatmul.mubr.bf16.gmra.mrb[48].mxu0 %v3404_v58  ;;  %3307 = vmatmul.mubr.bf16.gmra.mrb[48].mxu1 %v3405_v59 }
  0x87   : > { %3246 = vmatprep.mubr.bf16.mxu0 %v3406_v60  ;;  %3310 = vmatprep.mubr.bf16.mxu1 %v3407_v61 }
  0x8e   : > { %3247 = vmatmul.mubr.bf16.gmra.mrb[52].mxu0 %v3408_v62  ;;  %3311 = vmatmul.mubr.bf16.gmra.mrb[52].mxu1 %v3409_v63 }
  0x8f   : > { %3250 = vmatprep.mubr.bf16.mxu0 %v3410_v0  ;;  %3314 = vmatprep.mubr.bf16.mxu1 %v3411_v1 }
  0x96   : > { %3251 = vmatmul.mubr.bf16.gmra.mrb[56].mxu0 %v3412_v2  ;;  %3315 = vmatmul.mubr.bf16.gmra.mrb[56].mxu1 %v3413_v3 }
  0x97   : > { %3254 = vmatprep.mubr.bf16.mxu0 %v3414_v4  ;;  %3318 = vmatprep.mubr.bf16.mxu1 %v3415_v5 }
  0x9e   : > { %3255 = vmatmul.mubr.bf16.gmra.mrb[60].mxu0 %v3416_v6  ;;  %3319 = vmatmul.mubr.bf16.gmra.mrb[60].mxu1 %v3417_v7 }
  0xf9   : > { %v3196_v9 = vpop.f32.mrb[0].mxu0  ;;  %v3260_v10 = vpop.f32.mrb[0].mxu1 }
  0xfa   : > { %v801_v11 = vadd.f32 %v3196_v9, %v3556_v8  ;;  %v1057_v12 = vadd.f32 %v3260_v10, %v3556_v8  ;;  %v792_v13 = vpop.f32.mrb[1].mxu0  ;;  %v1048_v14 = vpop.f32.mrb[1].mxu1 }
  0xfb   : > { %v793_v15 = vadd.f32 %v3556_v8, %v792_v13  ;;  %v1049_v16 = vadd.f32 %v3556_v8, %v1048_v14  ;;  %v3197_v17 = vpop.f32.mrb[2].mxu0  ;;  %v3261_v18 = vpop.f32.mrb[2].mxu1 }
  0xfc   : > { %vm1305_vm0 = vcmp.ge.f32.partialorder %v801_v11, 0.0  ;;  %v1433_v19 = vmul.f32 0.2, %v801_v11  ;;  %vm1369_vm1 = vcmp.ge.f32.partialorder %v1057_v12, 0.0  ;;  %v1497_v20 = vmul.f32 0.2, %v1057_v12 }
  0xfd   : > { %vm1303_vm2 = vcmp.ge.f32.partialorder %v793_v15, 0.0  ;;  %v1431_v21 = vmul.f32 0.2, %v793_v15  ;;  %vm1367_vm3 = vcmp.ge.f32.partialorder %v1049_v16, 0.0  ;;  %v1495_v22 = vmul.f32 0.2, %v1049_v16 }
  0xfe   : > { %v804_v23 = vadd.f32 %v3197_v17, %v3556_v8  ;;  %v1060_v24 = vadd.f32 %v3261_v18, %v3556_v8  ;;  %v795_v25 = vpop.f32.mrb[3].mxu0  ;;  %v1051_v26 = vpop.f32.mrb[3].mxu1  ;;  %v1561_v27 = vsel %vm1305_vm0, %v801_v11, %v1433_v19  ;;  %v1625_v28 = vsel %vm1369_vm1, %v1057_v12, %v1497_v20 }
  0xff   : > { %v796_v29 = vadd.f32 %v3556_v8, %v795_v25  ;;  %v1052_v30 = vadd.f32 %v3556_v8, %v1051_v26  ;;  %v1559_v35 = vsel %vm1303_vm2, %v793_v15, %v1431_v21  ;;  %v1623_v36 = vsel %vm1367_vm3, %v1049_v16, %v1495_v22 }
 0x100   : > { %vm1306_vm4 = vcmp.ge.f32.partialorder %v804_v23, 0.0  ;;  %v1434_v31 = vmul.f32 0.2, %v804_v23  ;;  %vm1370_vm5 = vcmp.ge.f32.partialorder %v1060_v24, 0.0  ;;  %v1498_v32 = vmul.f32 0.2, %v1060_v24 }
 0x101   : > { %vm1304_vm6 = vcmp.ge.f32.partialorder %v796_v29, 0.0  ;;  %v1432_v33 = vmul.f32 0.2, %v796_v29  ;;  %vm1368_vm7 = vcmp.ge.f32.partialorder %v1052_v30, 0.0  ;;  %v1496_v34 = vmul.f32 0.2, %v1052_v30 }
 0x102   : > { %v1562_v37 = vsel %vm1306_vm4, %v804_v23, %v1434_v31  ;;  %v1626_v38 = vsel %vm1370_vm5, %v1060_v24, %v1498_v32  ;;  %v3200_v39 = vpop.f32.mrb[4].mxu0  ;;  %v3264_v40 = vpop.f32.mrb[4].mxu1 }
 0x103   : > { %v2731_v41 = vpack.c.bf16 %v1562_v37, %v1561_v27  ;;  %v2891_v42 = vpack.c.bf16 %v1626_v38, %v1625_v28  ;;  %v1560_v43 = vsel %vm1304_vm6, %v796_v29, %v1432_v33  ;;  %v1624_v44 = vsel %vm1368_vm7, %v1052_v30, %v1496_v34  ;;  %v808_v45 = vpop.f32.mrb[5].mxu0  ;;  %v1064_v46 = vpop.f32.mrb[5].mxu1 }
 0x104   : > { %v2726_v47 = vpack.c.bf16 %v1560_v43, %v1559_v35  ;;  %v2886_v48 = vpack.c.bf16 %v1624_v44, %v1623_v36  ;;  %v817_v49 = vadd.f32 %v3200_v39, %v3556_v8  ;;  %v1073_v50 = vadd.f32 %v3264_v40, %v3556_v8  ;;  %v3201_v51 = vpop.f32.mrb[6].mxu0  ;;  %v3265_v52 = vpop.f32.mrb[6].mxu1 }
 0x105   : > { %3043 = vst [vmem:[%s3573_s13 + $0x8] sm:$0xff] %v2731_v41   ;;  %3075 = vst [vmem:[%s3573_s13 + $0x108] sm:$0xff] %v2891_v42   ;;  %v809_v53 = vadd.f32 %v3556_v8, %v808_v45  ;;  %v1065_v54 = vadd.f32 %v3556_v8, %v1064_v46  ;;  %v820_v55 = vadd.f32 %v3201_v51, %v3556_v8  ;;  %v811_v57 = vpop.f32.mrb[7].mxu0  ;;  %v1067_v58 = vpop.f32.mrb[7].mxu1 }
 0x106   : > { %v1076_v56 = vadd.f32 %v3265_v52, %v3556_v8  ;;  %2727 = vst [vmem:[%s3573_s13] sm:$0xff] %v2726_v47   ;;  %3074 = vst [vmem:[%s3573_s13 + $0x100] sm:$0xff] %v2886_v48   ;;  %vm1309_vm8 = vcmp.ge.f32.partialorder %v817_v49, 0.0  ;;  %v1437_v59 = vmul.f32 0.2, %v817_v49  ;;  %vm1373_vm9 = vcmp.ge.f32.partialorder %v1073_v50, 0.0 }
 0x107   : > { %v1501_v60 = vmul.f32 0.2, %v1073_v50  ;;  %vm1307_vm10 = vcmp.ge.f32.partialorder %v809_v53, 0.0  ;;  %v1435_v61 = vmul.f32 0.2, %v809_v53  ;;  %vm1371_vm11 = vcmp.ge.f32.partialorder %v1065_v54, 0.0 }
 0x108   : > { %v1499_v62 = vmul.f32 0.2, %v1065_v54  ;;  %v1565_v63 = vsel %vm1309_vm8, %v817_v49, %v1437_v59  ;;  %vm1310_vm12 = vcmp.ge.f32.partialorder %v820_v55, 0.0  ;;  %v1438_v1 = vmul.f32 0.2, %v820_v55 }
 0x109   : > { %v1629_v0 = vsel %vm1373_vm9, %v1073_v50, %v1501_v60  ;;  %v1563_v2 = vsel %vm1307_vm10, %v809_v53, %v1435_v61  ;;  %vm1374_vm13 = vcmp.ge.f32.partialorder %v1076_v56, 0.0  ;;  %v1502_v4 = vmul.f32 0.2, %v1076_v56  ;;  %v3204_v5 = vpop.f32.mrb[8].mxu0  ;;  %v3268_v6 = vpop.f32.mrb[8].mxu1 }
 0x10a   : > { %v1627_v3 = vsel %vm1371_vm11, %v1065_v54, %v1499_v62  ;;  %v1566_v7 = vsel %vm1310_vm12, %v820_v55, %v1438_v1  ;;  %v812_v9 = vadd.f32 %v3556_v8, %v811_v57  ;;  %v1068_v10 = vadd.f32 %v3556_v8, %v1067_v58  ;;  %v824_v12 = vpop.f32.mrb[9].mxu0  ;;  %v1080_v13 = vpop.f32.mrb[9].mxu1 }
 0x10b   : > { %v833_v11 = vadd.f32 %v3204_v5, %v3556_v8  ;;  %v2741_v14 = vpack.c.bf16 %v1566_v7, %v1565_v63  ;;  %v1630_v15 = vsel %vm1374_vm13, %v1076_v56, %v1502_v4  ;;  %v1089_v16 = vadd.f32 %v3268_v6, %v3556_v8  ;;  %v3205_v18 = vpop.f32.mrb[10].mxu0  ;;  %v3269_v19 = vpop.f32.mrb[10].mxu1 }
 0x10c   : > { %v825_v17 = vadd.f32 %v3556_v8, %v824_v12  ;;  %v2901_v20 = vpack.c.bf16 %v1630_v15, %v1629_v0  ;;  %vm1308_vm14 = vcmp.ge.f32.partialorder %v812_v9, 0.0  ;;  %v1436_v21 = vmul.f32 0.2, %v812_v9  ;;  %v827_v22 = vpop.f32.mrb[11].mxu0  ;;  %v1083_v23 = vpop.f32.mrb[11].mxu1 }
 0x10d   : > { %vm1372_vm15 = vcmp.ge.f32.partialorder %v1068_v10, 0.0  ;;  %3045 = vst [vmem:[%s3573_s13 + $0x18] sm:$0xff] %v2741_v14   ;;  %v1500_v24 = vmul.f32 0.2, %v1068_v10  ;;  %vm1313_vm0 = vcmp.ge.f32.partialorder %v833_v11, 0.0  ;;  %vm1377_vm1 = vcmp.ge.f32.partialorder %v1089_v16, 0.0 }
 0x10e   : > { %v1441_v25 = vmul.f32 0.2, %v833_v11  ;;  %3077 = vst [vmem:[%s3573_s13 + $0x118] sm:$0xff] %v2901_v20   ;;  %v1564_v26 = vsel %vm1308_vm14, %v812_v9, %v1436_v21  ;;  %v1505_v27 = vmul.f32 0.2, %v1089_v16  ;;  %vm1311_vm2 = vcmp.ge.f32.partialorder %v825_v17, 0.0 }
 0x10f   : > { %v1439_v28 = vmul.f32 0.2, %v825_v17  ;;  %v2736_v29 = vpack.c.bf16 %v1564_v26, %v1563_v2  ;;  %v1628_v30 = vsel %vm1372_vm15, %v1068_v10, %v1500_v24  ;;  %v1081_v32 = vadd.f32 %v3556_v8, %v1080_v13 }
 0x110   : > { %v1569_v31 = vsel %vm1313_vm0, %v833_v11, %v1441_v25  ;;  %v2896_v33 = vpack.c.bf16 %v1628_v30, %v1627_v3  ;;  %v1633_v34 = vsel %vm1377_vm1, %v1089_v16, %v1505_v27  ;;  %v836_v36 = vadd.f32 %v3205_v18, %v3556_v8 }
 0x111   : > { %v1567_v35 = vsel %vm1311_vm2, %v825_v17, %v1439_v28  ;;  %3044 = vst [vmem:[%s3573_s13 + $0x10] sm:$0xff] %v2736_v29   ;;  %vm1375_vm3 = vcmp.ge.f32.partialorder %v1081_v32, 0.0  ;;  %v1503_v37 = vmul.f32 0.2, %v1081_v32  ;;  %v1092_v38 = vadd.f32 %v3269_v19, %v3556_v8  ;;  %v3208_v40 = vpop.f32.mrb[12].mxu0  ;;  %v3272_v41 = vpop.f32.mrb[12].mxu1 }
 0x112   : > { %v828_v39 = vadd.f32 %v3556_v8, %v827_v22  ;;  %3076 = vst [vmem:[%s3573_s13 + $0x110] sm:$0xff] %v2896_v33   ;;  %vm1314_vm4 = vcmp.ge.f32.partialorder %v836_v36, 0.0  ;;  %v1442_v42 = vmul.f32 0.2, %v836_v36  ;;  %v1084_v43 = vadd.f32 %v3556_v8, %v1083_v23  ;;  %v840_v45 = vpop.f32.mrb[13].mxu0  ;;  %v1096_v46 = vpop.f32.mrb[13].mxu1 }
 0x113   : > { %v849_v44 = vadd.f32 %v3208_v40, %v3556_v8  ;;  %v1631_v47 = vsel %vm1375_vm3, %v1081_v32, %v1503_v37  ;;  %vm1378_vm5 = vcmp.ge.f32.partialorder %v1092_v38, 0.0  ;;  %v1506_v48 = vmul.f32 0.2, %v1092_v38  ;;  %v3209_v49 = vpop.f32.mrb[14].mxu0  ;;  %v3273_v50 = vpop.f32.mrb[14].mxu1 }
 0x114   : > { %vm1312_vm6 = vcmp.ge.f32.partialorder %v828_v39, 0.0  ;;  %v1570_v51 = vsel %vm1314_vm4, %v836_v36, %v1442_v42  ;;  %v1440_v52 = vmul.f32 0.2, %v828_v39  ;;  %vm1376_vm7 = vcmp.ge.f32.partialorder %v1084_v43, 0.0  ;;  %v843_v54 = vpop.f32.mrb[15].mxu0  ;;  %v1099_v58 = vpop.f32.mrb[15].mxu1 }
 0x115   : > { %v1504_v53 = vmul.f32 0.2, %v1084_v43  ;;  %v2751_v55 = vpack.c.bf16 %v1570_v51, %v1569_v31  ;;  %v1634_v56 = vsel %vm1378_vm5, %v1092_v38, %v1506_v48  ;;  %vm1317_vm8 = vcmp.ge.f32.partialorder %v849_v44, 0.0 }
 0x116   : > { %v1445_v57 = vmul.f32 0.2, %v849_v44  ;;  %v2911_v59 = vpack.c.bf16 %v1634_v56, %v1633_v34  ;;  %v1568_v60 = vsel %vm1312_vm6, %v828_v39, %v1440_v52  ;;  %v1105_v62 = vadd.f32 %v3272_v41, %v3556_v8 }
 0x117   : > { %v1632_v61 = vsel %vm1376_vm7, %v1084_v43, %v1504_v53  ;;  %3047 = vst [vmem:[%s3573_s13 + $0x28] sm:$0xff] %v2751_v55   ;;  %v2746_v63 = vpack.c.bf16 %v1568_v60, %v1567_v35  ;;  %v841_v2 = vadd.f32 %v3556_v8, %v840_v45  ;;  %v1097_v4 = vadd.f32 %v3556_v8, %v1096_v46 }
 0x118   : > { %v2906_v0 = vpack.c.bf16 %v1632_v61, %v1631_v47  ;;  %v1573_v1 = vsel %vm1317_vm8, %v849_v44, %v1445_v57  ;;  %3079 = vst [vmem:[%s3573_s13 + $0x128] sm:$0xff] %v2911_v59   ;;  %vm1381_vm9 = vcmp.ge.f32.partialorder %v1105_v62, 0.0  ;;  %v1509_v3 = vmul.f32 0.2, %v1105_v62 }
 0x119   : > { %v852_v5 = vadd.f32 %v3209_v49, %v3556_v8  ;;  %3046 = vst [vmem:[%s3573_s13 + $0x20] sm:$0xff] %v2746_v63   ;;  %vm1315_vm10 = vcmp.ge.f32.partialorder %v841_v2, 0.0  ;;  %v1443_v6 = vmul.f32 0.2, %v841_v2  ;;  %v1108_v7 = vadd.f32 %v3273_v50, %v3556_v8  ;;  %v3212_v10 = vpop.f32.mrb[16].mxu0  ;;  %v3276_v11 = vpop.f32.mrb[16].mxu1 }
 0x11a   : > { %3078 = vst [vmem:[%s3573_s13 + $0x120] sm:$0xff] %v2906_v0   ;;  %v844_v9 = vadd.f32 %v3556_v8, %v843_v54  ;;  %v1637_v12 = vsel %vm1381_vm9, %v1105_v62, %v1509_v3  ;;  %vm1379_vm11 = vcmp.ge.f32.partialorder %v1097_v4, 0.0  ;;  %v1507_v13 = vmul.f32 0.2, %v1097_v4  ;;  %v856_v14 = vpop.f32.mrb[17].mxu0  ;;  %v1112_v15 = vpop.f32.mrb[17].mxu1 }
 0x11b   : > { %vm1318_vm12 = vcmp.ge.f32.partialorder %v852_v5, 0.0  ;;  %v1571_v16 = vsel %vm1315_vm10, %v841_v2, %v1443_v6  ;;  %v1446_v17 = vmul.f32 0.2, %v852_v5  ;;  %vm1382_vm13 = vcmp.ge.f32.partialorder %v1108_v7, 0.0  ;;  %v3213_v19 = vpop.f32.mrb[18].mxu0  ;;  %v3277_v23 = vpop.f32.mrb[18].mxu1 }
 0x11c   : > { %v1510_v18 = vmul.f32 0.2, %v1108_v7  ;;  %v1635_v20 = vsel %vm1379_vm11, %v1097_v4, %v1507_v13  ;;  %vm1316_vm14 = vcmp.ge.f32.partialorder %v844_v9, 0.0  ;;  %v1444_v21 = vmul.f32 0.2, %v844_v9  ;;  %v859_v24 = vpop.f32.mrb[19].mxu0 }
 0x11d   : > { %v1100_v22 = vadd.f32 %v3556_v8, %v1099_v58  ;;  %v1574_v25 = vsel %vm1318_vm12, %v852_v5, %v1446_v17  ;;  %v865_v27 = vadd.f32 %v3212_v10, %v3556_v8  ;;  %v1121_v28 = vadd.f32 %v3276_v11, %v3556_v8  ;;  %v1115_v29 = vpop.f32.mrb[19].mxu1 }
 0x11e   : > { %v1638_v26 = vsel %vm1382_vm13, %v1108_v7, %v1510_v18  ;;  %v2761_v30 = vpack.c.bf16 %v1574_v25, %v1573_v1  ;;  %v1572_v32 = vsel %vm1316_vm14, %v844_v9, %v1444_v21  ;;  %v857_v37 = vadd.f32 %v3556_v8, %v856_v14 }
 0x11f   : > { %v2921_v31 = vpack.c.bf16 %v1638_v26, %v1637_v12  ;;  %vm1380_vm15 = vcmp.ge.f32.partialorder %v1100_v22, 0.0  ;;  %v2756_v33 = vpack.c.bf16 %v1572_v32, %v1571_v16  ;;  %v1508_v34 = vmul.f32 0.2, %v1100_v22 }
 0x120   : > { %vm1321_vm0 = vcmp.ge.f32.partialorder %v865_v27, 0.0  ;;  %v1449_v35 = vmul.f32 0.2, %v865_v27  ;;  %3049 = vst [vmem:[%s3573_s13 + $0x38] sm:$0xff] %v2761_v30   ;;  %vm1385_vm1 = vcmp.ge.f32.partialorder %v1121_v28, 0.0  ;;  %v1113_v38 = vadd.f32 %v3556_v8, %v1112_v15 }
 0x121   : > { %3081 = vst [vmem:[%s3573_s13 + $0x138] sm:$0xff] %v2921_v31   ;;  %v1513_v36 = vmul.f32 0.2, %v1121_v28  ;;  %3048 = vst [vmem:[%s3573_s13 + $0x30] sm:$0xff] %v2756_v33   ;;  %v1636_v39 = vsel %vm1380_vm15, %v1100_v22, %v1508_v34  ;;  %v868_v41 = vadd.f32 %v3213_v19, %v3556_v8  ;;  %v1124_v42 = vadd.f32 %v3277_v23, %v3556_v8  ;;  %v3216_v43 = vpop.f32.mrb[20].mxu0  ;;  %v3280_v44 = vpop.f32.mrb[20].mxu1 }
 0x122   : > { %v1577_v40 = vsel %vm1321_vm0, %v865_v27, %v1449_v35  ;;  %v2916_v45 = vpack.c.bf16 %v1636_v39, %v1635_v20  ;;  %vm1319_vm2 = vcmp.ge.f32.partialorder %v857_v37, 0.0  ;;  %v1447_v47 = vmul.f32 0.2, %v857_v37  ;;  %v872_v48 = vpop.f32.mrb[21].mxu0  ;;  %v1128_v49 = vpop.f32.mrb[21].mxu1 }
 0x123   : > { %v1641_v46 = vsel %vm1385_vm1, %v1121_v28, %v1513_v36  ;;  %vm1383_vm3 = vcmp.ge.f32.partialorder %v1113_v38, 0.0  ;;  %v1511_v50 = vmul.f32 0.2, %v1113_v38  ;;  %vm1322_vm4 = vcmp.ge.f32.partialorder %v868_v41, 0.0  ;;  %v3217_v55 = vpop.f32.mrb[22].mxu0  ;;  %v3281_v56 = vpop.f32.mrb[22].mxu1 }
 0x124   : > { %v1450_v51 = vmul.f32 0.2, %v868_v41  ;;  %3080 = vst [vmem:[%s3573_s13 + $0x130] sm:$0xff] %v2916_v45   ;;  %v1575_v52 = vsel %vm1319_vm2, %v857_v37, %v1447_v47  ;;  %vm1386_vm5 = vcmp.ge.f32.partialorder %v1124_v42, 0.0  ;;  %v1514_v53 = vmul.f32 0.2, %v1124_v42 }
 0x125   : > { %v860_v54 = vadd.f32 %v3556_v8, %v859_v24  ;;  %v1639_v57 = vsel %vm1383_vm3, %v1113_v38, %v1511_v50  ;;  %v1116_v59 = vadd.f32 %v3556_v8, %v1115_v29  ;;  %v881_v60 = vadd.f32 %v3216_v43, %v3556_v8  ;;  %v875_v61 = vpop.f32.mrb[23].mxu0  ;;  %v1131_v62 = vpop.f32.mrb[23].mxu1 }
 0x126   : > { %v1578_v58 = vsel %vm1322_vm4, %v868_v41, %v1450_v51  ;;  %v1642_v0 = vsel %vm1386_vm5, %v1124_v42, %v1514_v53  ;;  %v1137_v6 = vadd.f32 %v3280_v44, %v3556_v8  ;;  %v873_v7 = vadd.f32 %v3556_v8, %v872_v48 }
 0x127   : > { %v2771_v63 = vpack.c.bf16 %v1578_v58, %v1577_v40  ;;  %vm1320_vm6 = vcmp.ge.f32.partialorder %v860_v54, 0.0  ;;  %v1448_v1 = vmul.f32 0.2, %v860_v54  ;;  %v2931_v2 = vpack.c.bf16 %v1642_v0, %v1641_v46 }
 0x128   : > { %vm1384_vm7 = vcmp.ge.f32.partialorder %v1116_v59, 0.0  ;;  %v1512_v3 = vmul.f32 0.2, %v1116_v59  ;;  %vm1325_vm8 = vcmp.ge.f32.partialorder %v881_v60, 0.0  ;;  %v1453_v5 = vmul.f32 0.2, %v881_v60 }
 0x129   : > { %3051 = vst [vmem:[%s3573_s13 + $0x48] sm:$0xff] %v2771_v63   ;;  %v1576_v4 = vsel %vm1320_vm6, %v860_v54, %v1448_v1  ;;  %3083 = vst [vmem:[%s3573_s13 + $0x148] sm:$0xff] %v2931_v2   ;;  %v1129_v11 = vadd.f32 %v3556_v8, %v1128_v49  ;;  %v884_v12 = vadd.f32 %v3217_v55, %v3556_v8  ;;  %v3220_v13 = vpop.f32.mrb[24].mxu0  ;;  %v3284_v14 = vpop.f32.mrb[24].mxu1  ;;  %vm1389_vm9 = vcmp.ge.f32.partialorder %v1137_v6, 0.0 }
 0x12a   : > { %v2766_v9 = vpack.c.bf16 %v1576_v4, %v1575_v52  ;;  %v1640_v10 = vsel %vm1384_vm7, %v1116_v59, %v1512_v3  ;;  %v1581_v16 = vsel %vm1325_vm8, %v881_v60, %v1453_v5  ;;  %v1517_v17 = vmul.f32 0.2, %v1137_v6  ;;  %v888_v18 = vpop.f32.mrb[25].mxu0  ;;  %v1144_v19 = vpop.f32.mrb[25].mxu1 }
 0x12b   : > { %v2926_v15 = vpack.c.bf16 %v1640_v10, %v1639_v57  ;;  %vm1323_vm10 = vcmp.ge.f32.partialorder %v873_v7, 0.0  ;;  %v1451_v20 = vmul.f32 0.2, %v873_v7  ;;  %vm1387_vm11 = vcmp.ge.f32.partialorder %v1129_v11, 0.0  ;;  %v3221_v25 = vpop.f32.mrb[26].mxu0  ;;  %v3285_v26 = vpop.f32.mrb[26].mxu1 }
 0x12c   : > { %3050 = vst [vmem:[%s3573_s13 + $0x40] sm:$0xff] %v2766_v9   ;;  %v1515_v21 = vmul.f32 0.2, %v1129_v11  ;;  %v1645_v22 = vsel %vm1389_vm9, %v1137_v6, %v1517_v17  ;;  %vm1326_vm12 = vcmp.ge.f32.partialorder %v884_v12, 0.0  ;;  %v1454_v23 = vmul.f32 0.2, %v884_v12 }
 0x12d   : > { %3082 = vst [vmem:[%s3573_s13 + $0x140] sm:$0xff] %v2926_v15   ;;  %v1140_v24 = vadd.f32 %v3281_v56, %v3556_v8  ;;  %v1579_v27 = vsel %vm1323_vm10, %v873_v7, %v1451_v20  ;;  %v876_v29 = vadd.f32 %v3556_v8, %v875_v61  ;;  %v1132_v30 = vadd.f32 %v3556_v8, %v1131_v62  ;;  %v891_v31 = vpop.f32.mrb[27].mxu0  ;;  %v1147_v32 = vpop.f32.mrb[27].mxu1 }
 0x12e   : > { %v1643_v28 = vsel %vm1387_vm11, %v1129_v11, %v1515_v21  ;;  %v1582_v33 = vsel %vm1326_vm12, %v884_v12, %v1454_v23  ;;  %v897_v35 = vadd.f32 %v3220_v13, %v3556_v8  ;;  %v1153_v43 = vadd.f32 %v3284_v14, %v3556_v8 }
 0x12f   : > { %vm1390_vm13 = vcmp.ge.f32.partialorder %v1140_v24, 0.0  ;;  %v1518_v34 = vmul.f32 0.2, %v1140_v24  ;;  %v2781_v36 = vpack.c.bf16 %v1582_v33, %v1581_v16  ;;  %vm1324_vm14 = vcmp.ge.f32.partialorder %v876_v29, 0.0 }
 0x130   : > { %v1452_v37 = vmul.f32 0.2, %v876_v29  ;;  %vm1388_vm15 = vcmp.ge.f32.partialorder %v1132_v30, 0.0  ;;  %v1516_v39 = vmul.f32 0.2, %v1132_v30  ;;  %vm1329_vm0 = vcmp.ge.f32.partialorder %v897_v35, 0.0 }
 0x131   : > { %v1646_v38 = vsel %vm1390_vm13, %v1140_v24, %v1518_v34  ;;  %v1457_v40 = vmul.f32 0.2, %v897_v35  ;;  %3053 = vst [vmem:[%s3573_s13 + $0x58] sm:$0xff] %v2781_v36   ;;  %v889_v44 = vadd.f32 %v3556_v8, %v888_v18  ;;  %v3224_v45 = vpop.f32.mrb[28].mxu0  ;;  %v3288_v46 = vpop.f32.mrb[28].mxu1  ;;  %v1145_v50 = vadd.f32 %v3556_v8, %v1144_v19 }
 0x132   : > { %v2941_v41 = vpack.c.bf16 %v1646_v38, %v1645_v22  ;;  %v1580_v42 = vsel %vm1324_vm14, %v876_v29, %v1452_v37  ;;  %v1644_v48 = vsel %vm1388_vm15, %v1132_v30, %v1516_v39  ;;  %v904_v51 = vpop.f32.mrb[29].mxu0  ;;  %v1160_v52 = vpop.f32.mrb[29].mxu1  ;;  %vm1393_vm1 = vcmp.ge.f32.partialorder %v1153_v43, 0.0 }
 0x133   : > { %v2776_v47 = vpack.c.bf16 %v1580_v42, %v1579_v27  ;;  %v1585_v49 = vsel %vm1329_vm0, %v897_v35, %v1457_v40  ;;  %v2936_v53 = vpack.c.bf16 %v1644_v48, %v1643_v28  ;;  %v1521_v54 = vmul.f32 0.2, %v1153_v43  ;;  %v3225_v55 = vpop.f32.mrb[30].mxu0  ;;  %v3289_v56 = vpop.f32.mrb[30].mxu1 }
 0x134   : > { %3085 = vst [vmem:[%s3573_s13 + $0x158] sm:$0xff] %v2941_v41   ;;  %vm1327_vm2 = vcmp.ge.f32.partialorder %v889_v44, 0.0  ;;  %v1455_v57 = vmul.f32 0.2, %v889_v44  ;;  %vm1391_vm3 = vcmp.ge.f32.partialorder %v1145_v50, 0.0  ;;  %v900_v59 = vadd.f32 %v3221_v25, %v3556_v8  ;;  %v907_v60 = vpop.f32.mrb[31].mxu0 }
 0x135   : > { %3052 = vst [vmem:[%s3573_s13 + $0x50] sm:$0xff] %v2776_v47   ;;  %v1519_v58 = vmul.f32 0.2, %v1145_v50  ;;  %3084 = vst [vmem:[%s3573_s13 + $0x150] sm:$0xff] %v2936_v53   ;;  %v1649_v61 = vsel %vm1393_vm1, %v1153_v43, %v1521_v54  ;;  %v1156_v62 = vadd.f32 %v3285_v26, %v3556_v8  ;;  %v892_v63 = vadd.f32 %v3556_v8, %v891_v31  ;;  %v1163_v1 = vpop.f32.mrb[31].mxu1 }
 0x136   : > { %v1148_v0 = vadd.f32 %v3556_v8, %v1147_v32  ;;  %v1583_v2 = vsel %vm1327_vm2, %v889_v44, %v1455_v57  ;;  %vm1330_vm4 = vcmp.ge.f32.partialorder %v900_v59, 0.0  ;;  %v1458_v4 = vmul.f32 0.2, %v900_v59 }
 0x137   : > { %v1647_v3 = vsel %vm1391_vm3, %v1145_v50, %v1519_v58  ;;  %vm1394_vm5 = vcmp.ge.f32.partialorder %v1156_v62, 0.0  ;;  %v1522_v5 = vmul.f32 0.2, %v1156_v62  ;;  %vm1328_vm6 = vcmp.ge.f32.partialorder %v892_v63, 0.0 }
 0x138   : > { %v1456_v6 = vmul.f32 0.2, %v892_v63  ;;  %v1586_v7 = vsel %vm1330_vm4, %v900_v59, %v1458_v4  ;;  %vm1392_vm7 = vcmp.ge.f32.partialorder %v1148_v0, 0.0  ;;  %v1520_v9 = vmul.f32 0.2, %v1148_v0 }
 0x139   : > { %v913_v10 = vadd.f32 %v3224_v45, %v3556_v8  ;;  %v2791_v11 = vpack.c.bf16 %v1586_v7, %v1585_v49  ;;  %v1650_v12 = vsel %vm1394_vm5, %v1156_v62, %v1522_v5  ;;  %v1169_v14 = vadd.f32 %v3288_v46, %v3556_v8  ;;  %v3228_v15 = vpop.f32.mrb[32].mxu0  ;;  %v3292_v16 = vpop.f32.mrb[32].mxu1 }
 0x13a   : > { %v1584_v13 = vsel %vm1328_vm6, %v892_v63, %v1456_v6  ;;  %v2951_v17 = vpack.c.bf16 %v1650_v12, %v1649_v61  ;;  %v1648_v19 = vsel %vm1392_vm7, %v1148_v0, %v1520_v9  ;;  %v920_v20 = vpop.f32.mrb[33].mxu0  ;;  %v1176_v21 = vpop.f32.mrb[33].mxu1  ;;  %v905_v26 = vadd.f32 %v3556_v8, %v904_v51 }
 0x13b   : > { %v2786_v18 = vpack.c.bf16 %v1584_v13, %v1583_v2  ;;  %vm1333_vm8 = vcmp.ge.f32.partialorder %v913_v10, 0.0  ;;  %3055 = vst [vmem:[%s3573_s13 + $0x68] sm:$0xff] %v2791_v11   ;;  %v2946_v22 = vpack.c.bf16 %v1648_v19, %v1647_v3  ;;  %v1461_v23 = vmul.f32 0.2, %v913_v10  ;;  %v3229_v25 = vpop.f32.mrb[34].mxu0  ;;  %v3293_v30 = vpop.f32.mrb[34].mxu1 }
 0x13c   : > { %vm1397_vm9 = vcmp.ge.f32.partialorder %v1169_v14, 0.0  ;;  %v1525_v24 = vmul.f32 0.2, %v1169_v14  ;;  %3087 = vst [vmem:[%s3573_s13 + $0x168] sm:$0xff] %v2951_v17   ;;  %v1161_v27 = vadd.f32 %v3556_v8, %v1160_v52  ;;  %v916_v28 = vadd.f32 %v3225_v55, %v3556_v8  ;;  %v923_v31 = vpop.f32.mrb[35].mxu0  ;;  %v1179_v36 = vpop.f32.mrb[35].mxu1 }
 0x13d   : > { %3054 = vst [vmem:[%s3573_s13 + $0x60] sm:$0xff] %v2786_v18   ;;  %v1172_v29 = vadd.f32 %v3289_v56, %v3556_v8  ;;  %3086 = vst [vmem:[%s3573_s13 + $0x160] sm:$0xff] %v2946_v22   ;;  %v1589_v32 = vsel %vm1333_vm8, %v913_v10, %v1461_v23  ;;  %v908_v34 = vadd.f32 %v3556_v8, %v907_v60  ;;  %vm1331_vm10 = vcmp.ge.f32.partialorder %v905_v26, 0.0 }
 0x13e   : > { %v1653_v33 = vsel %vm1397_vm9, %v1169_v14, %v1525_v24  ;;  %v1164_v35 = vadd.f32 %v3556_v8, %v1163_v1  ;;  %v1459_v37 = vmul.f32 0.2, %v905_v26  ;;  %vm1395_vm11 = vcmp.ge.f32.partialorder %v1161_v27, 0.0 }
 0x13f   : > { %v1523_v38 = vmul.f32 0.2, %v1161_v27  ;;  %vm1334_vm12 = vcmp.ge.f32.partialorder %v916_v28, 0.0  ;;  %v1462_v39 = vmul.f32 0.2, %v916_v28  ;;  %vm1398_vm13 = vcmp.ge.f32.partialorder %v1172_v29, 0.0 }
 0x140   : > { %v1526_v40 = vmul.f32 0.2, %v1172_v29  ;;  %v1587_v41 = vsel %vm1331_vm10, %v905_v26, %v1459_v37  ;;  %vm1332_vm14 = vcmp.ge.f32.partialorder %v908_v34, 0.0  ;;  %v1460_v43 = vmul.f32 0.2, %v908_v34 }
 0x141   : > { %v1651_v42 = vsel %vm1395_vm11, %v1161_v27, %v1523_v38  ;;  %v1590_v44 = vsel %vm1334_vm12, %v916_v28, %v1462_v39  ;;  %vm1396_vm15 = vcmp.ge.f32.partialorder %v1164_v35, 0.0  ;;  %v1524_v46 = vmul.f32 0.2, %v1164_v35  ;;  %v3232_v47 = vpop.f32.mrb[36].mxu0  ;;  %v3296_v48 = vpop.f32.mrb[36].mxu1 }
 0x142   : > { %v1654_v45 = vsel %vm1398_vm13, %v1172_v29, %v1526_v40  ;;  %v2801_v49 = vpack.c.bf16 %v1590_v44, %v1589_v32  ;;  %v1588_v51 = vsel %vm1332_vm14, %v908_v34, %v1460_v43  ;;  %v929_v52 = vadd.f32 %v3228_v15, %v3556_v8  ;;  %v3661_v53 = vpop.f32.mrb[37].mxu0  ;;  %v3663_v54 = vpop.f32.mrb[37].mxu1 }
 0x143   : > { %v2961_v50 = vpack.c.bf16 %v1654_v45, %v1653_v33  ;;  %v2796_v55 = vpack.c.bf16 %v1588_v51, %v1587_v41  ;;  %v1652_v56 = vsel %vm1396_vm15, %v1164_v35, %v1524_v46  ;;  %v1185_v57 = vadd.f32 %v3292_v16, %v3556_v8  ;;  %v3233_v59 = vpop.f32.mrb[38].mxu0  ;;  %v3297_v60 = vpop.f32.mrb[38].mxu1 }
 0x144   : > { %v921_v58 = vadd.f32 %v3556_v8, %v920_v20  ;;  %3057 = vst [vmem:[%s3573_s13 + $0x78] sm:$0xff] %v2801_v49   ;;  %v2956_v61 = vpack.c.bf16 %v1652_v56, %v1651_v42  ;;  %vm1337_vm0 = vcmp.ge.f32.partialorder %v929_v52, 0.0  ;;  %v1465_v62 = vmul.f32 0.2, %v929_v52  ;;  %v939_v0 = vpop.f32.mrb[39].mxu0  ;;  %v1195_v1 = vpop.f32.mrb[39].mxu1 }
 0x145   : > { %3089 = vst [vmem:[%s3573_s13 + $0x178] sm:$0xff] %v2961_v50   ;;  %v1177_v63 = vadd.f32 %v3556_v8, %v1176_v21  ;;  %3056 = vst [vmem:[%s3573_s13 + $0x70] sm:$0xff] %v2796_v55   ;;  %vm1401_vm1 = vcmp.ge.f32.partialorder %v1185_v57, 0.0  ;;  %v1529_v2 = vmul.f32 0.2, %v1185_v57  ;;  %v932_v6 = vadd.f32 %v3229_v25, %v3556_v8 }
 0x146   : > { %vm1335_vm2 = vcmp.ge.f32.partialorder %v921_v58, 0.0  ;;  %v1463_v3 = vmul.f32 0.2, %v921_v58  ;;  %3088 = vst [vmem:[%s3573_s13 + $0x170] sm:$0xff] %v2956_v61   ;;  %v1593_v4 = vsel %vm1337_vm0, %v929_v52, %v1465_v62  ;;  %v1188_v10 = vadd.f32 %v3293_v30, %v3556_v8 }
 0x147   : > { %vm1399_vm3 = vcmp.ge.f32.partialorder %v1177_v63, 0.0  ;;  %v1527_v5 = vmul.f32 0.2, %v1177_v63  ;;  %v1657_v7 = vsel %vm1401_vm1, %v1185_v57, %v1529_v2  ;;  %v924_v11 = vadd.f32 %v3556_v8, %v923_v31 }
 0x148   : > { %v1591_v9 = vsel %vm1335_vm2, %v921_v58, %v1463_v3  ;;  %vm1338_vm4 = vcmp.ge.f32.partialorder %v932_v6, 0.0  ;;  %v1466_v13 = vmul.f32 0.2, %v932_v6  ;;  %v1180_v14 = vadd.f32 %v3556_v8, %v1179_v36 }
 0x149   : > { %v1655_v12 = vsel %vm1399_vm3, %v1177_v63, %v1527_v5  ;;  %vm1402_vm5 = vcmp.ge.f32.partialorder %v1188_v10, 0.0  ;;  %v1530_v15 = vmul.f32 0.2, %v1188_v10  ;;  %vm1336_vm6 = vcmp.ge.f32.partialorder %v924_v11, 0.0  ;;  %v3236_v20 = vpop.f32.mrb[40].mxu0  ;;  %v3300_v21 = vpop.f32.mrb[40].mxu1 }
 0x14a   : > { %v1464_v16 = vmul.f32 0.2, %v924_v11  ;;  %v1594_v17 = vsel %vm1338_vm4, %v932_v6, %v1466_v13  ;;  %vm1400_vm7 = vcmp.ge.f32.partialorder %v1180_v14, 0.0  ;;  %v1528_v18 = vmul.f32 0.2, %v1180_v14  ;;  %v952_v26 = vpop.f32.mrb[41].mxu0 }
 0x14b   : > { %v945_v19 = vadd.f32 %v3232_v47, %v3556_v8  ;;  %v2811_v22 = vpack.c.bf16 %v1594_v17, %v1593_v4  ;;  %v1658_v23 = vsel %vm1402_vm5, %v1188_v10, %v1530_v15  ;;  %v1201_v25 = vadd.f32 %v3296_v48, %v3556_v8  ;;  %v1208_v27 = vpop.f32.mrb[41].mxu1  ;;  %v3678_v31 = vpop.f32.mrb[42].mxu0 }
 0x14c   : > { %v1592_v24 = vsel %vm1336_vm6, %v924_v11, %v1464_v16  ;;  %v2971_v28 = vpack.c.bf16 %v1658_v23, %v1657_v7  ;;  %v1656_v30 = vsel %vm1400_vm7, %v1180_v14, %v1528_v18  ;;  %v3680_v32 = vpop.f32.mrb[42].mxu1  ;;  %v3683_v36 = vpop.f32.mrb[43].mxu0  ;;  %v937_v37 = vadd.f32 %v3556_v8, %v3661_v53 }
 0x14d   : > { %v2806_v29 = vpack.c.bf16 %v1592_v24, %v1591_v9  ;;  %vm1341_vm8 = vcmp.ge.f32.partialorder %v945_v19, 0.0  ;;  %3059 = vst [vmem:[%s3573_s13 + $0x88] sm:$0xff] %v2811_v22   ;;  %v2966_v33 = vpack.c.bf16 %v1656_v30, %v1655_v12  ;;  %v1469_v34 = vmul.f32 0.2, %v945_v19  ;;  %v3693_v41 = vpop.f32.mrb[43].mxu1 }
 0x14e   : > { %vm1405_vm9 = vcmp.ge.f32.partialorder %v1201_v25, 0.0  ;;  %v1533_v35 = vmul.f32 0.2, %v1201_v25  ;;  %3091 = vst [vmem:[%s3573_s13 + $0x188] sm:$0xff] %v2971_v28   ;;  %v1193_v38 = vadd.f32 %v3556_v8, %v3663_v54  ;;  %v948_v39 = vadd.f32 %v3233_v59, %v3556_v8 }
 0x14f   : > { %3058 = vst [vmem:[%s3573_s13 + $0x80] sm:$0xff] %v2806_v29   ;;  %v1204_v40 = vadd.f32 %v3297_v60, %v3556_v8  ;;  %3090 = vst [vmem:[%s3573_s13 + $0x180] sm:$0xff] %v2966_v33   ;;  %v1597_v42 = vsel %vm1341_vm8, %v945_v19, %v1469_v34  ;;  %v940_v44 = vadd.f32 %v3556_v8, %v939_v0  ;;  %vm1339_vm10 = vcmp.ge.f32.partialorder %v937_v37, 0.0  ;;  %v3724_v19 = vld [vmem:[%s3902_s2] ss:$0 sm:$0xff] }
 0x150   : > { %v1661_v43 = vsel %vm1405_vm9, %v1201_v25, %v1533_v35  ;;  %v1196_v45 = vadd.f32 %v3556_v8, %v1195_v1  ;;  %v1467_v46 = vmul.f32 0.2, %v937_v37  ;;  %vm1403_vm11 = vcmp.ge.f32.partialorder %v1193_v38, 0.0 }
 0x151   : > { %v1531_v47 = vmul.f32 0.2, %v1193_v38  ;;  %vm1342_vm12 = vcmp.ge.f32.partialorder %v948_v39, 0.0  ;;  %v1470_v48 = vmul.f32 0.2, %v948_v39  ;;  %vm1406_vm13 = vcmp.ge.f32.partialorder %v1204_v40, 0.0 }
 0x152   : > { %v1534_v49 = vmul.f32 0.2, %v1204_v40  ;;  %v1595_v50 = vsel %vm1339_vm10, %v937_v37, %v1467_v46  ;;  %vm1340_vm14 = vcmp.ge.f32.partialorder %v940_v44, 0.0  ;;  %v1468_v52 = vmul.f32 0.2, %v940_v44  ;;  %v3240_v53 = vpop.f32.mrb[44].mxu0 }
 0x153   : > { %v1659_v51 = vsel %vm1403_vm11, %v1193_v38, %v1531_v47  ;;  %v3304_v54 = vpop.f32.mrb[44].mxu1  ;;  %v1598_v55 = vsel %vm1342_vm12, %v948_v39, %v1470_v48  ;;  %vm1404_vm15 = vcmp.ge.f32.partialorder %v1196_v45, 0.0  ;;  %v1532_v57 = vmul.f32 0.2, %v1196_v45  ;;  %v3699_v58 = vpop.f32.mrb[45].mxu0 }
 0x154   : > { %v1662_v56 = vsel %vm1406_vm13, %v1204_v40, %v1534_v49  ;;  %v3701_v59 = vpop.f32.mrb[45].mxu1  ;;  %v2821_v60 = vpack.c.bf16 %v1598_v55, %v1597_v42  ;;  %v1596_v62 = vsel %vm1340_vm14, %v940_v44, %v1468_v52  ;;  %v961_v63 = vadd.f32 %v3236_v20, %v3556_v8  ;;  %v3704_v0 = vpop.f32.mrb[46].mxu0 }
 0x155   : > { %v2981_v61 = vpack.c.bf16 %v1662_v56, %v1661_v43  ;;  %v3706_v1 = vpop.f32.mrb[46].mxu1  ;;  %v2816_v2 = vpack.c.bf16 %v1596_v62, %v1595_v50  ;;  %v1660_v3 = vsel %vm1404_vm15, %v1196_v45, %v1532_v57  ;;  %v1217_v4 = vadd.f32 %v3300_v21, %v3556_v8  ;;  %v3710_v6 = vpop.f32.mrb[47].mxu0 }
 0x156   : > { %v953_v5 = vadd.f32 %v3556_v8, %v952_v26  ;;  %v3712_v7 = vpop.f32.mrb[47].mxu1  ;;  %3061 = vst [vmem:[%s3573_s13 + $0x98] sm:$0xff] %v2821_v60   ;;  %v2976_v9 = vpack.c.bf16 %v1660_v3, %v1659_v51  ;;  %vm1345_vm0 = vcmp.ge.f32.partialorder %v961_v63, 0.0  ;;  %v1473_v10 = vmul.f32 0.2, %v961_v63 }
 0x157   : > { %3093 = vst [vmem:[%s3573_s13 + $0x198] sm:$0xff] %v2981_v61   ;;  %v1209_v11 = vadd.f32 %v3556_v8, %v1208_v27  ;;  %3060 = vst [vmem:[%s3573_s13 + $0x90] sm:$0xff] %v2816_v2   ;;  %vm1409_vm1 = vcmp.ge.f32.partialorder %v1217_v4, 0.0  ;;  %v1537_v12 = vmul.f32 0.2, %v1217_v4  ;;  %v964_v16 = vadd.f32 %v3678_v31, %v3556_v8 }
 0x158   : > { %vm1343_vm2 = vcmp.ge.f32.partialorder %v953_v5, 0.0  ;;  %v1471_v13 = vmul.f32 0.2, %v953_v5  ;;  %3092 = vst [vmem:[%s3573_s13 + $0x190] sm:$0xff] %v2976_v9   ;;  %v1601_v14 = vsel %vm1345_vm0, %v961_v63, %v1473_v10  ;;  %v1220_v20 = vadd.f32 %v3724_v19, %v3680_v32 }
 0x159   : > { %vm1407_vm3 = vcmp.ge.f32.partialorder %v1209_v11, 0.0  ;;  %v1535_v15 = vmul.f32 0.2, %v1209_v11  ;;  %v1665_v17 = vsel %vm1409_vm1, %v1217_v4, %v1537_v12  ;;  %v956_v21 = vadd.f32 %v3724_v19, %v3683_v36  ;;  %v3730_v22 = vpop.f32.mrb[48].mxu0  ;;  %v3732_v23 = vpop.f32.mrb[48].mxu1 }
 0x15a   : > { %v1599_v18 = vsel %vm1343_vm2, %v953_v5, %v1471_v13  ;;  %vm1346_vm4 = vcmp.ge.f32.partialorder %v964_v16, 0.0  ;;  %v1474_v8 = vmul.f32 0.2, %v964_v16  ;;  %v1212_v25 = vadd.f32 %v3724_v19, %v3693_v41  ;;  %v3736_v26 = vpop.f32.mrb[49].mxu0  ;;  %v3738_v27 = vpop.f32.mrb[49].mxu1 }
 0x15b   : > { %v1663_v24 = vsel %vm1407_vm3, %v1209_v11, %v1535_v15  ;;  %vm1410_vm5 = vcmp.ge.f32.partialorder %v1220_v20, 0.0  ;;  %v1538_v28 = vmul.f32 0.2, %v1220_v20  ;;  %vm1344_vm6 = vcmp.ge.f32.partialorder %v956_v21, 0.0  ;;  %v3741_v33 = vpop.f32.mrb[50].mxu0  ;;  %v3743_v34 = vpop.f32.mrb[50].mxu1 }
 0x15c   : > { %v1472_v29 = vmul.f32 0.2, %v956_v21  ;;  %v1602_v30 = vsel %vm1346_vm4, %v964_v16, %v1474_v8  ;;  %vm1408_vm7 = vcmp.ge.f32.partialorder %v1212_v25, 0.0  ;;  %v1536_v31 = vmul.f32 0.2, %v1212_v25  ;;  %v3746_v39 = vpop.f32.mrb[51].mxu0 }
 0x15d   : > { %v977_v32 = vadd.f32 %v3724_v19, %v3240_v53  ;;  %v2831_v35 = vpack.c.bf16 %v1602_v30, %v1601_v14  ;;  %v1666_v36 = vsel %vm1410_vm5, %v1220_v20, %v1538_v28  ;;  %v1233_v38 = vadd.f32 %v3724_v19, %v3304_v54  ;;  %v3748_v40 = vpop.f32.mrb[51].mxu1 }
 0x15e   : > { %v1600_v37 = vsel %vm1344_vm6, %v956_v21, %v1472_v29  ;;  %v2991_v41 = vpack.c.bf16 %v1666_v36, %v1665_v17  ;;  %v1664_v43 = vsel %vm1408_vm7, %v1212_v25, %v1536_v31  ;;  %v969_v47 = vadd.f32 %v3724_v19, %v3699_v58 }
 0x15f   : > { %v2826_v42 = vpack.c.bf16 %v1600_v37, %v1599_v18  ;;  %vm1349_vm8 = vcmp.ge.f32.partialorder %v977_v32, 0.0  ;;  %3063 = vst [vmem:[%s3573_s13 + $0xa8] sm:$0xff] %v2831_v35   ;;  %v2986_v44 = vpack.c.bf16 %v1664_v43, %v1663_v24  ;;  %v1477_v45 = vmul.f32 0.2, %v977_v32 }
 0x160   : > { %vm1413_vm9 = vcmp.ge.f32.partialorder %v1233_v38, 0.0  ;;  %v1541_v46 = vmul.f32 0.2, %v1233_v38  ;;  %3095 = vst [vmem:[%s3573_s13 + $0x1a8] sm:$0xff] %v2991_v41   ;;  %v1225_v48 = vadd.f32 %v3724_v19, %v3701_v59  ;;  %v980_v49 = vadd.f32 %v3724_v19, %v3704_v0 }
 0x161   : > { %3062 = vst [vmem:[%s3573_s13 + $0xa0] sm:$0xff] %v2826_v42   ;;  %v1236_v50 = vadd.f32 %v3724_v19, %v3706_v1  ;;  %3094 = vst [vmem:[%s3573_s13 + $0x1a0] sm:$0xff] %v2986_v44   ;;  %v1605_v51 = vsel %vm1349_vm8, %v977_v32, %v1477_v45  ;;  %v972_v53 = vadd.f32 %v3724_v19, %v3710_v6  ;;  %v3766_v55 = vpop.f32.mrb[52].mxu0  ;;  %v3768_v56 = vpop.f32.mrb[52].mxu1  ;;  %vm1347_vm10 = vcmp.ge.f32.partialorder %v969_v47, 0.0 }
 0x162   : > { %v1669_v52 = vsel %vm1413_vm9, %v1233_v38, %v1541_v46  ;;  %v1228_v54 = vadd.f32 %v3724_v19, %v3712_v7  ;;  %v1475_v57 = vmul.f32 0.2, %v969_v47  ;;  %vm1411_vm11 = vcmp.ge.f32.partialorder %v1225_v48, 0.0  ;;  %v3770_v0 = vpop.f32.mrb[53].mxu0  ;;  %v3772_v1 = vpop.f32.mrb[53].mxu1 }
 0x163   : > { %v1539_v58 = vmul.f32 0.2, %v1225_v48  ;;  %vm1350_vm12 = vcmp.ge.f32.partialorder %v980_v49, 0.0  ;;  %v1478_v59 = vmul.f32 0.2, %v980_v49  ;;  %vm1414_vm13 = vcmp.ge.f32.partialorder %v1236_v50, 0.0 }
 0x164   : > { %v1542_v60 = vmul.f32 0.2, %v1236_v50  ;;  %v1603_v61 = vsel %vm1347_vm10, %v969_v47, %v1475_v57  ;;  %vm1348_vm14 = vcmp.ge.f32.partialorder %v972_v53, 0.0  ;;  %v1476_v63 = vmul.f32 0.2, %v972_v53  ;;  %v3774_v5 = vpop.f32.mrb[54].mxu0 }
 0x165   : > { %v1667_v62 = vsel %vm1411_vm11, %v1225_v48, %v1539_v58  ;;  %v1606_v2 = vsel %vm1350_vm12, %v980_v49, %v1478_v59  ;;  %vm1412_vm15 = vcmp.ge.f32.partialorder %v1228_v54, 0.0  ;;  %v1540_v4 = vmul.f32 0.2, %v1228_v54  ;;  %v3776_v6 = vpop.f32.mrb[54].mxu1  ;;  %v3780_v12 = vpop.f32.mrb[55].mxu0 }
 0x166   : > { %v1670_v3 = vsel %vm1414_vm13, %v1236_v50, %v1542_v60  ;;  %v2841_v7 = vpack.c.bf16 %v1606_v2, %v1605_v51  ;;  %v1604_v10 = vsel %vm1348_vm14, %v972_v53, %v1476_v63  ;;  %v993_v11 = vadd.f32 %v3724_v19, %v3730_v22  ;;  %v3782_v13 = vpop.f32.mrb[55].mxu1 }
 0x167   : > { %v3001_v9 = vpack.c.bf16 %v1670_v3, %v1669_v52  ;;  %v2836_v14 = vpack.c.bf16 %v1604_v10, %v1603_v61  ;;  %v1668_v15 = vsel %vm1412_vm15, %v1228_v54, %v1540_v4  ;;  %v1249_v16 = vadd.f32 %v3724_v19, %v3732_v23 }
 0x168   : > { %v985_v17 = vadd.f32 %v3724_v19, %v3736_v26  ;;  %3065 = vst [vmem:[%s3573_s13 + $0xb8] sm:$0xff] %v2841_v7   ;;  %v2996_v18 = vpack.c.bf16 %v1668_v15, %v1667_v62  ;;  %vm1353_vm0 = vcmp.ge.f32.partialorder %v993_v11, 0.0  ;;  %v1481_v20 = vmul.f32 0.2, %v993_v11 }
 0x169   : > { %3097 = vst [vmem:[%s3573_s13 + $0x1b8] sm:$0xff] %v3001_v9   ;;  %v1241_v21 = vadd.f32 %v3724_v19, %v3738_v27  ;;  %3064 = vst [vmem:[%s3573_s13 + $0xb0] sm:$0xff] %v2836_v14   ;;  %vm1417_vm1 = vcmp.ge.f32.partialorder %v1249_v16, 0.0  ;;  %v1545_v22 = vmul.f32 0.2, %v1249_v16  ;;  %v996_v25 = vadd.f32 %v3724_v19, %v3741_v33  ;;  %v3796_v26 = vpop.f32.mrb[56].mxu0 }
 0x16a   : > { %vm1351_vm2 = vcmp.ge.f32.partialorder %v985_v17, 0.0  ;;  %v1479_v24 = vmul.f32 0.2, %v985_v17  ;;  %3096 = vst [vmem:[%s3573_s13 + $0x1b0] sm:$0xff] %v2996_v18   ;;  %v1609_v8 = vsel %vm1353_vm0, %v993_v11, %v1481_v20  ;;  %v3798_v28 = vpop.f32.mrb[56].mxu1  ;;  %v1252_v27 = vadd.f32 %v3724_v19, %v3743_v34  ;;  %v3804_v32 = vpop.f32.mrb[57].mxu0 }
 0x16b   : > { %vm1415_vm3 = vcmp.ge.f32.partialorder %v1241_v21, 0.0  ;;  %v1543_v23 = vmul.f32 0.2, %v1241_v21  ;;  %v1673_v29 = vsel %vm1417_vm1, %v1249_v16, %v1545_v22  ;;  %v988_v31 = vadd.f32 %v3724_v19, %v3746_v39  ;;  %v3806_v35 = vpop.f32.mrb[57].mxu1  ;;  %v3810_v38 = vpop.f32.mrb[58].mxu0 }
 0x16c   : > { %v1607_v30 = vsel %vm1351_vm2, %v985_v17, %v1479_v24  ;;  %vm1354_vm4 = vcmp.ge.f32.partialorder %v996_v25, 0.0  ;;  %v1482_v37 = vmul.f32 0.2, %v996_v25  ;;  %v1244_v33 = vadd.f32 %v3724_v19, %v3748_v40  ;;  %v3812_v41 = vpop.f32.mrb[58].mxu1  ;;  %v3816_v45 = vpop.f32.mrb[59].mxu0 }
 0x16d   : > { %v1671_v36 = vsel %vm1415_vm3, %v1241_v21, %v1543_v23  ;;  %vm1418_vm5 = vcmp.ge.f32.partialorder %v1252_v27, 0.0  ;;  %v1546_v42 = vmul.f32 0.2, %v1252_v27  ;;  %vm1352_vm6 = vcmp.ge.f32.partialorder %v988_v31, 0.0  ;;  %v3818_v46 = vpop.f32.mrb[59].mxu1 }
 0x16e   : > { %v1480_v34 = vmul.f32 0.2, %v988_v31  ;;  %v1610_v39 = vsel %vm1354_vm4, %v996_v25, %v1482_v37  ;;  %vm1416_vm7 = vcmp.ge.f32.partialorder %v1244_v33, 0.0  ;;  %v1544_v43 = vmul.f32 0.2, %v1244_v33 }
 0x16f   : > { %v1009_v44 = vadd.f32 %v3724_v19, %v3766_v55  ;;  %v2851_v40 = vpack.c.bf16 %v1610_v39, %v1609_v8  ;;  %v1674_v47 = vsel %vm1418_vm5, %v1252_v27, %v1546_v42  ;;  %v1265_v49 = vadd.f32 %v3724_v19, %v3768_v56 }
 0x170   : > { %v1608_v48 = vsel %vm1352_vm6, %v988_v31, %v1480_v34  ;;  %v3011_v50 = vpack.c.bf16 %v1674_v47, %v1673_v29  ;;  %v1672_v52 = vsel %vm1416_vm7, %v1244_v33, %v1544_v43  ;;  %v1001_v58 = vadd.f32 %v3724_v19, %v3770_v0 }
 0x171   : > { %v2846_v51 = vpack.c.bf16 %v1608_v48, %v1607_v30  ;;  %vm1357_vm8 = vcmp.ge.f32.partialorder %v1009_v44, 0.0  ;;  %3067 = vst [vmem:[%s3573_s13 + $0xc8] sm:$0xff] %v2851_v40   ;;  %v3006_v53 = vpack.c.bf16 %v1672_v52, %v1671_v36  ;;  %v1485_v54 = vmul.f32 0.2, %v1009_v44  ;;  %v3823_v57 = vpop.f32.mrb[60].mxu0  ;;  %v3835_v61 = vpop.f32.mrb[60].mxu1 }
 0x172   : > { %vm1421_vm9 = vcmp.ge.f32.partialorder %v1265_v49, 0.0  ;;  %v1549_v55 = vmul.f32 0.2, %v1265_v49  ;;  %3099 = vst [vmem:[%s3573_s13 + $0x1c8] sm:$0xff] %v3011_v50   ;;  %v1257_v56 = vadd.f32 %v3724_v19, %v3772_v1  ;;  %v1012_v59 = vadd.f32 %v3724_v19, %v3774_v5  ;;  %v3837_v62 = vpop.f32.mrb[61].mxu0  ;;  %v3845_v3 = vpop.f32.mrb[61].mxu1 }
 0x173   : > { %3066 = vst [vmem:[%s3573_s13 + $0xc0] sm:$0xff] %v2846_v51   ;;  %v1268_v60 = vadd.f32 %v3724_v19, %v3776_v6  ;;  %3098 = vst [vmem:[%s3573_s13 + $0x1c0] sm:$0xff] %v3006_v53   ;;  %v1613_v63 = vsel %vm1357_vm8, %v1009_v44, %v1485_v54  ;;  %v1004_v0 = vadd.f32 %v3724_v19, %v3780_v12  ;;  %v3847_v4 = vpop.f32.mrb[62].mxu0  ;;  %vm1355_vm10 = vcmp.ge.f32.partialorder %v1001_v58, 0.0  ;;  %v3849_v12 = vpop.f32.mrb[62].mxu1 }
 0x174   : > { %v1677_v2 = vsel %vm1421_vm9, %v1265_v49, %v1549_v55  ;;  %v1260_v1 = vadd.f32 %v3724_v19, %v3782_v13  ;;  %v1483_v5 = vmul.f32 0.2, %v1001_v58  ;;  %vm1419_vm11 = vcmp.ge.f32.partialorder %v1257_v56, 0.0  ;;  %v3851_v13 = vpop.f32.mrb[63].mxu0  ;;  %v1291_v18 = vpop.f32.mrb[63].mxu1 }
 0x175   : > { %v1547_v6 = vmul.f32 0.2, %v1257_v56  ;;  %vm1358_vm12 = vcmp.ge.f32.partialorder %v1012_v59, 0.0  ;;  %v1486_v7 = vmul.f32 0.2, %v1012_v59  ;;  %vm1422_vm13 = vcmp.ge.f32.partialorder %v1268_v60, 0.0 }
 0x176   : > { %v1550_v9 = vmul.f32 0.2, %v1268_v60  ;;  %v1611_v10 = vsel %vm1355_vm10, %v1001_v58, %v1483_v5  ;;  %vm1356_vm14 = vcmp.ge.f32.partialorder %v1004_v0, 0.0  ;;  %v1484_v14 = vmul.f32 0.2, %v1004_v0 }
 0x177   : > { %v1675_v11 = vsel %vm1419_vm11, %v1257_v56, %v1547_v6  ;;  %v1614_v15 = vsel %vm1358_vm12, %v1012_v59, %v1486_v7  ;;  %vm1420_vm15 = vcmp.ge.f32.partialorder %v1260_v1, 0.0  ;;  %v1548_v17 = vmul.f32 0.2, %v1260_v1 }
 0x178   : > { %v1678_v16 = vsel %vm1422_vm13, %v1268_v60, %v1550_v9  ;;  %v2861_v20 = vpack.c.bf16 %v1614_v15, %v1613_v63  ;;  %v1612_v22 = vsel %vm1356_vm14, %v1004_v0, %v1484_v14  ;;  %v1025_v24 = vadd.f32 %v3724_v19, %v3796_v26 }
 0x179   : > { %v3021_v21 = vpack.c.bf16 %v1678_v16, %v1677_v2  ;;  %v2856_v8 = vpack.c.bf16 %v1612_v22, %v1611_v10  ;;  %v1676_v23 = vsel %vm1420_vm15, %v1260_v1, %v1548_v17  ;;  %v1281_v25 = vadd.f32 %v3724_v19, %v3798_v28 }
 0x17a   : > { %v1017_v29 = vadd.f32 %v3724_v19, %v3804_v32  ;;  %3069 = vst [vmem:[%s3573_s13 + $0xd8] sm:$0xff] %v2861_v20   ;;  %v3016_v30 = vpack.c.bf16 %v1676_v23, %v1675_v11  ;;  %vm1361_vm0 = vcmp.ge.f32.partialorder %v1025_v24, 0.0  ;;  %v1489_v27 = vmul.f32 0.2, %v1025_v24 }
 0x17b   : > { %3101 = vst [vmem:[%s3573_s13 + $0x1d8] sm:$0xff] %v3021_v21   ;;  %v1273_v31 = vadd.f32 %v3724_v19, %v3806_v35  ;;  %3068 = vst [vmem:[%s3573_s13 + $0xd0] sm:$0xff] %v2856_v8   ;;  %vm1425_vm1 = vcmp.ge.f32.partialorder %v1281_v25, 0.0  ;;  %v1553_v26 = vmul.f32 0.2, %v1281_v25  ;;  %v1028_v28 = vadd.f32 %v3724_v19, %v3810_v38 }
 0x17c   : > { %vm1359_vm2 = vcmp.ge.f32.partialorder %v1017_v29, 0.0  ;;  %v1487_v36 = vmul.f32 0.2, %v1017_v29  ;;  %3100 = vst [vmem:[%s3573_s13 + $0x1d0] sm:$0xff] %v3016_v30   ;;  %v1617_v37 = vsel %vm1361_vm0, %v1025_v24, %v1489_v27  ;;  %v1284_v42 = vadd.f32 %v3724_v19, %v3812_v41 }
 0x17d   : > { %vm1423_vm3 = vcmp.ge.f32.partialorder %v1273_v31, 0.0  ;;  %v1681_v32 = vsel %vm1425_vm1, %v1281_v25, %v1553_v26  ;;  %v1551_v33 = vmul.f32 0.2, %v1273_v31  ;;  %v1020_v34 = vadd.f32 %v3724_v19, %v3816_v45 }
 0x17e   : > { %v1615_v35 = vsel %vm1359_vm2, %v1017_v29, %v1487_v36  ;;  %vm1362_vm4 = vcmp.ge.f32.partialorder %v1028_v28, 0.0  ;;  %v1490_v39 = vmul.f32 0.2, %v1028_v28  ;;  %v1276_v43 = vadd.f32 %v3724_v19, %v3818_v46 }
 0x17f   : > { %vm1426_vm5 = vcmp.ge.f32.partialorder %v1284_v42, 0.0  ;;  %v1554_v44 = vmul.f32 0.2, %v1284_v42  ;;  %vm1360_vm6 = vcmp.ge.f32.partialorder %v1020_v34, 0.0  ;;  %v1488_v40 = vmul.f32 0.2, %v1020_v34 }
 0x180   : > { %v1618_v38 = vsel %vm1362_vm4, %v1028_v28, %v1490_v39  ;;  %vm1424_vm7 = vcmp.ge.f32.partialorder %v1276_v43, 0.0  ;;  %v1552_v47 = vmul.f32 0.2, %v1276_v43  ;;  %v1041_v41 = vadd.f32 %v3724_v19, %v3823_v57 }
 0x181   : > { %v2871_v45 = vpack.c.bf16 %v1618_v38, %v1617_v37  ;;  %v1682_v48 = vsel %vm1426_vm5, %v1284_v42, %v1554_v44  ;;  %v1616_v49 = vsel %vm1360_vm6, %v1020_v34, %v1488_v40  ;;  %v1297_v50 = vadd.f32 %v3724_v19, %v3835_v61 }
 0x182   : > { %v1679_v46 = vsel %vm1423_vm3, %v1273_v31, %v1551_v33  ;;  %v3031_v51 = vpack.c.bf16 %v1682_v48, %v1681_v32  ;;  %v2866_v52 = vpack.c.bf16 %v1616_v49, %v1615_v35  ;;  %v1680_v53 = vsel %vm1424_vm7, %v1276_v43, %v1552_v47 }
 0x183   : > { %3071 = vst [vmem:[%s3573_s13 + $0xe8] sm:$0xff] %v2871_v45   ;;  %v3026_v54 = vpack.c.bf16 %v1680_v53, %v1679_v46  ;;  %vm1365_vm8 = vcmp.ge.f32.partialorder %v1041_v41, 0.0  ;;  %v1493_v55 = vmul.f32 0.2, %v1041_v41  ;;  %v1557_v58 = vmul.f32 0.2, %v1297_v50 }
 0x184   : > { %3103 = vst [vmem:[%s3573_s13 + $0x1e8] sm:$0xff] %v3031_v51   ;;  %3070 = vst [vmem:[%s3573_s13 + $0xe0] sm:$0xff] %v2866_v52   ;;  %v1033_v57 = vadd.f32 %v3724_v19, %v3837_v62  ;;  %v1289_v56 = vadd.f32 %v3724_v19, %v3845_v3  ;;  %v1044_v59 = vadd.f32 %v3724_v19, %v3847_v4  ;;  %vm1429_vm9 = vcmp.ge.f32.partialorder %v1297_v50, 0.0 }
 0x185   : > { %v1300_v60 = vadd.f32 %v3724_v19, %v3849_v12  ;;  %3102 = vst [vmem:[%s3573_s13 + $0x1e0] sm:$0xff] %v3026_v54   ;;  %v1036_v61 = vadd.f32 %v3724_v19, %v3851_v13  ;;  %v1292_v63 = vadd.f32 %v3724_v19, %v1291_v18  ;;  %v1621_v2 = vsel %vm1365_vm8, %v1041_v41, %v1493_v55 }
 0x186   : > { %vm1363_vm10 = vcmp.ge.f32.partialorder %v1033_v57, 0.0  ;;  %v1491_v0 = vmul.f32 0.2, %v1033_v57  ;;  %v1555_v62 = vmul.f32 0.2, %v1289_v56  ;;  %vm1366_vm11 = vcmp.ge.f32.partialorder %v1044_v59, 0.0 }
 0x187   : > { %v1494_v1 = vmul.f32 0.2, %v1044_v59  ;;  %vm1430_vm12 = vcmp.ge.f32.partialorder %v1300_v60, 0.0  ;;  %v1558_v3 = vmul.f32 0.2, %v1300_v60  ;;  %v1685_v4 = vsel %vm1429_vm9, %v1297_v50, %v1557_v58 }
 0x188   : > { %vm1427_vm13 = vcmp.ge.f32.partialorder %v1289_v56, 0.0  ;;  %vm1364_vm14 = vcmp.ge.f32.partialorder %v1036_v61, 0.0  ;;  %v1492_v5 = vmul.f32 0.2, %v1036_v61  ;;  %vm1428_vm15 = vcmp.ge.f32.partialorder %v1292_v63, 0.0 }
 0x189   : > { %v1622_v6 = vsel %vm1366_vm11, %v1044_v59, %v1494_v1  ;;  %v1686_v7 = vsel %vm1430_vm12, %v1300_v60, %v1558_v3  ;;  %v1556_v19 = vmul.f32 0.2, %v1292_v63  ;;  %v1619_v9 = vsel %vm1363_vm10, %v1033_v57, %v1491_v0 }
 0x18a   : > { %v2881_v10 = vpack.c.bf16 %v1622_v6, %v1621_v2  ;;  %v3041_v11 = vpack.c.bf16 %v1686_v7, %v1685_v4  ;;  %v1620_v14 = vsel %vm1364_vm14, %v1036_v61, %v1492_v5  ;;  %v1683_v12 = vsel %vm1427_vm13, %v1289_v56, %v1555_v62 }
 0x18b   : > { %v2876_v13 = vpack.c.bf16 %v1620_v14, %v1619_v9  ;;  %v1684_v15 = vsel %vm1428_vm15, %v1292_v63, %v1556_v19 }
 0x18c   : > { %3073 = vst [vmem:[%s3573_s13 + $0xf8] sm:$0xff] %v2881_v10   ;;  %3105 = vst [vmem:[%s3573_s13 + $0x1f8] sm:$0xff] %v3041_v11   ;;  %v3036_v16 = vpack.c.bf16 %v1684_v15, %v1683_v12 }
 0x18d   : > { %3072 = vst [vmem:[%s3573_s13 + $0xf0] sm:$0xff] %v2876_v13  }
 0x18e   : > { %3104 = vst [vmem:[%s3573_s13 + $0x1f0] sm:$0xff] %v3036_v16  }
 0x18f PF: > { %s13_s12 = sadd.s32 1, %s3425_s12  }
 0x190   : > { %p10_p4 = scmp.ge.s32.totalorder %s13_s12, 4  }
 0x192   :  { %12 = sbr.rel (!%p10_p4) target bundleno = 1 (0x1), region = 62 }

// kernel: discriminator_forward.5
= control target key start
LH: loop header
LB: loop body
LE: loop exit
PB: predicated region body
PF: predicated region fallthrough
CT: control target
= control target key end

     0   :  { %s2573_s15 = smov 0   ;;  %s2575_s16 = smov 0   ;;  %s3152_s0 = inlined_call_operand.vmem [shape: bf16[512,128], index: 0, kind: input, shape index: {}]   ;;  %s3153_s1 = inlined_call_operand.vmem [shape: bf16[128,128], index: 1, kind: input, shape index: {}]   ;;  %s3154_s2 = inlined_call_operand.vmem [shape: f32[1,128], index: 2, kind: input, shape index: {}]   ;;  %s3155_s3 = inlined_call_operand.vmem [shape: f32[1,128], index: 3, kind: input, shape index: {}]   ;;  %s3156_s4 = inlined_call_operand.vmem [shape: bf16[512,128], index: 4, kind: output, shape index: {}]  }
   0x1   :  { %s2577_s17 = smov 0  }
   0x2 LB: > { %s26_s18 = sadd.s32 1, %s2541_s16  ;;  %p1948_p0 = scmp.ge.s32.totalorder %s2545_s17, 1  ;;  %s2545_s17 = sphi %s2577_s17, %s14_s17   ;;  %s2541_s16 = sphi %s2575_s16, %s3158_s16   ;;  %s2537_s15 = sphi %s2573_s15, %s3157_s15  }
   0x3   : > { %p28_p1 = scmp.ge.s32.totalorder %s26_s18, 2  ;;  %p185_p2 = scmp.lt.s32.totalorder %s2545_s17, 3 }
   0x5   : > { %s3160_s18 = smov (%p28_p1, %s26_s18), 0  ;;  %p186_p3 = pnand %p1948_p0, %p185_p2 }
   0x6   : > { %p233_p4 = scmp.eq.s32.totalorder (!%p186_p3), %s2537_s15, 0 }
   0x7   : > { %189 = sbr.rel (%p186_p3) target bundleno = 543 (0x21f), region = 36 }
   0xe   : > { %238 = sbr.rel (!%p233_p4) target bundleno = 21 (0x15), region = 40  ;;  %v2547_v0 = vmov (%p233_p4), 0.0  }
   0xf   : > { %239 = vst [vmem:[#allocation3] sm:$0x1] (%p233_p4), %v2547_v0  ;;  %240 = vst [vmem:[#allocation4] sm:$0x1] (%p233_p4), %v2547_v0 }
  0x15 PF: > { %p1950_p5 = scmp.ne.s32.totalorder %s2537_s15, 0 }
  0x16   : > { %v2481_v1 = vld [vmem:[%s3153_s1] sm:$0xff] (!%p1950_p5)   ;;  %v2482_v2 = vld [vmem:[%s3153_s1 + $0x8] sm:$0xff] (!%p1950_p5)   ;;  %v2483_v3 = vld [vmem:[%s3153_s1 + $0x10] sm:$0xff] (!%p1950_p5)  }
  0x17   : > { %243 = sbr.rel (%p1950_p5) target bundleno = 413 (0x19d), region = 44  ;;  %2360 = vmatprep.subr.bf16.mxu0 (!%p1950_p5), %v2481_v1  ;;  %2440 = vmatprep.subr.bf16.mxu1 (!%p1950_p5), %v2481_v1  ;;  %v2484_v4 = vld [vmem:[%s3153_s1 + $0x18] sm:$0xff] (!%p1950_p5)   ;;  %v2489_v5 = vld [vmem:[%s3152_s0] sm:$0xff] (!%p1950_p5)   ;;  %v2486_v7 = vld [vmem:[%s3153_s1 + $0x28] sm:$0xff] (!%p1950_p5)  }
  0x18   : > { %2361 = vmatpush3.bf16.msra.mxu0 (!%p1950_p5), %v2481_v1  ;;  %2448 = vmatpush3.bf16.msra.mxu1 (!%p1950_p5), %v2481_v1  ;;  %v2485_v6 = vld [vmem:[%s3153_s1 + $0x20] sm:$0xff] (!%p1950_p5)   ;;  %v2487_v8 = vld [vmem:[%s3153_s1 + $0x30] sm:$0xff] (!%p1950_p5)   ;;  %v2488_v9 = vld [vmem:[%s3153_s1 + $0x38] sm:$0xff] (!%p1950_p5)  }
  0x19   : > { %2362 = vmatprep.subr.bf16.mxu0 (!%p1950_p5), %v2482_v2  ;;  %2441 = vmatprep.subr.bf16.mxu1 (!%p1950_p5), %v2482_v2  ;;  %v2505_v10 = vld [vmem:[%s3152_s0 + $0x80] sm:$0xff] (!%p1950_p5)   ;;  %v2490_v11 = vld [vmem:[%s3152_s0 + $0x8] sm:$0xff] (!%p1950_p5)   ;;  %v2491_v12 = vld [vmem:[%s3152_s0 + $0x10] sm:$0xff] (!%p1950_p5)  }
  0x1a   : > { %2376 = vmatprep.mubr.bf16.mxu0 (!%p1950_p5), %v2489_v5  ;;  %2408 = vmatprep.mubr.bf16.mxu1 (!%p1950_p5), %v2505_v10  ;;  %v2506_v13 = vld [vmem:[%s3152_s0 + $0x88] sm:$0xff] (!%p1950_p5)   ;;  %v2507_v14 = vld [vmem:[%s3152_s0 + $0x90] sm:$0xff] (!%p1950_p5)   ;;  %v2492_v15 = vld [vmem:[%s3152_s0 + $0x18] sm:$0xff] (!%p1950_p5)  }
  0x1b   : > { %v2493_v16 = vld [vmem:[%s3152_s0 + $0x20] sm:$0xff] (!%p1950_p5)   ;;  %v2508_v17 = vld [vmem:[%s3152_s0 + $0x98] sm:$0xff] (!%p1950_p5)   ;;  %v2494_v19 = vld [vmem:[%s3152_s0 + $0x28] sm:$0xff] (!%p1950_p5)  }
  0x1c   : > { %2363 = vmatpush3.bf16.msra.mxu0 (!%p1950_p5), %v2482_v2  ;;  %2449 = vmatpush3.bf16.msra.mxu1 (!%p1950_p5), %v2482_v2  ;;  %v2509_v18 = vld [vmem:[%s3152_s0 + $0xa0] sm:$0xff] (!%p1950_p5)   ;;  %v2510_v20 = vld [vmem:[%s3152_s0 + $0xa8] sm:$0xff] (!%p1950_p5)   ;;  %v2495_v21 = vld [vmem:[%s3152_s0 + $0x30] sm:$0xff] (!%p1950_p5)  }
  0x1d   : > { %2364 = vmatprep.subr.bf16.mxu0 (!%p1950_p5), %v2483_v3  ;;  %2442 = vmatprep.subr.bf16.mxu1 (!%p1950_p5), %v2483_v3  ;;  %v2511_v22 = vld [vmem:[%s3152_s0 + $0xb0] sm:$0xff] (!%p1950_p5)   ;;  %v2496_v23 = vld [vmem:[%s3152_s0 + $0x38] sm:$0xff] (!%p1950_p5)   ;;  %v2497_v25 = vld [vmem:[%s3152_s0 + $0x40] sm:$0xff] (!%p1950_p5)  }
  0x1e   : > { %v2512_v24 = vld [vmem:[%s3152_s0 + $0xb8] sm:$0xff]   ;;  %v2513_v26 = vld [vmem:[%s3152_s0 + $0xc0] sm:$0xff]   ;;  %v2498_v27 = vld [vmem:[%s3152_s0 + $0x48] sm:$0xff]  }
  0x1f   : > { %v2514_v28 = vld [vmem:[%s3152_s0 + $0xc8] sm:$0xff]   ;;  %v2499_v29 = vld [vmem:[%s3152_s0 + $0x50] sm:$0xff]   ;;  %v2500_v31 = vld [vmem:[%s3152_s0 + $0x58] sm:$0xff]  }
  0x20   : > { %2365 = vmatpush3.bf16.msra.mxu0 %v2483_v3  ;;  %2450 = vmatpush3.bf16.msra.mxu1 %v2483_v3  ;;  %v2515_v30 = vld [vmem:[%s3152_s0 + $0xd0] sm:$0xff]   ;;  %v2516_v32 = vld [vmem:[%s3152_s0 + $0xd8] sm:$0xff]   ;;  %v2501_v33 = vld [vmem:[%s3152_s0 + $0x60] sm:$0xff]  }
  0x21   : > { %2366 = vmatprep.subr.bf16.mxu0 %v2484_v4  ;;  %2443 = vmatprep.subr.bf16.mxu1 %v2484_v4  ;;  %v2517_v34 = vld [vmem:[%s3152_s0 + $0xe0] sm:$0xff]   ;;  %v2502_v35 = vld [vmem:[%s3152_s0 + $0x68] sm:$0xff]   ;;  %v2503_v37 = vld [vmem:[%s3152_s0 + $0x70] sm:$0xff]  }
  0x22   : > { %v2518_v36 = vld [vmem:[%s3152_s0 + $0xe8] sm:$0xff]   ;;  %v2519_v38 = vld [vmem:[%s3152_s0 + $0xf0] sm:$0xff]   ;;  %v2504_v39 = vld [vmem:[%s3152_s0 + $0x78] sm:$0xff]  }
  0x23   : > { %v2520_v40 = vld [vmem:[%s3152_s0 + $0xf8] sm:$0xff]  }
  0x24   : > { %2367 = vmatpush3.bf16.msra.mxu0 %v2484_v4  ;;  %2451 = vmatpush3.bf16.msra.mxu1 %v2484_v4 }
  0x25   : > { %2368 = vmatprep.subr.bf16.mxu0 %v2485_v6  ;;  %2444 = vmatprep.subr.bf16.mxu1 %v2485_v6 }
  0x28   : > { %2369 = vmatpush3.bf16.msra.mxu0 %v2485_v6  ;;  %2452 = vmatpush3.bf16.msra.mxu1 %v2485_v6 }
  0x29   : > { %2370 = vmatprep.subr.bf16.mxu0 %v2486_v7  ;;  %2445 = vmatprep.subr.bf16.mxu1 %v2486_v7 }
  0x2c   : > { %2371 = vmatpush3.bf16.msra.mxu0 %v2486_v7  ;;  %2453 = vmatpush3.bf16.msra.mxu1 %v2486_v7 }
  0x2d   : > { %2372 = vmatprep.subr.bf16.mxu0 %v2487_v8  ;;  %2446 = vmatprep.subr.bf16.mxu1 %v2487_v8 }
  0x30   : > { %2373 = vmatpush3.bf16.msra.mxu0 %v2487_v8  ;;  %2454 = vmatpush3.bf16.msra.mxu1 %v2487_v8 }
  0x31   : > { %2374 = vmatprep.subr.bf16.mxu0 %v2488_v9  ;;  %2447 = vmatprep.subr.bf16.mxu1 %v2488_v9 }
  0x34   : > { %2375 = vmatpush3.bf16.msra.mxu0 %v2488_v9  ;;  %2455 = vmatpush3.bf16.msra.mxu1 %v2488_v9 }
  0x37   : > { %2377 = vmatmul.mubr.bf16.vlgmr.msra.gmra.mrb[0].mxu0 %v2490_v11  ;;  %2409 = vmatmul.mubr.bf16.vlgmr.msra.gmra.mrb[0].mxu1 %v2506_v13 }
  0x38   : > { %2380 = vmatprep.mubr.bf16.mxu0 %v2491_v12  ;;  %2412 = vmatprep.mubr.bf16.mxu1 %v2507_v14 }
  0x3f   : > { %2381 = vmatmul.mubr.bf16.gmra.mrb[4].mxu0 %v2492_v15  ;;  %2413 = vmatmul.mubr.bf16.gmra.mrb[4].mxu1 %v2508_v17 }
  0x40   : > { %2384 = vmatprep.mubr.bf16.mxu0 %v2493_v16  ;;  %2416 = vmatprep.mubr.bf16.mxu1 %v2509_v18 }
  0x47   : > { %2385 = vmatmul.mubr.bf16.gmra.mrb[8].mxu0 %v2494_v19  ;;  %2417 = vmatmul.mubr.bf16.gmra.mrb[8].mxu1 %v2510_v20 }
  0x48   : > { %2388 = vmatprep.mubr.bf16.mxu0 %v2495_v21  ;;  %2420 = vmatprep.mubr.bf16.mxu1 %v2511_v22 }
  0x4f   : > { %2389 = vmatmul.mubr.bf16.gmra.mrb[12].mxu0 %v2496_v23  ;;  %2421 = vmatmul.mubr.bf16.gmra.mrb[12].mxu1 %v2512_v24 }
  0x50   : > { %2392 = vmatprep.mubr.bf16.mxu0 %v2497_v25  ;;  %2424 = vmatprep.mubr.bf16.mxu1 %v2513_v26 }
  0x57   : > { %2393 = vmatmul.mubr.bf16.gmra.mrb[16].mxu0 %v2498_v27  ;;  %2425 = vmatmul.mubr.bf16.gmra.mrb[16].mxu1 %v2514_v28 }
  0x58   : > { %2396 = vmatprep.mubr.bf16.mxu0 %v2499_v29  ;;  %2428 = vmatprep.mubr.bf16.mxu1 %v2515_v30 }
  0x5f   : > { %2397 = vmatmul.mubr.bf16.gmra.mrb[20].mxu0 %v2500_v31  ;;  %2429 = vmatmul.mubr.bf16.gmra.mrb[20].mxu1 %v2516_v32 }
  0x60   : > { %2400 = vmatprep.mubr.bf16.mxu0 %v2501_v33  ;;  %2432 = vmatprep.mubr.bf16.mxu1 %v2517_v34 }
  0x67   : > { %2401 = vmatmul.mubr.bf16.gmra.mrb[24].mxu0 %v2502_v35  ;;  %2433 = vmatmul.mubr.bf16.gmra.mrb[24].mxu1 %v2518_v36 }
  0x68   : > { %2404 = vmatprep.mubr.bf16.mxu0 %v2503_v37  ;;  %2436 = vmatprep.mubr.bf16.mxu1 %v2519_v38 }
  0x6f   : > { %2405 = vmatmul.mubr.bf16.gmra.mrb[28].mxu0 %v2504_v39  ;;  %2437 = vmatmul.mubr.bf16.gmra.mrb[28].mxu1 %v2520_v40 }
 0x10a   : > { %v2378_v41 = vpop.f32.mrb[0].mxu0  ;;  %v2715_v42 = vpop.f32.mrb[0].mxu1 }
 0x10b   : > { %857 = vst [vmem:[#allocation2 + $0x10] sm:$0xff] %v2378_v41  ;;  %v598_v43 = vpop.f32.mrb[1].mxu0  ;;  %889 = vst [vmem:[#allocation2 + $0x110] sm:$0xff] %v2715_v42  ;;  %v2718_v44 = vpop.f32.mrb[1].mxu1  ;;  %v994_v52 = vmul.f32 %v2378_v41, %v2378_v41 }
 0x10c   : > { %855 = vst [vmem:[#allocation2] sm:$0xff] %v598_v43  ;;  %v2379_v45 = vpop.f32.mrb[2].mxu0  ;;  %887 = vst [vmem:[#allocation2 + $0x100] sm:$0xff] %v2718_v44  ;;  %v2721_v46 = vpop.f32.mrb[2].mxu1  ;;  %v992_v49 = vmul.f32 %v598_v43, %v598_v43 }
 0x10d   : > { %858 = vst [vmem:[#allocation2 + $0x18] sm:$0xff] %v2379_v45  ;;  %v601_v47 = vpop.f32.mrb[3].mxu0  ;;  %890 = vst [vmem:[#allocation2 + $0x118] sm:$0xff] %v2721_v46  ;;  %v2724_v48 = vpop.f32.mrb[3].mxu1  ;;  %v995_v55 = vmul.f32 %v2379_v45, %v2379_v45 }
 0x10e   : > { %856 = vst [vmem:[#allocation2 + $0x8] sm:$0xff] %v601_v47  ;;  %v920_v50 = vadd.f32 %v601_v47, %v598_v43  ;;  %v993_v51 = vmul.f32 %v601_v47, %v601_v47  ;;  %888 = vst [vmem:[#allocation2 + $0x108] sm:$0xff] %v2724_v48 }
 0x110   : > { %v921_v53 = vadd.f32 %v2378_v41, %v920_v50  ;;  %v1056_v54 = vadd.f32 %v993_v51, %v992_v49 }
 0x112   : > { %v1057_v56 = vadd.f32 %v1056_v54, %v994_v52  ;;  %v2382_v57 = vpop.f32.mrb[4].mxu0  ;;  %v922_v58 = vadd.f32 %v2379_v45, %v921_v53  ;;  %v2727_v59 = vpop.f32.mrb[4].mxu1 }
 0x113   : > { %861 = vst [vmem:[#allocation2 + $0x30] sm:$0xff] %v2382_v57  ;;  %v614_v60 = vpop.f32.mrb[5].mxu0  ;;  %893 = vst [vmem:[#allocation2 + $0x130] sm:$0xff] %v2727_v59  ;;  %v2730_v61 = vpop.f32.mrb[5].mxu1  ;;  %v998_v8 = vmul.f32 %v2382_v57, %v2382_v57 }
 0x114   : > { %859 = vst [vmem:[#allocation2 + $0x20] sm:$0xff] %v614_v60  ;;  %v923_v62 = vadd.f32 %v922_v58, %v614_v60  ;;  %v996_v63 = vmul.f32 %v614_v60, %v614_v60  ;;  %v1058_v0 = vadd.f32 %v1057_v56, %v995_v55  ;;  %v2383_v1 = vpop.f32.mrb[6].mxu0  ;;  %891 = vst [vmem:[#allocation2 + $0x120] sm:$0xff] %v2730_v61  ;;  %v2733_v2 = vpop.f32.mrb[6].mxu1 }
 0x115   : > { %862 = vst [vmem:[#allocation2 + $0x38] sm:$0xff] %v2383_v1  ;;  %v617_v3 = vpop.f32.mrb[7].mxu0  ;;  %894 = vst [vmem:[#allocation2 + $0x138] sm:$0xff] %v2733_v2  ;;  %v2736_v4 = vpop.f32.mrb[7].mxu1  ;;  %v999_v11 = vmul.f32 %v2383_v1, %v2383_v1 }
 0x116   : > { %v1059_v5 = vadd.f32 %v1058_v0, %v996_v63  ;;  %860 = vst [vmem:[#allocation2 + $0x28] sm:$0xff] %v617_v3  ;;  %v924_v6 = vadd.f32 %v923_v62, %v617_v3  ;;  %v997_v7 = vmul.f32 %v617_v3, %v617_v3  ;;  %892 = vst [vmem:[#allocation2 + $0x128] sm:$0xff] %v2736_v4 }
 0x118   : > { %v925_v9 = vadd.f32 %v2382_v57, %v924_v6  ;;  %v1060_v10 = vadd.f32 %v1059_v5, %v997_v7 }
 0x11a   : > { %v1061_v12 = vadd.f32 %v1060_v10, %v998_v8  ;;  %v2386_v13 = vpop.f32.mrb[8].mxu0  ;;  %v926_v14 = vadd.f32 %v2383_v1, %v925_v9  ;;  %v2739_v15 = vpop.f32.mrb[8].mxu1 }
 0x11b   : > { %865 = vst [vmem:[#allocation2 + $0x50] sm:$0xff] %v2386_v13  ;;  %v630_v16 = vpop.f32.mrb[9].mxu0  ;;  %897 = vst [vmem:[#allocation2 + $0x150] sm:$0xff] %v2739_v15  ;;  %v2742_v17 = vpop.f32.mrb[9].mxu1  ;;  %v1002_v28 = vmul.f32 %v2386_v13, %v2386_v13 }
 0x11c   : > { %863 = vst [vmem:[#allocation2 + $0x40] sm:$0xff] %v630_v16  ;;  %v927_v18 = vadd.f32 %v926_v14, %v630_v16  ;;  %v1000_v19 = vmul.f32 %v630_v16, %v630_v16  ;;  %v1062_v20 = vadd.f32 %v1061_v12, %v999_v11  ;;  %v2387_v21 = vpop.f32.mrb[10].mxu0  ;;  %895 = vst [vmem:[#allocation2 + $0x140] sm:$0xff] %v2742_v17  ;;  %v2745_v22 = vpop.f32.mrb[10].mxu1 }
 0x11d   : > { %866 = vst [vmem:[#allocation2 + $0x58] sm:$0xff] %v2387_v21  ;;  %v633_v23 = vpop.f32.mrb[11].mxu0  ;;  %898 = vst [vmem:[#allocation2 + $0x158] sm:$0xff] %v2745_v22  ;;  %v2748_v24 = vpop.f32.mrb[11].mxu1  ;;  %v1003_v31 = vmul.f32 %v2387_v21, %v2387_v21 }
 0x11e   : > { %v1063_v25 = vadd.f32 %v1062_v20, %v1000_v19  ;;  %864 = vst [vmem:[#allocation2 + $0x48] sm:$0xff] %v633_v23  ;;  %v928_v26 = vadd.f32 %v927_v18, %v633_v23  ;;  %v1001_v27 = vmul.f32 %v633_v23, %v633_v23  ;;  %896 = vst [vmem:[#allocation2 + $0x148] sm:$0xff] %v2748_v24 }
 0x120   : > { %v929_v29 = vadd.f32 %v2386_v13, %v928_v26  ;;  %v1064_v30 = vadd.f32 %v1063_v25, %v1001_v27 }
 0x122   : > { %v1065_v32 = vadd.f32 %v1064_v30, %v1002_v28  ;;  %v2390_v33 = vpop.f32.mrb[12].mxu0  ;;  %v930_v34 = vadd.f32 %v2387_v21, %v929_v29  ;;  %v2751_v35 = vpop.f32.mrb[12].mxu1 }
 0x123   : > { %869 = vst [vmem:[#allocation2 + $0x70] sm:$0xff] %v2390_v33  ;;  %v646_v36 = vpop.f32.mrb[13].mxu0  ;;  %901 = vst [vmem:[#allocation2 + $0x170] sm:$0xff] %v2751_v35  ;;  %v2754_v37 = vpop.f32.mrb[13].mxu1  ;;  %v1006_v52 = vmul.f32 %v2390_v33, %v2390_v33 }
 0x124   : > { %867 = vst [vmem:[#allocation2 + $0x60] sm:$0xff] %v646_v36  ;;  %v931_v38 = vadd.f32 %v930_v34, %v646_v36  ;;  %v1004_v39 = vmul.f32 %v646_v36, %v646_v36  ;;  %v1066_v40 = vadd.f32 %v1065_v32, %v1003_v31  ;;  %v2391_v41 = vpop.f32.mrb[14].mxu0  ;;  %899 = vst [vmem:[#allocation2 + $0x160] sm:$0xff] %v2754_v37  ;;  %v2757_v43 = vpop.f32.mrb[14].mxu1 }
 0x125   : > { %870 = vst [vmem:[#allocation2 + $0x78] sm:$0xff] %v2391_v41  ;;  %v649_v45 = vpop.f32.mrb[15].mxu0  ;;  %902 = vst [vmem:[#allocation2 + $0x178] sm:$0xff] %v2757_v43  ;;  %v2760_v47 = vpop.f32.mrb[15].mxu1  ;;  %v1007_v55 = vmul.f32 %v2391_v41, %v2391_v41 }
 0x126   : > { %v1067_v49 = vadd.f32 %v1066_v40, %v1004_v39  ;;  %868 = vst [vmem:[#allocation2 + $0x68] sm:$0xff] %v649_v45  ;;  %v932_v50 = vadd.f32 %v931_v38, %v649_v45  ;;  %v1005_v51 = vmul.f32 %v649_v45, %v649_v45  ;;  %900 = vst [vmem:[#allocation2 + $0x168] sm:$0xff] %v2760_v47 }
 0x128   : > { %v933_v53 = vadd.f32 %v2390_v33, %v932_v50  ;;  %v1068_v54 = vadd.f32 %v1067_v49, %v1005_v51 }
 0x12a   : > { %v1069_v56 = vadd.f32 %v1068_v54, %v1006_v52  ;;  %v2394_v57 = vpop.f32.mrb[16].mxu0  ;;  %v934_v58 = vadd.f32 %v2391_v41, %v933_v53  ;;  %v2763_v60 = vpop.f32.mrb[16].mxu1 }
 0x12b   : > { %873 = vst [vmem:[#allocation2 + $0x90] sm:$0xff] %v2394_v57  ;;  %v662_v62 = vpop.f32.mrb[17].mxu0  ;;  %905 = vst [vmem:[#allocation2 + $0x190] sm:$0xff] %v2763_v60  ;;  %v2766_v63 = vpop.f32.mrb[17].mxu1  ;;  %v1010_v12 = vmul.f32 %v2394_v57, %v2394_v57 }
 0x12c   : > { %871 = vst [vmem:[#allocation2 + $0x80] sm:$0xff] %v662_v62  ;;  %v935_v0 = vadd.f32 %v934_v58, %v662_v62  ;;  %v1008_v1 = vmul.f32 %v662_v62, %v662_v62  ;;  %v1070_v3 = vadd.f32 %v1069_v56, %v1007_v55  ;;  %v2395_v5 = vpop.f32.mrb[18].mxu0  ;;  %903 = vst [vmem:[#allocation2 + $0x180] sm:$0xff] %v2766_v63  ;;  %v2769_v6 = vpop.f32.mrb[18].mxu1 }
 0x12d   : > { %874 = vst [vmem:[#allocation2 + $0x98] sm:$0xff] %v2395_v5  ;;  %v665_v7 = vpop.f32.mrb[19].mxu0  ;;  %906 = vst [vmem:[#allocation2 + $0x198] sm:$0xff] %v2769_v6  ;;  %v2772_v8 = vpop.f32.mrb[19].mxu1  ;;  %v1011_v16 = vmul.f32 %v2395_v5, %v2395_v5 }
 0x12e   : > { %v1071_v9 = vadd.f32 %v1070_v3, %v1008_v1  ;;  %872 = vst [vmem:[#allocation2 + $0x88] sm:$0xff] %v665_v7  ;;  %v936_v10 = vadd.f32 %v935_v0, %v665_v7  ;;  %v1009_v11 = vmul.f32 %v665_v7, %v665_v7  ;;  %904 = vst [vmem:[#allocation2 + $0x188] sm:$0xff] %v2772_v8 }
 0x130   : > { %v937_v13 = vadd.f32 %v2394_v57, %v936_v10  ;;  %v1072_v14 = vadd.f32 %v1071_v9, %v1009_v11 }
 0x132   : > { %v1073_v18 = vadd.f32 %v1072_v14, %v1010_v12  ;;  %v2398_v19 = vpop.f32.mrb[20].mxu0  ;;  %v938_v20 = vadd.f32 %v2395_v5, %v937_v13  ;;  %v2775_v21 = vpop.f32.mrb[20].mxu1 }
 0x133   : > { %877 = vst [vmem:[#allocation2 + $0xb0] sm:$0xff] %v2398_v19  ;;  %v678_v23 = vpop.f32.mrb[21].mxu0  ;;  %909 = vst [vmem:[#allocation2 + $0x1b0] sm:$0xff] %v2775_v21  ;;  %v2778_v25 = vpop.f32.mrb[21].mxu1  ;;  %v1014_v38 = vmul.f32 %v2398_v19, %v2398_v19 }
 0x134   : > { %875 = vst [vmem:[#allocation2 + $0xa0] sm:$0xff] %v678_v23  ;;  %v939_v26 = vadd.f32 %v938_v20, %v678_v23  ;;  %v1012_v27 = vmul.f32 %v678_v23, %v678_v23  ;;  %v1074_v28 = vadd.f32 %v1073_v18, %v1011_v16  ;;  %v2399_v29 = vpop.f32.mrb[22].mxu0  ;;  %907 = vst [vmem:[#allocation2 + $0x1a0] sm:$0xff] %v2778_v25  ;;  %v2781_v30 = vpop.f32.mrb[22].mxu1 }
 0x135   : > { %878 = vst [vmem:[#allocation2 + $0xb8] sm:$0xff] %v2399_v29  ;;  %v681_v31 = vpop.f32.mrb[23].mxu0  ;;  %910 = vst [vmem:[#allocation2 + $0x1b8] sm:$0xff] %v2781_v30  ;;  %v2784_v32 = vpop.f32.mrb[23].mxu1  ;;  %v1015_v41 = vmul.f32 %v2399_v29, %v2399_v29 }
 0x136   : > { %v1075_v33 = vadd.f32 %v1074_v28, %v1012_v27  ;;  %876 = vst [vmem:[#allocation2 + $0xa8] sm:$0xff] %v681_v31  ;;  %v940_v34 = vadd.f32 %v939_v26, %v681_v31  ;;  %v1013_v36 = vmul.f32 %v681_v31, %v681_v31  ;;  %908 = vst [vmem:[#allocation2 + $0x1a8] sm:$0xff] %v2784_v32 }
 0x138   : > { %v941_v39 = vadd.f32 %v2398_v19, %v940_v34  ;;  %v1076_v40 = vadd.f32 %v1075_v33, %v1013_v36 }
 0x13a   : > { %v1077_v45 = vadd.f32 %v1076_v40, %v1014_v38  ;;  %v2402_v49 = vpop.f32.mrb[24].mxu0  ;;  %v942_v50 = vadd.f32 %v2399_v29, %v941_v39  ;;  %v2787_v51 = vpop.f32.mrb[24].mxu1 }
 0x13b   : > { %881 = vst [vmem:[#allocation2 + $0xd0] sm:$0xff] %v2402_v49  ;;  %v694_v52 = vpop.f32.mrb[25].mxu0  ;;  %913 = vst [vmem:[#allocation2 + $0x1d0] sm:$0xff] %v2787_v51  ;;  %v2790_v53 = vpop.f32.mrb[25].mxu1  ;;  %v1018_v7 = vmul.f32 %v2402_v49, %v2402_v49 }
 0x13c   : > { %879 = vst [vmem:[#allocation2 + $0xc0] sm:$0xff] %v694_v52  ;;  %v943_v54 = vadd.f32 %v942_v50, %v694_v52  ;;  %v1016_v55 = vmul.f32 %v694_v52, %v694_v52  ;;  %v1078_v56 = vadd.f32 %v1077_v45, %v1015_v41  ;;  %v2403_v57 = vpop.f32.mrb[26].mxu0  ;;  %911 = vst [vmem:[#allocation2 + $0x1c0] sm:$0xff] %v2790_v53  ;;  %v2793_v58 = vpop.f32.mrb[26].mxu1 }
 0x13d   : > { %882 = vst [vmem:[#allocation2 + $0xd8] sm:$0xff] %v2403_v57  ;;  %v697_v62 = vpop.f32.mrb[27].mxu0  ;;  %914 = vst [vmem:[#allocation2 + $0x1d8] sm:$0xff] %v2793_v58  ;;  %v2796_v0 = vpop.f32.mrb[27].mxu1  ;;  %v1019_v11 = vmul.f32 %v2403_v57, %v2403_v57  ;;  %v1024_v50 = vmul.f32 %v2718_v44, %v2718_v44 }
 0x13e   : > { %v1079_v1 = vadd.f32 %v1078_v56, %v1016_v55  ;;  %880 = vst [vmem:[#allocation2 + $0xc8] sm:$0xff] %v697_v62  ;;  %v944_v3 = vadd.f32 %v943_v54, %v697_v62  ;;  %v1017_v5 = vmul.f32 %v697_v62, %v697_v62  ;;  %912 = vst [vmem:[#allocation2 + $0x1c8] sm:$0xff] %v2796_v0 }
 0x13f   : > { %v1026_v62 = vmul.f32 %v2715_v42, %v2715_v42 }
 0x140   : > { %v945_v9 = vadd.f32 %v2402_v49, %v944_v3  ;;  %v1080_v10 = vadd.f32 %v1079_v1, %v1017_v5  ;;  %v1027_v5 = vmul.f32 %v2721_v46, %v2721_v46 }
 0x142   : > { %v1081_v12 = vadd.f32 %v1080_v10, %v1018_v7  ;;  %v2406_v13 = vpop.f32.mrb[28].mxu0  ;;  %v946_v14 = vadd.f32 %v2403_v57, %v945_v9  ;;  %v2799_v16 = vpop.f32.mrb[28].mxu1  ;;  %v1025_v57 = vmul.f32 %v2724_v48, %v2724_v48 }
 0x143   : > { %885 = vst [vmem:[#allocation2 + $0xf0] sm:$0xff] %v2406_v13  ;;  %v710_v18 = vpop.f32.mrb[29].mxu0  ;;  %917 = vst [vmem:[#allocation2 + $0x1f0] sm:$0xff] %v2799_v16  ;;  %v2802_v19 = vpop.f32.mrb[29].mxu1  ;;  %v1022_v38 = vmul.f32 %v2406_v13, %v2406_v13 }
 0x144   : > { %883 = vst [vmem:[#allocation2 + $0xe0] sm:$0xff] %v710_v18  ;;  %v947_v20 = vadd.f32 %v946_v14, %v710_v18  ;;  %v1020_v23 = vmul.f32 %v710_v18, %v710_v18  ;;  %v1082_v26 = vadd.f32 %v1081_v12, %v1019_v11  ;;  %v2407_v27 = vpop.f32.mrb[30].mxu0  ;;  %915 = vst [vmem:[#allocation2 + $0x1e0] sm:$0xff] %v2802_v19  ;;  %v2805_v28 = vpop.f32.mrb[30].mxu1 }
 0x145   : > { %886 = vst [vmem:[#allocation2 + $0xf8] sm:$0xff] %v2407_v27  ;;  %v713_v29 = vpop.f32.mrb[31].mxu0  ;;  %918 = vst [vmem:[#allocation2 + $0x1f8] sm:$0xff] %v2805_v28  ;;  %v2808_v31 = vpop.f32.mrb[31].mxu1  ;;  %v1023_v41 = vmul.f32 %v2407_v27, %v2407_v27 }
 0x146   : > { %v1083_v33 = vadd.f32 %v1082_v26, %v1020_v23  ;;  %884 = vst [vmem:[#allocation2 + $0xe8] sm:$0xff] %v713_v29  ;;  %v948_v34 = vadd.f32 %v947_v20, %v713_v29  ;;  %v1021_v36 = vmul.f32 %v713_v29, %v713_v29  ;;  %916 = vst [vmem:[#allocation2 + $0x1e8] sm:$0xff] %v2808_v31 }
 0x148   : > { %v949_v39 = vadd.f32 %v2406_v13, %v948_v34  ;;  %v1084_v40 = vadd.f32 %v1083_v33, %v1021_v36  ;;  %v1029_v13 = vmul.f32 %v2736_v4, %v2736_v4  ;;  %v1033_v33 = vmul.f32 %v2748_v24, %v2748_v24 }
 0x14a   : > { %v1085_v45 = vadd.f32 %v1084_v40, %v1022_v38  ;;  %v950_v49 = vadd.f32 %v2407_v27, %v949_v39 }
 0x14c   : > { %v951_v52 = vadd.f32 %v950_v49, %v2718_v44  ;;  %v1086_v54 = vadd.f32 %v1085_v45, %v1023_v41  ;;  %v1028_v44 = vmul.f32 %v2730_v61, %v2730_v61  ;;  %v1037_v49 = vmul.f32 %v2760_v47, %v2760_v47 }
 0x14e   : > { %v1087_v55 = vadd.f32 %v1086_v54, %v1024_v50  ;;  %v952_v56 = vadd.f32 %v951_v52, %v2724_v48 }
 0x150   : > { %v953_v1 = vadd.f32 %v2715_v42, %v952_v56  ;;  %v1088_v3 = vadd.f32 %v1087_v55, %v1025_v57  ;;  %v1030_v42 = vmul.f32 %v2727_v59, %v2727_v59 }
 0x152   : > { %v1089_v7 = vadd.f32 %v1088_v3, %v1026_v62  ;;  %v954_v9 = vadd.f32 %v2721_v46, %v953_v1  ;;  %v1031_v46 = vmul.f32 %v2733_v2, %v2733_v2  ;;  %v1041_v1 = vmul.f32 %v2772_v8, %v2772_v8 }
 0x154   : > { %v955_v10 = vadd.f32 %v954_v9, %v2730_v61  ;;  %v1090_v11 = vadd.f32 %v1089_v7, %v1027_v5  ;;  %v1032_v61 = vmul.f32 %v2742_v17, %v2742_v17 }
 0x156   : > { %v1091_v12 = vadd.f32 %v1090_v11, %v1028_v44  ;;  %v956_v48 = vadd.f32 %v955_v10, %v2736_v4 }
 0x158   : > { %v957_v14 = vadd.f32 %v2727_v59, %v956_v48  ;;  %v1092_v18 = vadd.f32 %v1091_v12, %v1029_v13  ;;  %v1034_v59 = vmul.f32 %v2739_v15, %v2739_v15  ;;  %v1045_v12 = vmul.f32 %v2784_v32, %v2784_v32 }
 0x15a   : > { %v1093_v20 = vadd.f32 %v1092_v18, %v1030_v42  ;;  %v958_v23 = vadd.f32 %v2733_v2, %v957_v14  ;;  %v1035_v2 = vmul.f32 %v2745_v22, %v2745_v22 }
 0x15c   : > { %v959_v26 = vadd.f32 %v958_v23, %v2742_v17  ;;  %v1094_v27 = vadd.f32 %v1093_v20, %v1031_v46  ;;  %v1036_v17 = vmul.f32 %v2754_v37, %v2754_v37  ;;  %v1049_v23 = vmul.f32 %v2796_v0, %v2796_v0 }
 0x15e   : > { %v1095_v29 = vadd.f32 %v1094_v27, %v1032_v61  ;;  %v960_v4 = vadd.f32 %v959_v26, %v2748_v24 }
 0x160   : > { %v961_v34 = vadd.f32 %v2739_v15, %v960_v4  ;;  %v1096_v36 = vadd.f32 %v1095_v29, %v1033_v33  ;;  %v1038_v15 = vmul.f32 %v2751_v35, %v2751_v35 }
 0x162   : > { %v1097_v38 = vadd.f32 %v1096_v36, %v1034_v59  ;;  %v962_v39 = vadd.f32 %v2745_v22, %v961_v34  ;;  %v1039_v22 = vmul.f32 %v2757_v43, %v2757_v43  ;;  %v1053_v34 = vmul.f32 %v2808_v31, %v2808_v31 }
 0x164   : > { %v963_v40 = vadd.f32 %v962_v39, %v2754_v37  ;;  %v1098_v41 = vadd.f32 %v1097_v38, %v1035_v2  ;;  %v1040_v37 = vmul.f32 %v2766_v63, %v2766_v63 }
 0x166   : > { %v1099_v45 = vadd.f32 %v1098_v41, %v1036_v17  ;;  %v964_v24 = vadd.f32 %v963_v40, %v2760_v47 }
 0x168   : > { %v965_v50 = vadd.f32 %v2751_v35, %v964_v24  ;;  %v1100_v52 = vadd.f32 %v1099_v45, %v1037_v49  ;;  %v1042_v35 = vmul.f32 %v2763_v60, %v2763_v60 }
 0x16a   : > { %v1101_v54 = vadd.f32 %v1100_v52, %v1038_v15  ;;  %v966_v55 = vadd.f32 %v2757_v43, %v965_v50  ;;  %v1043_v43 = vmul.f32 %v2769_v6, %v2769_v6  ;;  %v919_v52 = vld [vmem:[#allocation3] sm:$0x1] }
 0x16c   : > { %v967_v56 = vadd.f32 %v966_v55, %v2766_v63  ;;  %v1102_v57 = vadd.f32 %v1101_v54, %v1039_v22  ;;  %v1044_v63 = vmul.f32 %v2778_v25, %v2778_v25  ;;  %v991_v54 = vld [vmem:[#allocation4] sm:$0x1] }
 0x16e   : > { %v1103_v62 = vadd.f32 %v1102_v57, %v1040_v37  ;;  %v968_v47 = vadd.f32 %v967_v56, %v2772_v8 }
 0x170   : > { %v969_v3 = vadd.f32 %v2763_v60, %v968_v47  ;;  %v1104_v5 = vadd.f32 %v1103_v62, %v1041_v1  ;;  %v1046_v60 = vmul.f32 %v2775_v21, %v2775_v21 }
 0x172   : > { %v1105_v7 = vadd.f32 %v1104_v5, %v1042_v35  ;;  %v970_v9 = vadd.f32 %v2769_v6, %v969_v3  ;;  %v1047_v6 = vmul.f32 %v2781_v30, %v2781_v30 }
 0x174   : > { %v971_v44 = vadd.f32 %v970_v9, %v2778_v25  ;;  %v1106_v10 = vadd.f32 %v1105_v7, %v1043_v43  ;;  %v1048_v25 = vmul.f32 %v2790_v53, %v2790_v53 }
 0x176   : > { %v1107_v11 = vadd.f32 %v1106_v10, %v1044_v63  ;;  %v972_v8 = vadd.f32 %v971_v44, %v2784_v32 }
 0x178   : > { %v973_v48 = vadd.f32 %v2775_v21, %v972_v8  ;;  %v1108_v13 = vadd.f32 %v1107_v11, %v1045_v12  ;;  %v1050_v21 = vmul.f32 %v2787_v51, %v2787_v51 }
 0x17a   : > { %v1109_v42 = vadd.f32 %v1108_v13, %v1046_v60  ;;  %v974_v14 = vadd.f32 %v2781_v30, %v973_v48  ;;  %v1051_v30 = vmul.f32 %v2793_v58, %v2793_v58 }
 0x17c   : > { %v975_v18 = vadd.f32 %v974_v14, %v2790_v53  ;;  %v1110_v46 = vadd.f32 %v1109_v42, %v1047_v6  ;;  %v1052_v53 = vmul.f32 %v2802_v19, %v2802_v19 }
 0x17e   : > { %v1111_v20 = vadd.f32 %v1110_v46, %v1048_v25  ;;  %v976_v32 = vadd.f32 %v975_v18, %v2796_v0 }
 0x180   : > { %v977_v61 = vadd.f32 %v2787_v51, %v976_v32  ;;  %v1112_v26 = vadd.f32 %v1111_v20, %v1049_v23  ;;  %v1054_v51 = vmul.f32 %v2799_v16, %v2799_v16 }
 0x182   : > { %v1113_v27 = vadd.f32 %v1112_v26, %v1050_v21  ;;  %v978_v29 = vadd.f32 %v2793_v58, %v977_v61  ;;  %v1055_v58 = vmul.f32 %v2805_v28, %v2805_v28 }
 0x184   : > { %v979_v4 = vadd.f32 %v978_v29, %v2802_v19  ;;  %v1114_v33 = vadd.f32 %v1113_v27, %v1051_v30 }
 0x186   : > { %v1115_v59 = vadd.f32 %v1114_v33, %v1052_v53  ;;  %v980_v0 = vadd.f32 %v979_v4, %v2808_v31 }
 0x188   : > { %v981_v36 = vadd.f32 %v2799_v16, %v980_v0  ;;  %v1116_v2 = vadd.f32 %v1115_v59, %v1053_v34 }
 0x18a   : > { %v982_v38 = vadd.f32 %v2805_v28, %v981_v36  ;;  %v1117_v39 = vadd.f32 %v1116_v2, %v1054_v51 }
 0x18c   : > { %v983_v19 = vrot.slane %v982_v38, 4  ;;  %v1118_v17 = vadd.f32 %v1117_v39, %v1055_v58 }
 0x18e   : > { %v984_v40 = vadd.f32 %v983_v19, %v982_v38  ;;  %v1119_v41 = vrot.slane %v1118_v17, 4 }
 0x190   : > { %v985_v45 = vrot.slane %v984_v40, 2  ;;  %v1120_v24 = vadd.f32 %v1119_v41, %v1118_v17 }
 0x192   : > { %v986_v49 = vadd.f32 %v985_v45, %v984_v40  ;;  %v1121_v31 = vrot.slane %v1120_v24, 2 }
 0x194   : > { %v987_v15 = vrot.slane %v986_v49, 1  ;;  %v1122_v50 = vadd.f32 %v1121_v31, %v1120_v24 }
 0x196   : > { %v988_v22 = vadd.f32 %v987_v15, %v986_v49  ;;  %v1123_v16 = vrot.slane %v1122_v50, 1 }
 0x198   : > { %v989_v55 = vadd.f32 %v988_v22, %v919_v52  ;;  %v1124_v37 = vadd.f32 %v1123_v16, %v1122_v50 }
 0x19a   : > { %990 = vst [vmem:[#allocation3] sm:$0x1] %v989_v55  ;;  %v1125_v56 = vadd.f32 %v1124_v37, %v991_v54 }
 0x19c   : > { %1126 = vst [vmem:[#allocation4] sm:$0x1] %v1125_v56 }
 0x19d PF: > { %p1127_p6 = scmp.eq.s32.totalorder %s2537_s15, 1 }
 0x19e   : > { %v1139_v43 = vld [vmem:[%s3154_s2] sm:$0x1] (%p1127_p6) }
 0x19f   : > { %1131 = sbr.rel (!%p1127_p6) target bundleno = 446 (0x1be), region = 48  ;;  %v1144_v63 = vld [vmem:[%s3155_s3] sm:$0x1] (%p1127_p6) }
 0x1a1   : > { %v1132_v28 = vld [vmem:[#allocation3] sm:$0x1] (%p1127_p6) }
 0x1a2   : > { %v1133_v62 = vmul.f32 (%p1127_p6), 0.001953125, %v1132_v28 }
 0x1a3   : > { %v1134_v57 = vld [vmem:[#allocation4] sm:$0x1] (%p1127_p6) }
 0x1a4   : > { %v1135_v47 = vmul.f32 (%p1127_p6), 0.001953125, %v1134_v57  ;;  %v1136_v1 = vmul.f32 (%p1127_p6), %v1133_v62, %v1133_v62 }
 0x1a6   : > { %v1137_v35 = vsub.f32 %v1135_v47, %v1136_v1 }
 0x1a8   : > { %v1138_v3 = vmax.f32 %v1137_v35, 0.0 }
 0x1aa   : > { %v1140_v5 = vadd.f32 1e-05, %v1138_v3 }
 0x1ac   : > { %2521 = vrsqrt.f32 %v1140_v5 }
 0x1b6   : > { %v2522_v7 = vpop.eup %2521 }
 0x1b7   : > { %v1142_v9 = vmul.f32 %v2522_v7, %v1139_v43 }
 0x1b9   : > { %1143 = vst [vmem:[#allocation5] sm:$0x1] %v1142_v9  ;;  %v1145_v44 = vmul.f32 %v1142_v9, %v1133_v62 }
 0x1bb   : > { %v1146_v10 = vsub.f32 %v1144_v63, %v1145_v44 }
 0x1bd   : > { %1147 = vst [vmem:[#allocation6] sm:$0x1] %v1146_v10 }
 0x1be PF: > { %p1992_p7 = scmp.ne.s32.totalorder %s2537_s15, 1 }
 0x1bf   : > { %v1153_v11 = vld [vmem:[#allocation2] sm:$0xff] (!%p1992_p7)  ;;  %v1154_v8 = vld [vmem:[#allocation2 + $0x8] sm:$0xff] (!%p1992_p7)  ;;  %v1155_v6 = vld [vmem:[#allocation2 + $0x10] sm:$0xff] (!%p1992_p7) }
 0x1c0   : > { %1150 = sbr.rel (%p1992_p7) target bundleno = 543 (0x21f), region = 52  ;;  %v2915_v12 = vld [vmem:[#allocation5] ss:$0 sm:$0xff] (!%p1992_p7)  ;;  %v1156_v42 = vld [vmem:[#allocation2 + $0x18] sm:$0xff] (!%p1992_p7)  ;;  %v1158_v46 = vld [vmem:[#allocation2 + $0x28] sm:$0xff] (!%p1992_p7) }
 0x1c1   : > { %v1224_v60 = vmul.f32 (!%p1992_p7), %v2915_v12, %v1153_v11  ;;  %v1225_v48 = vmul.f32 (!%p1992_p7), %v2915_v12, %v1154_v8  ;;  %v1226_v14 = vmul.f32 (!%p1992_p7), %v2915_v12, %v1155_v6  ;;  %v1227_v25 = vmul.f32 (!%p1992_p7), %v2915_v12, %v1156_v42  ;;  %v1157_v18 = vld [vmem:[#allocation2 + $0x20] sm:$0xff] (!%p1992_p7)  ;;  %v1159_v20 = vld [vmem:[#allocation2 + $0x30] sm:$0xff] (!%p1992_p7)  ;;  %v1160_v26 = vld [vmem:[#allocation2 + $0x38] sm:$0xff] (!%p1992_p7) }
 0x1c2   : > { %v1228_v21 = vmul.f32 (!%p1992_p7), %v2915_v12, %v1157_v18  ;;  %v1229_v61 = vmul.f32 (!%p1992_p7), %v2915_v12, %v1158_v46  ;;  %v1230_v29 = vmul.f32 (!%p1992_p7), %v2915_v12, %v1159_v20  ;;  %v1231_v53 = vmul.f32 (!%p1992_p7), %v2915_v12, %v1160_v26  ;;  %v1161_v17 = vld [vmem:[#allocation2 + $0x40] sm:$0xff] (!%p1992_p7)  ;;  %v1162_v40 = vld [vmem:[#allocation2 + $0x48] sm:$0xff] (!%p1992_p7)  ;;  %v1163_v41 = vld [vmem:[#allocation2 + $0x50] sm:$0xff] (!%p1992_p7) }
 0x1c3   : > { %v1164_v50 = vld [vmem:[#allocation2 + $0x58] sm:$0xff] (!%p1992_p7)  ;;  %v1232_v22 = vmul.f32 (!%p1992_p7), %v2915_v12, %v1161_v17  ;;  %v1233_v16 = vmul.f32 (!%p1992_p7), %v2915_v12, %v1162_v40  ;;  %v1234_v54 = vmul.f32 (!%p1992_p7), %v2915_v12, %v1163_v41  ;;  %v1165_v55 = vld [vmem:[#allocation2 + $0x60] sm:$0xff] (!%p1992_p7)  ;;  %v1166_v37 = vld [vmem:[#allocation2 + $0x68] sm:$0xff] (!%p1992_p7) }
 0x1c4   : > { %v2919_v13 = vld [vmem:[#allocation6] ss:$0 sm:$0xff] (!%p1992_p7)  ;;  %v1235_v35 = vmul.f32 (!%p1992_p7), %v2915_v12, %v1164_v50  ;;  %v1236_v43 = vmul.f32 (!%p1992_p7), %v2915_v12, %v1165_v55  ;;  %v1237_v7 = vmul.f32 (!%p1992_p7), %v2915_v12, %v1166_v37  ;;  %v1167_v9 = vld [vmem:[#allocation2 + $0x70] sm:$0xff] (!%p1992_p7)  ;;  %v1168_v42 = vld [vmem:[#allocation2 + $0x78] sm:$0xff] (!%p1992_p7) }
 0x1c5   : > { %v1295_v32 = vadd.f32 (!%p1992_p7), %v2919_v13, %v1224_v60  ;;  %v1296_v23 = vadd.f32 (!%p1992_p7), %v2919_v13, %v1225_v48  ;;  %v1297_v30 = vadd.f32 (!%p1992_p7), %v2919_v13, %v1226_v14  ;;  %v1298_v27 = vadd.f32 (!%p1992_p7), %v2919_v13, %v1227_v25  ;;  %v1169_v20 = vld [vmem:[#allocation2 + $0x80] sm:$0xff] (!%p1992_p7) }
 0x1c6   : > { %v1299_v36 = vadd.f32 (!%p1992_p7), %v2919_v13, %v1228_v21  ;;  %v1300_v2 = vadd.f32 (!%p1992_p7), %v2919_v13, %v1229_v61  ;;  %v1301_v19 = vadd.f32 (!%p1992_p7), %v2919_v13, %v1230_v29  ;;  %v1302_v31 = vadd.f32 (!%p1992_p7), %v2919_v13, %v1231_v53  ;;  %v1171_v29 = vld [vmem:[#allocation2 + $0x90] sm:$0xff] (!%p1992_p7) }
 0x1c7   : > { %vm1359_vm0 = vcmp.ge.f32.partialorder %v1295_v32, 0.0  ;;  %vm1360_vm1 = vcmp.ge.f32.partialorder %v1296_v23, 0.0  ;;  %v1423_v4 = vmul.f32 0.2, %v1295_v32  ;;  %v1424_v33 = vmul.f32 0.2, %v1296_v23 }
 0x1c8   : > { %vm1361_vm2 = vcmp.ge.f32.partialorder %v1297_v30, 0.0  ;;  %vm1362_vm3 = vcmp.ge.f32.partialorder %v1298_v27, 0.0  ;;  %v1425_v59 = vmul.f32 0.2, %v1297_v30  ;;  %v1426_v0 = vmul.f32 0.2, %v1298_v27 }
 0x1c9   : > { %v1487_v34 = vsel %vm1359_vm0, %v1295_v32, %v1423_v4  ;;  %v1488_v51 = vsel %vm1360_vm1, %v1296_v23, %v1424_v33  ;;  %vm1363_vm4 = vcmp.ge.f32.partialorder %v1299_v36, 0.0  ;;  %vm1364_vm5 = vcmp.ge.f32.partialorder %v1300_v2, 0.0  ;;  %v1170_v32 = vld [vmem:[#allocation2 + $0x88] sm:$0xff] }
 0x1ca   : > { %v2132_v58 = vpack.c.bf16 %v1488_v51, %v1487_v34  ;;  %v1489_v38 = vsel %vm1361_vm2, %v1297_v30, %v1425_v59  ;;  %v1490_v39 = vsel %vm1362_vm3, %v1298_v27, %v1426_v0  ;;  %v1427_v24 = vmul.f32 0.2, %v1299_v36  ;;  %v1172_v0 = vld [vmem:[#allocation2 + $0x98] sm:$0xff] }
 0x1cb   : > { %v2137_v45 = vpack.c.bf16 %v1490_v39, %v1489_v38  ;;  %v1428_v49 = vmul.f32 0.2, %v1300_v2  ;;  %vm1365_vm6 = vcmp.ge.f32.partialorder %v1301_v19, 0.0  ;;  %v1429_v15 = vmul.f32 0.2, %v1301_v19 }
 0x1cc   : > { %2133 = vst [vmem:[%s3156_s4] sm:$0xff] %v2132_v58   ;;  %v1491_v52 = vsel %vm1363_vm4, %v1299_v36, %v1427_v24  ;;  %vm1366_vm7 = vcmp.ge.f32.partialorder %v1302_v31, 0.0  ;;  %v1430_v28 = vmul.f32 0.2, %v1302_v31  ;;  %v1303_v47 = vadd.f32 %v2919_v13, %v1232_v22  ;;  %v1175_v22 = vld [vmem:[#allocation2 + $0xb0] sm:$0xff] }
 0x1cd   : > { %2289 = vst [vmem:[%s3156_s4 + $0x8] sm:$0xff] %v2137_v45   ;;  %v1492_v56 = vsel %vm1364_vm5, %v1300_v2, %v1428_v49  ;;  %v1493_v57 = vsel %vm1365_vm6, %v1301_v19, %v1429_v15  ;;  %v1304_v1 = vadd.f32 %v2919_v13, %v1233_v16  ;;  %v1305_v5 = vadd.f32 %v2919_v13, %v1234_v54  ;;  %v1173_v19 = vld [vmem:[#allocation2 + $0xa0] sm:$0xff]  ;;  %v1174_v45 = vld [vmem:[#allocation2 + $0xa8] sm:$0xff] }
 0x1ce   : > { %v2142_v62 = vpack.c.bf16 %v1492_v56, %v1491_v52  ;;  %v1494_v3 = vsel %vm1366_vm7, %v1302_v31, %v1430_v28  ;;  %vm1367_vm8 = vcmp.ge.f32.partialorder %v1303_v47, 0.0  ;;  %v1431_v44 = vmul.f32 0.2, %v1303_v47  ;;  %v1176_v56 = vld [vmem:[#allocation2 + $0xb8] sm:$0xff]  ;;  %v1177_v28 = vld [vmem:[#allocation2 + $0xc0] sm:$0xff] }
 0x1cf   : > { %v2147_v63 = vpack.c.bf16 %v1494_v3, %v1493_v57  ;;  %vm1368_vm9 = vcmp.ge.f32.partialorder %v1304_v1, 0.0  ;;  %v1432_v10 = vmul.f32 0.2, %v1304_v1  ;;  %v1306_v11 = vadd.f32 %v2919_v13, %v1235_v35  ;;  %v1178_v57 = vld [vmem:[#allocation2 + $0xc8] sm:$0xff] }
 0x1d0   : > { %2290 = vst [vmem:[%s3156_s4 + $0x10] sm:$0xff] %v2142_v62   ;;  %vm1369_vm10 = vcmp.ge.f32.partialorder %v1305_v5, 0.0  ;;  %v1433_v8 = vmul.f32 0.2, %v1305_v5  ;;  %v1495_v60 = vsel %vm1367_vm8, %v1303_v47, %v1431_v44  ;;  %v1307_v48 = vadd.f32 %v2919_v13, %v1236_v43  ;;  %v1179_v44 = vld [vmem:[#allocation2 + $0xd0] sm:$0xff] }
 0x1d1   : > { %2291 = vst [vmem:[%s3156_s4 + $0x18] sm:$0xff] %v2147_v63   ;;  %v1308_v6 = vadd.f32 %v2919_v13, %v1237_v7  ;;  %v1238_v14 = vmul.f32 %v2915_v12, %v1167_v9  ;;  %v1496_v25 = vsel %vm1368_vm9, %v1304_v1, %v1432_v10  ;;  %vm1370_vm11 = vcmp.ge.f32.partialorder %v1306_v11, 0.0 }
 0x1d2   : > { %v1434_v18 = vmul.f32 0.2, %v1306_v11  ;;  %v1497_v46 = vsel %vm1369_vm10, %v1305_v5, %v1433_v8  ;;  %v2152_v23 = vpack.c.bf16 %v1496_v25, %v1495_v60  ;;  %vm1371_vm12 = vcmp.ge.f32.partialorder %v1307_v48, 0.0 }
 0x1d3   : > { %vm1372_vm13 = vcmp.ge.f32.partialorder %v1308_v6, 0.0  ;;  %v1435_v21 = vmul.f32 0.2, %v1307_v48  ;;  %v1436_v26 = vmul.f32 0.2, %v1308_v6  ;;  %v1239_v30 = vmul.f32 %v2915_v12, %v1168_v42 }
 0x1d4   : > { %v1498_v61 = vsel %vm1370_vm11, %v1306_v11, %v1434_v18  ;;  %v1309_v27 = vadd.f32 %v2919_v13, %v1238_v14  ;;  %2292 = vst [vmem:[%s3156_s4 + $0x20] sm:$0xff] %v2152_v23   ;;  %v1240_v33 = vmul.f32 %v2915_v12, %v1169_v20  ;;  %v1241_v59 = vmul.f32 %v2915_v12, %v1170_v32  ;;  %v1180_v18 = vld [vmem:[#allocation2 + $0xd8] sm:$0xff]  ;;  %v1181_v23 = vld [vmem:[#allocation2 + $0xe0] sm:$0xff] }
 0x1d5   : > { %v2157_v53 = vpack.c.bf16 %v1498_v61, %v1497_v46  ;;  %v1499_v4 = vsel %vm1371_vm12, %v1307_v48, %v1435_v21  ;;  %v1500_v34 = vsel %vm1372_vm13, %v1308_v6, %v1436_v26  ;;  %v1310_v51 = vadd.f32 %v2919_v13, %v1239_v30  ;;  %v1182_v21 = vld [vmem:[#allocation2 + $0xe8] sm:$0xff] }
 0x1d6   : > { %vm1373_vm14 = vcmp.ge.f32.partialorder %v1309_v27, 0.0  ;;  %v1437_v36 = vmul.f32 0.2, %v1309_v27  ;;  %v2162_v2 = vpack.c.bf16 %v1500_v34, %v1499_v4  ;;  %v1311_v58 = vadd.f32 %v2919_v13, %v1240_v33  ;;  %v1183_v34 = vld [vmem:[#allocation2 + $0xf0] sm:$0xff] }
 0x1d7   : > { %2293 = vst [vmem:[%s3156_s4 + $0x28] sm:$0xff] %v2157_v53   ;;  %v1312_v38 = vadd.f32 %v2919_v13, %v1241_v59  ;;  %v1242_v39 = vmul.f32 %v2915_v12, %v1171_v29  ;;  %vm1374_vm15 = vcmp.ge.f32.partialorder %v1310_v51, 0.0  ;;  %v1438_v17 = vmul.f32 0.2, %v1310_v51 }
 0x1d8   : > { %v1501_v40 = vsel %vm1373_vm14, %v1309_v27, %v1437_v36  ;;  %v1243_v41 = vmul.f32 %v2915_v12, %v1172_v0  ;;  %2294 = vst [vmem:[%s3156_s4 + $0x30] sm:$0xff] %v2162_v2   ;;  %vm1375_vm0 = vcmp.ge.f32.partialorder %v1311_v58, 0.0  ;;  %v1439_v24 = vmul.f32 0.2, %v1311_v58 }
 0x1d9   : > { %vm1376_vm1 = vcmp.ge.f32.partialorder %v1312_v38, 0.0  ;;  %v1440_v49 = vmul.f32 0.2, %v1312_v38  ;;  %v1502_v31 = vsel %vm1374_vm15, %v1310_v51, %v1438_v17  ;;  %v1313_v15 = vadd.f32 %v2919_v13, %v1242_v39 }
 0x1da   : > { %v1314_v50 = vadd.f32 %v2919_v13, %v1243_v41  ;;  %v1244_v52 = vmul.f32 %v2915_v12, %v1173_v19  ;;  %v2167_v16 = vpack.c.bf16 %v1502_v31, %v1501_v40  ;;  %v1503_v54 = vsel %vm1375_vm0, %v1311_v58, %v1439_v24  ;;  %v1185_v24 = vld [vmem:[#allocation2 + $0x100] sm:$0xff] }
 0x1db   : > { %v1504_v55 = vsel %vm1376_vm1, %v1312_v38, %v1440_v49  ;;  %v1245_v37 = vmul.f32 %v2915_v12, %v1174_v45  ;;  %vm1377_vm2 = vcmp.ge.f32.partialorder %v1313_v15, 0.0  ;;  %v1441_v47 = vmul.f32 0.2, %v1313_v15  ;;  %v1184_v38 = vld [vmem:[#allocation2 + $0xf8] sm:$0xff] }
 0x1dc   : > { %v2172_v62 = vpack.c.bf16 %v1504_v55, %v1503_v54  ;;  %vm1378_vm3 = vcmp.ge.f32.partialorder %v1314_v50, 0.0  ;;  %2295 = vst [vmem:[%s3156_s4 + $0x38] sm:$0xff] %v2167_v16   ;;  %v1442_v1 = vmul.f32 0.2, %v1314_v50  ;;  %v1315_v35 = vadd.f32 %v2919_v13, %v1244_v52 }
 0x1dd   : > { %v1316_v3 = vadd.f32 %v2919_v13, %v1245_v37  ;;  %v1246_v5 = vmul.f32 %v2915_v12, %v1175_v22  ;;  %v1505_v43 = vsel %vm1377_vm2, %v1313_v15, %v1441_v47  ;;  %v1247_v7 = vmul.f32 %v2915_v12, %v1176_v56 }
 0x1de   : > { %2296 = vst [vmem:[%s3156_s4 + $0x40] sm:$0xff] %v2172_v62   ;;  %v1248_v9 = vmul.f32 %v2915_v12, %v1177_v28  ;;  %v1249_v63 = vmul.f32 %v2915_v12, %v1178_v57  ;;  %v1506_v10 = vsel %vm1378_vm3, %v1314_v50, %v1442_v1  ;;  %vm1379_vm4 = vcmp.ge.f32.partialorder %v1315_v35, 0.0  ;;  %v1186_v50 = vld [vmem:[#allocation2 + $0x108] sm:$0xff]  ;;  %v1187_v28 = vld [vmem:[#allocation2 + $0x110] sm:$0xff]  ;;  %v1188_v57 = vld [vmem:[#allocation2 + $0x118] sm:$0xff] }
 0x1df   : > { %vm1380_vm5 = vcmp.ge.f32.partialorder %v1316_v3, 0.0  ;;  %v1443_v11 = vmul.f32 0.2, %v1315_v35  ;;  %v2177_v8 = vpack.c.bf16 %v1506_v10, %v1505_v43  ;;  %v1444_v60 = vmul.f32 0.2, %v1316_v3  ;;  %v1190_v10 = vld [vmem:[#allocation2 + $0x128] sm:$0xff] }
 0x1e0   : > { %v1317_v48 = vadd.f32 %v2919_v13, %v1246_v5  ;;  %v1318_v6 = vadd.f32 %v2919_v13, %v1247_v7  ;;  %v1319_v14 = vadd.f32 %v2919_v13, %v1248_v9  ;;  %v1320_v25 = vadd.f32 %v2919_v13, %v1249_v63 }
 0x1e1   : > { %v1507_v42 = vsel %vm1379_vm4, %v1315_v35, %v1443_v11  ;;  %v1250_v46 = vmul.f32 %v2915_v12, %v1179_v44  ;;  %2297 = vst [vmem:[%s3156_s4 + $0x48] sm:$0xff] %v2177_v8   ;;  %v1508_v20 = vsel %vm1380_vm5, %v1316_v3, %v1444_v60  ;;  %v1251_v53 = vmul.f32 %v2915_v12, %v1180_v18  ;;  %v1189_v35 = vld [vmem:[#allocation2 + $0x120] sm:$0xff] }
 0x1e2   : > { %vm1381_vm6 = vcmp.ge.f32.partialorder %v1317_v48, 0.0  ;;  %vm1382_vm7 = vcmp.ge.f32.partialorder %v1318_v6, 0.0  ;;  %v1445_v32 = vmul.f32 0.2, %v1317_v48  ;;  %v2182_v61 = vpack.c.bf16 %v1508_v20, %v1507_v42 }
 0x1e3   : > { %v1446_v26 = vmul.f32 0.2, %v1318_v6  ;;  %vm1383_vm8 = vcmp.ge.f32.partialorder %v1319_v14, 0.0  ;;  %vm1384_vm9 = vcmp.ge.f32.partialorder %v1320_v25, 0.0  ;;  %v1447_v27 = vmul.f32 0.2, %v1319_v14 }
 0x1e4   : > { %v1509_v30 = vsel %vm1381_vm6, %v1317_v48, %v1445_v32  ;;  %v1448_v29 = vmul.f32 0.2, %v1320_v25  ;;  %2298 = vst [vmem:[%s3156_s4 + $0x50] sm:$0xff] %v2182_v61   ;;  %v1321_v33 = vadd.f32 %v2919_v13, %v1250_v46  ;;  %v1252_v59 = vmul.f32 %v2915_v12, %v1181_v23  ;;  %v1191_v48 = vld [vmem:[#allocation2 + $0x130] sm:$0xff]  ;;  %v1192_v32 = vld [vmem:[#allocation2 + $0x138] sm:$0xff] }
 0x1e5   : > { %v1510_v4 = vsel %vm1382_vm7, %v1318_v6, %v1446_v26  ;;  %v1253_v0 = vmul.f32 %v2915_v12, %v1182_v21  ;;  %v1511_v36 = vsel %vm1383_vm8, %v1319_v14, %v1447_v27  ;;  %v1322_v58 = vadd.f32 %v2919_v13, %v1251_v53 }
 0x1e6   : > { %v2187_v51 = vpack.c.bf16 %v1510_v4, %v1509_v30  ;;  %v1512_v2 = vsel %vm1384_vm9, %v1320_v25, %v1448_v29  ;;  %vm1385_vm10 = vcmp.ge.f32.partialorder %v1321_v33, 0.0  ;;  %v1449_v19 = vmul.f32 0.2, %v1321_v33  ;;  %v1193_v29 = vld [vmem:[#allocation2 + $0x140] sm:$0xff] }
 0x1e7   : > { %v2192_v39 = vpack.c.bf16 %v1512_v2, %v1511_v36  ;;  %v1323_v17 = vadd.f32 %v2919_v13, %v1252_v59  ;;  %vm1386_vm11 = vcmp.ge.f32.partialorder %v1322_v58, 0.0  ;;  %v1450_v40 = vmul.f32 0.2, %v1322_v58  ;;  %v1194_v59 = vld [vmem:[#allocation2 + $0x148] sm:$0xff] }
 0x1e8   : > { %2299 = vst [vmem:[%s3156_s4 + $0x58] sm:$0xff] %v2187_v51   ;;  %v1324_v41 = vadd.f32 %v2919_v13, %v1253_v0  ;;  %v1254_v45 = vmul.f32 %v2915_v12, %v1183_v34  ;;  %v1513_v49 = vsel %vm1385_vm10, %v1321_v33, %v1449_v19  ;;  %v1255_v15 = vmul.f32 %v2915_v12, %v1184_v38  ;;  %v1196_v19 = vld [vmem:[#allocation2 + $0x158] sm:$0xff] }
 0x1e9   : > { %2300 = vst [vmem:[%s3156_s4 + $0x60] sm:$0xff] %v2192_v39   ;;  %vm1387_vm12 = vcmp.ge.f32.partialorder %v1323_v17, 0.0  ;;  %v1451_v31 = vmul.f32 0.2, %v1323_v17  ;;  %v1514_v52 = vsel %vm1386_vm11, %v1322_v58, %v1450_v40  ;;  %v1256_v56 = vmul.f32 %v2915_v12, %v1185_v24  ;;  %v1195_v39 = vld [vmem:[#allocation2 + $0x150] sm:$0xff] }
 0x1ea   : > { %vm1388_vm13 = vcmp.ge.f32.partialorder %v1324_v41, 0.0  ;;  %v1452_v22 = vmul.f32 0.2, %v1324_v41  ;;  %v1325_v16 = vadd.f32 %v2919_v13, %v1254_v45  ;;  %v2197_v54 = vpack.c.bf16 %v1514_v52, %v1513_v49  ;;  %v1197_v45 = vld [vmem:[#allocation2 + $0x160] sm:$0xff] }
 0x1eb   : > { %v1515_v55 = vsel %vm1387_vm12, %v1323_v17, %v1451_v31  ;;  %v1326_v37 = vadd.f32 %v2919_v13, %v1255_v15  ;;  %v1257_v1 = vmul.f32 %v2915_v12, %v1186_v50  ;;  %v1327_v43 = vadd.f32 %v2919_v13, %v1256_v56  ;;  %v1199_v56 = vld [vmem:[#allocation2 + $0x170] sm:$0xff] }
 0x1ec   : > { %v1516_v62 = vsel %vm1388_vm13, %v1324_v41, %v1452_v22  ;;  %vm1389_vm14 = vcmp.ge.f32.partialorder %v1325_v16, 0.0  ;;  %v1453_v47 = vmul.f32 0.2, %v1325_v16  ;;  %2301 = vst [vmem:[%s3156_s4 + $0x68] sm:$0xff] %v2197_v54   ;;  %v1258_v63 = vmul.f32 %v2915_v12, %v1187_v28 }
 0x1ed   : > { %v2202_v3 = vpack.c.bf16 %v1516_v62, %v1515_v55  ;;  %vm1390_vm15 = vcmp.ge.f32.partialorder %v1326_v37, 0.0  ;;  %v1454_v5 = vmul.f32 0.2, %v1326_v37  ;;  %v1328_v9 = vadd.f32 %v2919_v13, %v1257_v1 }
 0x1ee   : > { %v1517_v7 = vsel %vm1389_vm14, %v1325_v16, %v1453_v47  ;;  %v1259_v44 = vmul.f32 %v2915_v12, %v1188_v57  ;;  %vm1391_vm0 = vcmp.ge.f32.partialorder %v1327_v43, 0.0  ;;  %v1455_v8 = vmul.f32 0.2, %v1327_v43  ;;  %v1198_v16 = vld [vmem:[#allocation2 + $0x168] sm:$0xff] }
 0x1ef   : > { %2302 = vst [vmem:[%s3156_s4 + $0x70] sm:$0xff] %v2202_v3   ;;  %v1518_v11 = vsel %vm1390_vm15, %v1326_v37, %v1454_v5  ;;  %v1260_v60 = vmul.f32 %v2915_v12, %v1189_v35  ;;  %vm1392_vm1 = vcmp.ge.f32.partialorder %v1328_v9, 0.0  ;;  %v1456_v42 = vmul.f32 0.2, %v1328_v9  ;;  %v1200_v5 = vld [vmem:[#allocation2 + $0x178] sm:$0xff] }
 0x1f0   : > { %v2207_v6 = vpack.c.bf16 %v1518_v11, %v1517_v7  ;;  %v1329_v14 = vadd.f32 %v2919_v13, %v1258_v63  ;;  %v1519_v25 = vsel %vm1391_vm0, %v1327_v43, %v1455_v8  ;;  %v1330_v18 = vadd.f32 %v2919_v13, %v1259_v44  ;;  %v1201_v11 = vld [vmem:[#allocation2 + $0x180] sm:$0xff] }
 0x1f1   : > { %v1261_v46 = vmul.f32 %v2915_v12, %v1190_v10  ;;  %v1331_v20 = vadd.f32 %v2919_v13, %v1260_v60  ;;  %v1520_v23 = vsel %vm1392_vm1, %v1328_v9, %v1456_v42  ;;  %v1262_v61 = vmul.f32 %v2915_v12, %v1191_v48 }
 0x1f2   : > { %2303 = vst [vmem:[%s3156_s4 + $0x78] sm:$0xff] %v2207_v6   ;;  %vm1393_vm2 = vcmp.ge.f32.partialorder %v1329_v14, 0.0  ;;  %v1457_v21 = vmul.f32 0.2, %v1329_v14  ;;  %v2212_v26 = vpack.c.bf16 %v1520_v23, %v1519_v25  ;;  %vm1394_vm3 = vcmp.ge.f32.partialorder %v1330_v18, 0.0  ;;  %v1202_v6 = vld [vmem:[#allocation2 + $0x188] sm:$0xff] }
 0x1f3   : > { %v1458_v30 = vmul.f32 0.2, %v1330_v18  ;;  %v1332_v27 = vadd.f32 %v2919_v13, %v1261_v46  ;;  %vm1395_vm4 = vcmp.ge.f32.partialorder %v1331_v20, 0.0  ;;  %v1459_v4 = vmul.f32 0.2, %v1331_v20  ;;  %v1203_v23 = vld [vmem:[#allocation2 + $0x190] sm:$0xff] }
 0x1f4   : > { %v1521_v53 = vsel %vm1393_vm2, %v1329_v14, %v1457_v21  ;;  %v1263_v33 = vmul.f32 %v2915_v12, %v1192_v32  ;;  %2304 = vst [vmem:[%s3156_s4 + $0x80] sm:$0xff] %v2212_v26   ;;  %v1333_v51 = vadd.f32 %v2919_v13, %v1262_v61  ;;  %v1264_v38 = vmul.f32 %v2915_v12, %v1193_v29  ;;  %v1204_v21 = vld [vmem:[#allocation2 + $0x198] sm:$0xff] }
 0x1f5   : > { %v1522_v0 = vsel %vm1394_vm3, %v1330_v18, %v1458_v30  ;;  %vm1396_vm5 = vcmp.ge.f32.partialorder %v1332_v27, 0.0  ;;  %v1460_v34 = vmul.f32 0.2, %v1332_v27  ;;  %v1523_v2 = vsel %vm1395_vm4, %v1331_v20, %v1459_v4 }
 0x1f6   : > { %v2217_v36 = vpack.c.bf16 %v1522_v0, %v1521_v53  ;;  %v1334_v58 = vadd.f32 %v2919_v13, %v1263_v33  ;;  %vm1397_vm6 = vcmp.ge.f32.partialorder %v1333_v51, 0.0  ;;  %v1461_v40 = vmul.f32 0.2, %v1333_v51 }
 0x1f7   : > { %v1524_v17 = vsel %vm1396_vm5, %v1332_v27, %v1460_v34  ;;  %v1265_v41 = vmul.f32 %v2915_v12, %v1194_v59  ;;  %v1335_v31 = vadd.f32 %v2919_v13, %v1264_v38  ;;  %v1266_v52 = vmul.f32 %v2915_v12, %v1195_v39  ;;  %v1205_v27 = vld [vmem:[#allocation2 + $0x1a0] sm:$0xff]  ;;  %v1207_v38 = vld [vmem:[#allocation2 + $0x1b0] sm:$0xff] }
 0x1f8   : > { %2305 = vst [vmem:[%s3156_s4 + $0x88] sm:$0xff] %v2217_v36   ;;  %v2222_v24 = vpack.c.bf16 %v1524_v17, %v1523_v2  ;;  %vm1398_vm7 = vcmp.ge.f32.partialorder %v1334_v58, 0.0  ;;  %v1462_v49 = vmul.f32 0.2, %v1334_v58  ;;  %v1525_v15 = vsel %vm1397_vm6, %v1333_v51, %v1461_v40  ;;  %v1206_v51 = vld [vmem:[#allocation2 + $0x1a8] sm:$0xff] }
 0x1f9   : > { %v1336_v50 = vadd.f32 %v2919_v13, %v1265_v41  ;;  %v1267_v22 = vmul.f32 %v2915_v12, %v1196_v19  ;;  %vm1399_vm8 = vcmp.ge.f32.partialorder %v1335_v31, 0.0  ;;  %v1463_v55 = vmul.f32 0.2, %v1335_v31 }
 0x1fa   : > { %2306 = vst [vmem:[%s3156_s4 + $0x90] sm:$0xff] %v2222_v24   ;;  %v1526_v54 = vsel %vm1398_vm7, %v1334_v58, %v1462_v49  ;;  %v1268_v37 = vmul.f32 %v2915_v12, %v1197_v45  ;;  %v1337_v62 = vadd.f32 %v2919_v13, %v1266_v52  ;;  %v1269_v35 = vmul.f32 %v2915_v12, %v1198_v16  ;;  %v1208_v49 = vld [vmem:[#allocation2 + $0x1b8] sm:$0xff] }
 0x1fb   : > { %v2227_v28 = vpack.c.bf16 %v1526_v54, %v1525_v15  ;;  %vm1400_vm9 = vcmp.ge.f32.partialorder %v1336_v50, 0.0  ;;  %v1464_v57 = vmul.f32 0.2, %v1336_v50  ;;  %v1527_v47 = vsel %vm1399_vm8, %v1335_v31, %v1463_v55  ;;  %v1209_v54 = vld [vmem:[#allocation2 + $0x1c0] sm:$0xff] }
 0x1fc   : > { %v1338_v1 = vadd.f32 %v2919_v13, %v1267_v22  ;;  %v1339_v3 = vadd.f32 %v2919_v13, %v1268_v37  ;;  %vm1401_vm10 = vcmp.ge.f32.partialorder %v1337_v62, 0.0  ;;  %v1465_v7 = vmul.f32 0.2, %v1337_v62 }
 0x1fd   : > { %2307 = vst [vmem:[%s3156_s4 + $0x98] sm:$0xff] %v2227_v28   ;;  %v1528_v43 = vsel %vm1400_vm9, %v1336_v50, %v1464_v57  ;;  %v1270_v9 = vmul.f32 %v2915_v12, %v1199_v56  ;;  %v1340_v10 = vadd.f32 %v2919_v13, %v1269_v35  ;;  %v1271_v48 = vmul.f32 %v2915_v12, %v1200_v5  ;;  %v1210_v28 = vld [vmem:[#allocation2 + $0x1c8] sm:$0xff] }
 0x1fe   : > { %v2232_v63 = vpack.c.bf16 %v1528_v43, %v1527_v47  ;;  %vm1402_vm11 = vcmp.ge.f32.partialorder %v1338_v1, 0.0  ;;  %v1466_v44 = vmul.f32 0.2, %v1338_v1  ;;  %v1529_v8 = vsel %vm1401_vm10, %v1337_v62, %v1465_v7  ;;  %v1211_v43 = vld [vmem:[#allocation2 + $0x1d0] sm:$0xff]  ;;  %v1212_v7 = vld [vmem:[#allocation2 + $0x1d8] sm:$0xff] }
 0x1ff   : > { %vm1403_vm12 = vcmp.ge.f32.partialorder %v1339_v3, 0.0  ;;  %v1467_v60 = vmul.f32 0.2, %v1339_v3  ;;  %vm1404_vm13 = vcmp.ge.f32.partialorder %v1340_v10, 0.0  ;;  %v1468_v14 = vmul.f32 0.2, %v1340_v10 }
 0x200   : > { %2308 = vst [vmem:[%s3156_s4 + $0xa0] sm:$0xff] %v2232_v63   ;;  %v1530_v42 = vsel %vm1402_vm11, %v1338_v1, %v1466_v44  ;;  %v1341_v25 = vadd.f32 %v2919_v13, %v1270_v9  ;;  %v1342_v20 = vadd.f32 %v2919_v13, %v1271_v48  ;;  %v1272_v32 = vmul.f32 %v2915_v12, %v1201_v11 }
 0x201   : > { %v2237_v18 = vpack.c.bf16 %v1530_v42, %v1529_v8  ;;  %v1531_v46 = vsel %vm1403_vm12, %v1339_v3, %v1467_v60  ;;  %v1532_v61 = vsel %vm1404_vm13, %v1340_v10, %v1468_v14  ;;  %v1273_v30 = vmul.f32 %v2915_v12, %v1202_v6  ;;  %v1213_v10 = vld [vmem:[#allocation2 + $0x1e0] sm:$0xff] }
 0x202   : > { %vm1405_vm14 = vcmp.ge.f32.partialorder %v1341_v25, 0.0  ;;  %v1469_v26 = vmul.f32 0.2, %v1341_v25  ;;  %v2242_v29 = vpack.c.bf16 %v1532_v61, %v1531_v46  ;;  %vm1406_vm15 = vcmp.ge.f32.partialorder %v1342_v20, 0.0 }
 0x203   : > { %2309 = vst [vmem:[%s3156_s4 + $0xa8] sm:$0xff] %v2237_v18   ;;  %v1470_v53 = vmul.f32 0.2, %v1342_v20  ;;  %v1343_v4 = vadd.f32 %v2919_v13, %v1272_v32  ;;  %v1344_v59 = vadd.f32 %v2919_v13, %v1273_v30  ;;  %v1274_v0 = vmul.f32 %v2915_v12, %v1203_v23  ;;  %v1215_v32 = vld [vmem:[#allocation2 + $0x1f0] sm:$0xff] }
 0x204   : > { %v1533_v33 = vsel %vm1405_vm14, %v1341_v25, %v1469_v26  ;;  %v1275_v34 = vmul.f32 %v2915_v12, %v1204_v21  ;;  %2310 = vst [vmem:[%s3156_s4 + $0xb0] sm:$0xff] %v2242_v29   ;;  %v1276_v58 = vmul.f32 %v2915_v12, %v1205_v27  ;;  %v1277_v45 = vmul.f32 %v2915_v12, %v1206_v51  ;;  %v1214_v25 = vld [vmem:[#allocation2 + $0x1e8] sm:$0xff] }
 0x205   : > { %v1534_v36 = vsel %vm1406_vm15, %v1342_v20, %v1470_v53  ;;  %vm1407_vm0 = vcmp.ge.f32.partialorder %v1343_v4, 0.0  ;;  %v1471_v2 = vmul.f32 0.2, %v1343_v4  ;;  %vm1408_vm1 = vcmp.ge.f32.partialorder %v1344_v59, 0.0  ;;  %v1216_v53 = vld [vmem:[#allocation2 + $0x1f8] sm:$0xff] }
 0x206   : > { %v2247_v39 = vpack.c.bf16 %v1534_v36, %v1533_v33  ;;  %v1472_v19 = vmul.f32 0.2, %v1344_v59  ;;  %v1345_v17 = vadd.f32 %v2919_v13, %v1274_v0  ;;  %v1346_v41 = vadd.f32 %v2919_v13, %v1275_v34 }
 0x207   : > { %v1535_v40 = vsel %vm1407_vm0, %v1343_v4, %v1471_v2  ;;  %v1347_v24 = vadd.f32 %v2919_v13, %v1276_v58  ;;  %v1278_v50 = vmul.f32 %v2915_v12, %v1207_v38  ;;  %v1348_v16 = vadd.f32 %v2919_v13, %v1277_v45 }
 0x208   : > { %2311 = vst [vmem:[%s3156_s4 + $0xb8] sm:$0xff] %v2247_v39   ;;  %v1536_v31 = vsel %vm1408_vm1, %v1344_v59, %v1472_v19  ;;  %vm1409_vm2 = vcmp.ge.f32.partialorder %v1345_v17, 0.0  ;;  %v1473_v15 = vmul.f32 0.2, %v1345_v17  ;;  %vm1410_vm3 = vcmp.ge.f32.partialorder %v1346_v41, 0.0 }
 0x209   : > { %v2252_v52 = vpack.c.bf16 %v1536_v31, %v1535_v40  ;;  %v1474_v22 = vmul.f32 0.2, %v1346_v41  ;;  %vm1411_vm4 = vcmp.ge.f32.partialorder %v1347_v24, 0.0  ;;  %v1475_v37 = vmul.f32 0.2, %v1347_v24 }
 0x20a   : > { %v1537_v55 = vsel %vm1409_vm2, %v1345_v17, %v1473_v15  ;;  %v1279_v56 = vmul.f32 %v2915_v12, %v1208_v49  ;;  %vm1412_vm5 = vcmp.ge.f32.partialorder %v1348_v16, 0.0  ;;  %v1476_v62 = vmul.f32 0.2, %v1348_v16 }
 0x20b   : > { %2312 = vst [vmem:[%s3156_s4 + $0xc0] sm:$0xff] %v2252_v52   ;;  %v1538_v57 = vsel %vm1410_vm3, %v1346_v41, %v1474_v22  ;;  %v1349_v47 = vadd.f32 %v2919_v13, %v1278_v50  ;;  %v1539_v35 = vsel %vm1411_vm4, %v1347_v24, %v1475_v37  ;;  %v1280_v5 = vmul.f32 %v2915_v12, %v1209_v54 }
 0x20c   : > { %v2257_v1 = vpack.c.bf16 %v1538_v57, %v1537_v55  ;;  %v1350_v3 = vadd.f32 %v2919_v13, %v1279_v56  ;;  %v1540_v9 = vsel %vm1412_vm5, %v1348_v16, %v1476_v62  ;;  %v1281_v44 = vmul.f32 %v2915_v12, %v1210_v28 }
 0x20d   : > { %vm1413_vm6 = vcmp.ge.f32.partialorder %v1349_v47, 0.0  ;;  %v1477_v63 = vmul.f32 0.2, %v1349_v47  ;;  %v2262_v11 = vpack.c.bf16 %v1540_v9, %v1539_v35  ;;  %v1351_v60 = vadd.f32 %v2919_v13, %v1280_v5 }
 0x20e   : > { %2313 = vst [vmem:[%s3156_s4 + $0xc8] sm:$0xff] %v2257_v1   ;;  %vm1414_vm7 = vcmp.ge.f32.partialorder %v1350_v3, 0.0  ;;  %v1478_v8 = vmul.f32 0.2, %v1350_v3  ;;  %v1352_v6 = vadd.f32 %v2919_v13, %v1281_v44  ;;  %v1282_v42 = vmul.f32 %v2915_v12, %v1211_v43 }
 0x20f   : > { %v1541_v48 = vsel %vm1413_vm6, %v1349_v47, %v1477_v63  ;;  %v1283_v14 = vmul.f32 %v2915_v12, %v1212_v7  ;;  %2314 = vst [vmem:[%s3156_s4 + $0xd0] sm:$0xff] %v2262_v11   ;;  %vm1415_vm8 = vcmp.ge.f32.partialorder %v1351_v60, 0.0  ;;  %v1479_v46 = vmul.f32 0.2, %v1351_v60 }
 0x210   : > { %v1542_v18 = vsel %vm1414_vm7, %v1350_v3, %v1478_v8  ;;  %v1284_v20 = vmul.f32 %v2915_v12, %v1213_v10  ;;  %vm1416_vm9 = vcmp.ge.f32.partialorder %v1352_v6, 0.0  ;;  %v1480_v21 = vmul.f32 0.2, %v1352_v6 }
 0x211   : > { %v2267_v23 = vpack.c.bf16 %v1542_v18, %v1541_v48  ;;  %v1353_v61 = vadd.f32 %v2919_v13, %v1282_v42  ;;  %v1543_v26 = vsel %vm1415_vm8, %v1351_v60, %v1479_v46  ;;  %v1354_v30 = vadd.f32 %v2919_v13, %v1283_v14 }
 0x212   : > { %v1285_v27 = vmul.f32 %v2915_v12, %v1214_v25  ;;  %v1355_v29 = vadd.f32 %v2919_v13, %v1284_v20  ;;  %v1544_v4 = vsel %vm1416_vm9, %v1352_v6, %v1480_v21  ;;  %v1286_v59 = vmul.f32 %v2915_v12, %v1215_v32 }
 0x213   : > { %2315 = vst [vmem:[%s3156_s4 + $0xd8] sm:$0xff] %v2267_v23   ;;  %vm1417_vm10 = vcmp.ge.f32.partialorder %v1353_v61, 0.0  ;;  %v1481_v33 = vmul.f32 0.2, %v1353_v61  ;;  %v2272_v0 = vpack.c.bf16 %v1544_v4, %v1543_v26  ;;  %vm1418_vm11 = vcmp.ge.f32.partialorder %v1354_v30, 0.0 }
 0x214   : > { %v1482_v34 = vmul.f32 0.2, %v1354_v30  ;;  %v1356_v51 = vadd.f32 %v2919_v13, %v1285_v27  ;;  %vm1419_vm12 = vcmp.ge.f32.partialorder %v1355_v29, 0.0  ;;  %v1483_v2 = vmul.f32 0.2, %v1355_v29 }
 0x215   : > { %v1545_v36 = vsel %vm1417_vm10, %v1353_v61, %v1481_v33  ;;  %v1287_v58 = vmul.f32 %v2915_v12, %v1216_v53  ;;  %2316 = vst [vmem:[%s3156_s4 + $0xe0] sm:$0xff] %v2272_v0   ;;  %v1357_v19 = vadd.f32 %v2919_v13, %v1286_v59 }
 0x216   : > { %v1546_v38 = vsel %vm1418_vm11, %v1354_v30, %v1482_v34  ;;  %vm1420_vm13 = vcmp.ge.f32.partialorder %v1356_v51, 0.0  ;;  %v1484_v39 = vmul.f32 0.2, %v1356_v51  ;;  %v1547_v40 = vsel %vm1419_vm12, %v1355_v29, %v1483_v2 }
 0x217   : > { %v2277_v17 = vpack.c.bf16 %v1546_v38, %v1545_v36  ;;  %v1358_v41 = vadd.f32 %v2919_v13, %v1287_v58  ;;  %vm1421_vm14 = vcmp.ge.f32.partialorder %v1357_v19, 0.0  ;;  %v1485_v24 = vmul.f32 0.2, %v1357_v19 }
 0x218   : > { %v1548_v45 = vsel %vm1420_vm13, %v1356_v51, %v1484_v39 }
 0x219   : > { %2317 = vst [vmem:[%s3156_s4 + $0xe8] sm:$0xff] %v2277_v17   ;;  %v2282_v12 = vpack.c.bf16 %v1548_v45, %v1547_v40  ;;  %vm1422_vm15 = vcmp.ge.f32.partialorder %v1358_v41, 0.0  ;;  %v1486_v49 = vmul.f32 0.2, %v1358_v41  ;;  %v1549_v31 = vsel %vm1421_vm14, %v1357_v19, %v1485_v24 }
 0x21b   : > { %2318 = vst [vmem:[%s3156_s4 + $0xf0] sm:$0xff] %v2282_v12   ;;  %v1550_v15 = vsel %vm1422_vm15, %v1358_v41, %v1486_v49 }
 0x21c   : > { %v2287_v50 = vpack.c.bf16 %v1550_v15, %v1549_v31 }
 0x21e   : > { %2319 = vst [vmem:[%s3156_s4 + $0xf8] sm:$0xff] %v2287_v50  }
 0x21f PF: > { %s14_s17 = sadd.s32 1, %s2545_s17   ;;  %s3157_s15 = smov %s2541_s16 }
 0x220   : > { %p11_p8 = scmp.ge.s32.totalorder %s14_s17, 4   ;;  %s3158_s16 = smov %s3160_s18 }
 0x222   :  { %13 = sbr.rel (!%p11_p8) target bundleno = 2 (0x2), region = 84 }

// kernel: discriminator_forward.6
= control target key start
LH: loop header
LB: loop body
LE: loop exit
PB: predicated region body
PF: predicated region fallthrough
CT: control target
= control target key end

     0   :  { %s1264_s15 = smov 0   ;;  %s1266_s16 = smov 0   ;;  %s1477_s0 = inlined_call_operand.vmem [shape: bf16[128,256], index: 0, kind: input, shape index: {}]   ;;  %s1478_s1 = inlined_call_operand.vmem [shape: bf16[256,128], index: 1, kind: input, shape index: {}]   ;;  %s1479_s2 = inlined_call_operand.vmem [shape: f32[1,128], index: 2, kind: input, shape index: {}]   ;;  %s1480_s3 = inlined_call_operand.vmem [shape: f32[1,128], index: 3, kind: input, shape index: {}]   ;;  %s1481_s4 = inlined_call_operand.vmem [shape: bf16[128,128], index: 4, kind: output, shape index: {}]  }
   0x1   :  { %s1268_s17 = smov 0  }
   0x2 LB: > { %s26_s18 = sadd.s32 1, %s1232_s16  ;;  %p943_p0 = scmp.ge.s32.totalorder %s1236_s17, 1  ;;  %s1236_s17 = sphi %s1268_s17, %s14_s17   ;;  %s1232_s16 = sphi %s1266_s16, %s1483_s16   ;;  %s1228_s15 = sphi %s1264_s15, %s1482_s15  }
   0x3   : > { %p28_p1 = scmp.ge.s32.totalorder %s26_s18, 2  ;;  %p186_p2 = scmp.lt.s32.totalorder %s1236_s17, 3 }
   0x5   : > { %s1485_s18 = smov (%p28_p1, %s26_s18), 0  ;;  %p187_p3 = pnand %p943_p0, %p186_p2 }
   0x6   : > { %p236_p4 = scmp.eq.s32.totalorder (!%p187_p3), %s1228_s15, 0 }
   0x7   : > { %190 = sbr.rel (%p187_p3) target bundleno = 395 (0x18b), region = 36 }
   0xe   : > { %241 = sbr.rel (!%p236_p4) target bundleno = 21 (0x15), region = 40  ;;  %v1238_v0 = vmov (%p236_p4), 0.0  }
   0xf   : > { %242 = vst [vmem:[#allocation3] sm:$0x1] (%p236_p4), %v1238_v0  ;;  %243 = vst [vmem:[#allocation4] sm:$0x1] (%p236_p4), %v1238_v0 }
  0x15 PF: > { %p945_p5 = scmp.ne.s32.totalorder %s1228_s15, 0 }
  0x16   : > { %v1172_v1 = vld [vmem:[%s1478_s1 + $0x40] sm:$0xff] (!%p945_p5)   ;;  %v1174_v3 = vld [vmem:[%s1478_s1 + $0x48] sm:$0xff] (!%p945_p5)   ;;  %v1176_v5 = vld [vmem:[%s1478_s1 + $0x50] sm:$0xff] (!%p945_p5)  }
  0x17   : > { %246 = sbr.rel (%p945_p5) target bundleno = 331 (0x14b), region = 44  ;;  %v1173_v2 = vld [vmem:[%s1478_s1] sm:$0xff] (!%p945_p5)   ;;  %1067 = vmatprep.subr.bf16.mxu0 (!%p945_p5), %v1172_v1  ;;  %1131 = vmatprep.subr.bf16.mxu1 (!%p945_p5), %v1172_v1  ;;  %v1175_v4 = vld [vmem:[%s1478_s1 + $0x8] sm:$0xff] (!%p945_p5)   ;;  %v1177_v6 = vld [vmem:[%s1478_s1 + $0x10] sm:$0xff] (!%p945_p5)  }
  0x18   : > { %1068 = vmatpush3.bf16.msra.mxu0 (!%p945_p5), %v1173_v2  ;;  %1139 = vmatpush3.bf16.msra.mxu1 (!%p945_p5), %v1173_v2  ;;  %v1178_v7 = vld [vmem:[%s1478_s1 + $0x58] sm:$0xff] (!%p945_p5)   ;;  %v1180_v9 = vld [vmem:[%s1478_s1 + $0x60] sm:$0xff] (!%p945_p5)   ;;  %v1182_v11 = vld [vmem:[%s1478_s1 + $0x68] sm:$0xff] (!%p945_p5)  }
  0x19   : > { %1069 = vmatprep.subr.bf16.mxu0 (!%p945_p5), %v1174_v3  ;;  %1132 = vmatprep.subr.bf16.mxu1 (!%p945_p5), %v1174_v3  ;;  %v1179_v8 = vld [vmem:[%s1478_s1 + $0x18] sm:$0xff] (!%p945_p5)   ;;  %v1181_v10 = vld [vmem:[%s1478_s1 + $0x20] sm:$0xff] (!%p945_p5)   ;;  %v1183_v13 = vld [vmem:[%s1478_s1 + $0x28] sm:$0xff] (!%p945_p5)  }
  0x1a   : > { %v1190_v12 = vld [vmem:[%s1477_s0 + $0x4] ss:$8 sps:$4 sm:$0xff] (!%p945_p5)   ;;  %v1184_v15 = vld [vmem:[%s1478_s1 + $0x70] sm:$0xff] (!%p945_p5)   ;;  %v1186_v17 = vld [vmem:[%s1478_s1 + $0x78] sm:$0xff] (!%p945_p5)  }
  0x1b   : > { %v1196_v14 = vld [vmem:[%s1477_s0 + $0x44] ss:$8 sps:$4 sm:$0xff] (!%p945_p5)   ;;  %503 = vmatprep.mubr.bf16.mxu0 (!%p945_p5), %v1190_v12  ;;  %v1185_v16 = vld [vmem:[%s1478_s1 + $0x30] sm:$0xff] (!%p945_p5)   ;;  %v1187_v18 = vld [vmem:[%s1478_s1 + $0x38] sm:$0xff] (!%p945_p5)  }
  0x1c   : > { %1070 = vmatpush3.bf16.msra.mxu0 (!%p945_p5), %v1175_v4  ;;  %1140 = vmatpush3.bf16.msra.mxu1 (!%p945_p5), %v1175_v4  ;;  %v1188_v19 = vld [vmem:[%s1477_s0] ss:$8 sps:$4 sm:$0xff] (!%p945_p5)   ;;  %v1191_v21 = vld [vmem:[%s1477_s0 + $0x14] ss:$8 sps:$4 sm:$0xff] (!%p945_p5)   ;;  %v1193_v23 = vld [vmem:[%s1477_s0 + $0x10] ss:$8 sps:$4 sm:$0xff] (!%p945_p5)  }
  0x1d   : > { %1071 = vmatprep.subr.bf16.mxu0 (!%p945_p5), %v1176_v5  ;;  %1133 = vmatprep.subr.bf16.mxu1 (!%p945_p5), %v1176_v5  ;;  %v1194_v20 = vld [vmem:[%s1477_s0 + $0x40] ss:$8 sps:$4 sm:$0xff] (!%p945_p5)   ;;  %v1200_v22 = vld [vmem:[%s1477_s0 + $0x54] ss:$8 sps:$4 sm:$0xff] (!%p945_p5)   ;;  %v1202_v24 = vld [vmem:[%s1477_s0 + $0x50] ss:$8 sps:$4 sm:$0xff] (!%p945_p5)  }
  0x1e   : > { %535 = vmatprep.mubr.bf16.mxu1 %v1196_v14  ;;  %v1197_v25 = vld [vmem:[%s1477_s0 + $0x24] ss:$8 sps:$4 sm:$0xff]   ;;  %v1199_v27 = vld [vmem:[%s1477_s0 + $0x20] ss:$8 sps:$4 sm:$0xff]   ;;  %v1203_v29 = vld [vmem:[%s1477_s0 + $0x34] ss:$8 sps:$4 sm:$0xff]  }
  0x1f   : > { %v1206_v26 = vld [vmem:[%s1477_s0 + $0x64] ss:$8 sps:$4 sm:$0xff]   ;;  %v1208_v28 = vld [vmem:[%s1477_s0 + $0x60] ss:$8 sps:$4 sm:$0xff]   ;;  %v1209_v30 = vld [vmem:[%s1477_s0 + $0x74] ss:$8 sps:$4 sm:$0xff]  }
  0x20   : > { %1072 = vmatpush3.bf16.msra.mxu0 %v1177_v6  ;;  %1141 = vmatpush3.bf16.msra.mxu1 %v1177_v6  ;;  %v1205_v31 = vld [vmem:[%s1477_s0 + $0x30] ss:$8 sps:$4 sm:$0xff]  }
  0x21   : > { %1073 = vmatprep.subr.bf16.mxu0 %v1178_v7  ;;  %1134 = vmatprep.subr.bf16.mxu1 %v1178_v7  ;;  %v1211_v32 = vld [vmem:[%s1477_s0 + $0x70] ss:$8 sps:$4 sm:$0xff]  }
  0x24   : > { %1074 = vmatpush3.bf16.msra.mxu0 %v1179_v8  ;;  %1142 = vmatpush3.bf16.msra.mxu1 %v1179_v8 }
  0x25   : > { %1075 = vmatprep.subr.bf16.mxu0 %v1180_v9  ;;  %1135 = vmatprep.subr.bf16.mxu1 %v1180_v9 }
  0x28   : > { %1076 = vmatpush3.bf16.msra.mxu0 %v1181_v10  ;;  %1143 = vmatpush3.bf16.msra.mxu1 %v1181_v10 }
  0x29   : > { %1077 = vmatprep.subr.bf16.mxu0 %v1182_v11  ;;  %1136 = vmatprep.subr.bf16.mxu1 %v1182_v11 }
  0x2c   : > { %1078 = vmatpush3.bf16.msra.mxu0 %v1183_v13  ;;  %1144 = vmatpush3.bf16.msra.mxu1 %v1183_v13 }
  0x2d   : > { %1079 = vmatprep.subr.bf16.mxu0 %v1184_v15  ;;  %1137 = vmatprep.subr.bf16.mxu1 %v1184_v15 }
  0x30   : > { %1080 = vmatpush3.bf16.msra.mxu0 %v1185_v16  ;;  %1145 = vmatpush3.bf16.msra.mxu1 %v1185_v16 }
  0x31   : > { %1081 = vmatprep.subr.bf16.mxu0 %v1186_v17  ;;  %1138 = vmatprep.subr.bf16.mxu1 %v1186_v17 }
  0x34   : > { %1082 = vmatpush3.bf16.msra.mxu0 %v1187_v18  ;;  %1146 = vmatpush3.bf16.msra.mxu1 %v1187_v18 }
  0x37   : > { %504 = vmatmul.mubr.bf16.vlgmr.msra.gmra.mrb[0].mxu0 %v1188_v19  ;;  %536 = vmatmul.mubr.bf16.vlgmr.msra.gmra.mrb[0].mxu1 %v1194_v20 }
  0x38   : > { %511 = vmatprep.mubr.bf16.mxu0 %v1191_v21  ;;  %543 = vmatprep.mubr.bf16.mxu1 %v1200_v22 }
  0x3f   : > { %512 = vmatmul.mubr.bf16.gmra.mrb[4].mxu0 %v1193_v23  ;;  %544 = vmatmul.mubr.bf16.gmra.mrb[4].mxu1 %v1202_v24 }
  0x40   : > { %519 = vmatprep.mubr.bf16.mxu0 %v1197_v25  ;;  %551 = vmatprep.mubr.bf16.mxu1 %v1206_v26 }
  0x47   : > { %520 = vmatmul.mubr.bf16.gmra.mrb[8].mxu0 %v1199_v27  ;;  %552 = vmatmul.mubr.bf16.gmra.mrb[8].mxu1 %v1208_v28 }
  0x48   : > { %527 = vmatprep.mubr.bf16.mxu0 %v1203_v29  ;;  %559 = vmatprep.mubr.bf16.mxu1 %v1209_v30 }
  0x4f   : > { %528 = vmatmul.mubr.bf16.gmra.mrb[12].mxu0 %v1205_v31  ;;  %560 = vmatmul.mubr.bf16.gmra.mrb[12].mxu1 %v1211_v32 }
 0x10a   : > { %v1083_v33 = vpop.f32.mrb[0].mxu0  ;;  %v1107_v34 = vpop.f32.mrb[0].mxu1 }
 0x10b   : > { %v1084_v35 = vpop.f32.mrb[1].mxu0  ;;  %v1108_v36 = vpop.f32.mrb[1].mxu1 }
 0x10c   : > { %v1085_v37 = vadd.f32 %v1084_v35, %v1083_v33  ;;  %v1086_v38 = vpop.f32.mrb[2].mxu0  ;;  %v1382_v39 = vadd.f32 %v1108_v36, %v1107_v34  ;;  %v1110_v40 = vpop.f32.mrb[2].mxu1 }
 0x10d   : > { %v1087_v41 = vpop.f32.mrb[3].mxu0  ;;  %v1111_v42 = vpop.f32.mrb[3].mxu1 }
 0x10e   : > { %570 = vst [vmem:[#allocation2] sm:$0xff] %v1085_v37  ;;  %v1088_v43 = vadd.f32 %v1087_v41, %v1086_v38  ;;  %578 = vst [vmem:[#allocation2 + $0x40] sm:$0xff] %v1382_v39  ;;  %v1385_v44 = vadd.f32 %v1111_v42, %v1110_v40  ;;  %v611_v45 = vmul.f32 %v1085_v37, %v1085_v37 }
 0x10f   : > { %v619_v38 = vmul.f32 %v1382_v39, %v1382_v39 }
 0x110   : > { %571 = vst [vmem:[#allocation2 + $0x8] sm:$0xff] %v1088_v43  ;;  %v587_v46 = vadd.f32 %v1088_v43, %v1085_v37  ;;  %v612_v47 = vmul.f32 %v1088_v43, %v1088_v43  ;;  %579 = vst [vmem:[#allocation2 + $0x48] sm:$0xff] %v1385_v44  ;;  %v620_v42 = vmul.f32 %v1385_v44, %v1385_v44 }
 0x112   : > { %v627_v48 = vadd.f32 %v612_v47, %v611_v45  ;;  %v1089_v49 = vpop.f32.mrb[4].mxu0  ;;  %v1113_v50 = vpop.f32.mrb[4].mxu1 }
 0x113   : > { %v1090_v51 = vpop.f32.mrb[5].mxu0  ;;  %v1114_v52 = vpop.f32.mrb[5].mxu1 }
 0x114   : > { %v1091_v53 = vadd.f32 %v1090_v51, %v1089_v49  ;;  %v1092_v54 = vpop.f32.mrb[6].mxu0  ;;  %v1388_v55 = vadd.f32 %v1114_v52, %v1113_v50  ;;  %v1116_v56 = vpop.f32.mrb[6].mxu1 }
 0x115   : > { %v1093_v57 = vpop.f32.mrb[7].mxu0  ;;  %v1117_v58 = vpop.f32.mrb[7].mxu1 }
 0x116   : > { %572 = vst [vmem:[#allocation2 + $0x10] sm:$0xff] %v1091_v53  ;;  %v588_v59 = vadd.f32 %v1091_v53, %v587_v46  ;;  %v613_v60 = vmul.f32 %v1091_v53, %v1091_v53  ;;  %v1094_v61 = vadd.f32 %v1093_v57, %v1092_v54  ;;  %580 = vst [vmem:[#allocation2 + $0x50] sm:$0xff] %v1388_v55 }
 0x117   : > { %v1118_v62 = vadd.f32 %v1117_v58, %v1116_v56  ;;  %v621_v46 = vmul.f32 %v1388_v55, %v1388_v55 }
 0x118   : > { %v628_v63 = vadd.f32 %v627_v48, %v613_v60  ;;  %573 = vst [vmem:[#allocation2 + $0x18] sm:$0xff] %v1094_v61  ;;  %v589_v0 = vadd.f32 %v1094_v61, %v588_v59  ;;  %v614_v1 = vmul.f32 %v1094_v61, %v1094_v61 }
 0x119   : > { %581 = vst [vmem:[#allocation2 + $0x58] sm:$0xff] %v1118_v62  ;;  %v622_v49 = vmul.f32 %v1118_v62, %v1118_v62 }
 0x11a   : > { %v629_v2 = vadd.f32 %v628_v63, %v614_v1  ;;  %v1095_v3 = vpop.f32.mrb[8].mxu0  ;;  %v1119_v4 = vpop.f32.mrb[8].mxu1 }
 0x11b   : > { %v1096_v5 = vpop.f32.mrb[9].mxu0  ;;  %v1120_v6 = vpop.f32.mrb[9].mxu1 }
 0x11c   : > { %v1097_v7 = vadd.f32 %v1096_v5, %v1095_v3  ;;  %v1098_v8 = vpop.f32.mrb[10].mxu0  ;;  %v1121_v9 = vadd.f32 %v1120_v6, %v1119_v4  ;;  %v1122_v10 = vpop.f32.mrb[10].mxu1 }
 0x11d   : > { %v1099_v11 = vpop.f32.mrb[11].mxu0  ;;  %v1123_v12 = vpop.f32.mrb[11].mxu1 }
 0x11e   : > { %574 = vst [vmem:[#allocation2 + $0x20] sm:$0xff] %v1097_v7  ;;  %v590_v13 = vadd.f32 %v1097_v7, %v589_v0  ;;  %v615_v14 = vmul.f32 %v1097_v7, %v1097_v7  ;;  %v1100_v15 = vadd.f32 %v1099_v11, %v1098_v8  ;;  %582 = vst [vmem:[#allocation2 + $0x60] sm:$0xff] %v1121_v9  ;;  %v586_v8 = vld [vmem:[#allocation3] sm:$0x1]  ;;  %v610_v11 = vld [vmem:[#allocation4] sm:$0x1] }
 0x11f   : > { %v1124_v16 = vadd.f32 %v1123_v12, %v1122_v10  ;;  %v623_v53 = vmul.f32 %v1121_v9, %v1121_v9 }
 0x120   : > { %v630_v17 = vadd.f32 %v629_v2, %v615_v14  ;;  %575 = vst [vmem:[#allocation2 + $0x28] sm:$0xff] %v1100_v15  ;;  %v591_v18 = vadd.f32 %v1100_v15, %v590_v13  ;;  %v616_v19 = vmul.f32 %v1100_v15, %v1100_v15 }
 0x121   : > { %583 = vst [vmem:[#allocation2 + $0x68] sm:$0xff] %v1124_v16  ;;  %v624_v57 = vmul.f32 %v1124_v16, %v1124_v16 }
 0x122   : > { %v631_v20 = vadd.f32 %v630_v17, %v616_v19  ;;  %v1101_v21 = vpop.f32.mrb[12].mxu0  ;;  %v1125_v22 = vpop.f32.mrb[12].mxu1 }
 0x123   : > { %v1102_v23 = vpop.f32.mrb[13].mxu0  ;;  %v1126_v24 = vpop.f32.mrb[13].mxu1 }
 0x124   : > { %v1103_v25 = vadd.f32 %v1102_v23, %v1101_v21  ;;  %v1104_v26 = vpop.f32.mrb[14].mxu0  ;;  %v1127_v27 = vadd.f32 %v1126_v24, %v1125_v22  ;;  %v1128_v28 = vpop.f32.mrb[14].mxu1 }
 0x125   : > { %v1105_v29 = vpop.f32.mrb[15].mxu0  ;;  %v1129_v30 = vpop.f32.mrb[15].mxu1 }
 0x126   : > { %576 = vst [vmem:[#allocation2 + $0x30] sm:$0xff] %v1103_v25  ;;  %v592_v31 = vadd.f32 %v1103_v25, %v591_v18  ;;  %v617_v32 = vmul.f32 %v1103_v25, %v1103_v25  ;;  %v1106_v33 = vadd.f32 %v1105_v29, %v1104_v26  ;;  %584 = vst [vmem:[#allocation2 + $0x70] sm:$0xff] %v1127_v27 }
 0x127   : > { %v1130_v34 = vadd.f32 %v1129_v30, %v1128_v28  ;;  %v625_v58 = vmul.f32 %v1127_v27, %v1127_v27 }
 0x128   : > { %v632_v35 = vadd.f32 %v631_v20, %v617_v32  ;;  %577 = vst [vmem:[#allocation2 + $0x38] sm:$0xff] %v1106_v33  ;;  %v593_v36 = vadd.f32 %v1106_v33, %v592_v31  ;;  %v618_v37 = vmul.f32 %v1106_v33, %v1106_v33 }
 0x129   : > { %585 = vst [vmem:[#allocation2 + $0x78] sm:$0xff] %v1130_v34  ;;  %v626_v63 = vmul.f32 %v1130_v34, %v1130_v34 }
 0x12a   : > { %v594_v40 = vadd.f32 %v1382_v39, %v593_v36  ;;  %v633_v41 = vadd.f32 %v632_v35, %v618_v37 }
 0x12c   : > { %v595_v43 = vadd.f32 %v1385_v44, %v594_v40  ;;  %v634_v45 = vadd.f32 %v633_v41, %v619_v38 }
 0x12e   : > { %v635_v47 = vadd.f32 %v634_v45, %v620_v42  ;;  %v596_v48 = vadd.f32 %v1388_v55, %v595_v43 }
 0x130   : > { %v597_v50 = vadd.f32 %v1118_v62, %v596_v48  ;;  %v636_v51 = vadd.f32 %v635_v47, %v621_v46 }
 0x132   : > { %v598_v52 = vadd.f32 %v1121_v9, %v597_v50  ;;  %v637_v54 = vadd.f32 %v636_v51, %v622_v49 }
 0x134   : > { %v638_v39 = vadd.f32 %v637_v54, %v623_v53  ;;  %v599_v56 = vadd.f32 %v1124_v16, %v598_v52 }
 0x136   : > { %v639_v59 = vadd.f32 %v638_v39, %v624_v57  ;;  %v600_v60 = vadd.f32 %v1127_v27, %v599_v56 }
 0x138   : > { %v640_v44 = vadd.f32 %v639_v59, %v625_v58  ;;  %v601_v61 = vadd.f32 %v1130_v34, %v600_v60 }
 0x13a   : > { %v602_v0 = vrot.slane %v601_v61, 4  ;;  %v641_v1 = vadd.f32 %v640_v44, %v626_v63 }
 0x13c   : > { %v603_v2 = vadd.f32 %v602_v0, %v601_v61  ;;  %v642_v3 = vrot.slane %v641_v1, 4 }
 0x13e   : > { %v604_v55 = vrot.slane %v603_v2, 2  ;;  %v643_v4 = vadd.f32 %v642_v3, %v641_v1 }
 0x140   : > { %v605_v62 = vadd.f32 %v604_v55, %v603_v2  ;;  %v644_v5 = vrot.slane %v643_v4, 2 }
 0x142   : > { %v606_v6 = vrot.slane %v605_v62, 1  ;;  %v645_v7 = vadd.f32 %v644_v5, %v643_v4 }
 0x144   : > { %v607_v9 = vadd.f32 %v606_v6, %v605_v62  ;;  %v646_v10 = vrot.slane %v645_v7, 1 }
 0x146   : > { %v608_v12 = vadd.f32 %v607_v9, %v586_v8  ;;  %v647_v13 = vadd.f32 %v646_v10, %v645_v7 }
 0x148   : > { %609 = vst [vmem:[#allocation3] sm:$0x1] %v608_v12  ;;  %v648_v14 = vadd.f32 %v647_v13, %v610_v11 }
 0x14a   : > { %649 = vst [vmem:[#allocation4] sm:$0x1] %v648_v14 }
 0x14b PF: > { %p650_p6 = scmp.eq.s32.totalorder %s1228_s15, 1 }
 0x14c   : > { %v662_v23 = vld [vmem:[%s1479_s2] sm:$0x1] (%p650_p6) }
 0x14d   : > { %654 = sbr.rel (!%p650_p6) target bundleno = 364 (0x16c), region = 48  ;;  %v667_v26 = vld [vmem:[%s1480_s3] sm:$0x1] (%p650_p6) }
 0x14f   : > { %v655_v15 = vld [vmem:[#allocation3] sm:$0x1] (%p650_p6) }
 0x150   : > { %v656_v17 = vmul.f32 (%p650_p6), 0.0078125, %v655_v15 }
 0x151   : > { %v657_v16 = vld [vmem:[#allocation4] sm:$0x1] (%p650_p6) }
 0x152   : > { %v658_v18 = vmul.f32 (%p650_p6), 0.0078125, %v657_v16  ;;  %v659_v19 = vmul.f32 (%p650_p6), %v656_v17, %v656_v17 }
 0x154   : > { %v660_v20 = vsub.f32 %v658_v18, %v659_v19 }
 0x156   : > { %v661_v21 = vmax.f32 %v660_v20, 0.0 }
 0x158   : > { %v663_v22 = vadd.f32 1e-05, %v661_v21 }
 0x15a   : > { %1212 = vrsqrt.f32 %v663_v22 }
 0x164   : > { %v1213_v24 = vpop.eup %1212 }
 0x165   : > { %v665_v25 = vmul.f32 %v1213_v24, %v662_v23 }
 0x167   : > { %666 = vst [vmem:[#allocation5] sm:$0x1] %v665_v25  ;;  %v668_v27 = vmul.f32 %v665_v25, %v656_v17 }
 0x169   : > { %v669_v28 = vsub.f32 %v667_v26, %v668_v27 }
 0x16b   : > { %670 = vst [vmem:[#allocation6] sm:$0x1] %v669_v28 }
 0x16c PF: > { %p979_p7 = scmp.ne.s32.totalorder %s1228_s15, 1 }
 0x16d   : > { %v676_v29 = vld [vmem:[#allocation2] sm:$0xff] (!%p979_p7)  ;;  %v677_v30 = vld [vmem:[#allocation2 + $0x8] sm:$0xff] (!%p979_p7)  ;;  %v678_v35 = vld [vmem:[#allocation2 + $0x10] sm:$0xff] (!%p979_p7) }
 0x16e   : > { %673 = sbr.rel (%p979_p7) target bundleno = 395 (0x18b), region = 52  ;;  %v1408_v31 = vld [vmem:[#allocation5] ss:$0 sm:$0xff] (!%p979_p7)  ;;  %v679_v36 = vld [vmem:[#allocation2 + $0x18] sm:$0xff] (!%p979_p7)  ;;  %v681_v41 = vld [vmem:[#allocation2 + $0x28] sm:$0xff] (!%p979_p7) }
 0x16f   : > { %v699_v32 = vmul.f32 (!%p979_p7), %v1408_v31, %v676_v29  ;;  %v700_v33 = vmul.f32 (!%p979_p7), %v1408_v31, %v677_v30  ;;  %v701_v37 = vmul.f32 (!%p979_p7), %v1408_v31, %v678_v35  ;;  %v702_v38 = vmul.f32 (!%p979_p7), %v1408_v31, %v679_v36  ;;  %v680_v40 = vld [vmem:[#allocation2 + $0x20] sm:$0xff] (!%p979_p7)  ;;  %v682_v42 = vld [vmem:[#allocation2 + $0x30] sm:$0xff] (!%p979_p7)  ;;  %v683_v48 = vld [vmem:[#allocation2 + $0x38] sm:$0xff] (!%p979_p7) }
 0x170   : > { %v703_v46 = vmul.f32 (!%p979_p7), %v1408_v31, %v680_v40  ;;  %v704_v47 = vmul.f32 (!%p979_p7), %v1408_v31, %v681_v41  ;;  %v705_v51 = vmul.f32 (!%p979_p7), %v1408_v31, %v682_v42  ;;  %v706_v52 = vmul.f32 (!%p979_p7), %v1408_v31, %v683_v48  ;;  %v684_v1 = vld [vmem:[#allocation2 + $0x40] sm:$0xff] (!%p979_p7)  ;;  %v685_v2 = vld [vmem:[#allocation2 + $0x48] sm:$0xff] (!%p979_p7)  ;;  %v686_v3 = vld [vmem:[#allocation2 + $0x50] sm:$0xff] (!%p979_p7) }
 0x171   : > { %v687_v7 = vld [vmem:[#allocation2 + $0x58] sm:$0xff] (!%p979_p7)  ;;  %v707_v9 = vmul.f32 (!%p979_p7), %v1408_v31, %v684_v1  ;;  %v708_v10 = vmul.f32 (!%p979_p7), %v1408_v31, %v685_v2  ;;  %v709_v11 = vmul.f32 (!%p979_p7), %v1408_v31, %v686_v3  ;;  %v688_v12 = vld [vmem:[#allocation2 + $0x60] sm:$0xff] (!%p979_p7)  ;;  %v689_v13 = vld [vmem:[#allocation2 + $0x68] sm:$0xff] (!%p979_p7) }
 0x172   : > { %v1412_v34 = vld [vmem:[#allocation6] ss:$0 sm:$0xff] (!%p979_p7)  ;;  %v710_v20 = vmul.f32 (!%p979_p7), %v1408_v31, %v687_v7  ;;  %v711_v23 = vmul.f32 (!%p979_p7), %v1408_v31, %v688_v12  ;;  %v712_v24 = vmul.f32 (!%p979_p7), %v1408_v31, %v689_v13  ;;  %v690_v25 = vld [vmem:[#allocation2 + $0x70] sm:$0xff] (!%p979_p7)  ;;  %v691_v36 = vld [vmem:[#allocation2 + $0x78] sm:$0xff] (!%p979_p7) }
 0x173   : > { %v722_v43 = vadd.f32 (!%p979_p7), %v1412_v34, %v699_v32  ;;  %v723_v45 = vadd.f32 (!%p979_p7), %v1412_v34, %v700_v33  ;;  %v724_v49 = vadd.f32 (!%p979_p7), %v1412_v34, %v701_v37  ;;  %v725_v50 = vadd.f32 (!%p979_p7), %v1412_v34, %v702_v38 }
 0x174   : > { %v726_v59 = vadd.f32 (!%p979_p7), %v1412_v34, %v703_v46  ;;  %v727_v60 = vadd.f32 (!%p979_p7), %v1412_v34, %v704_v47  ;;  %v728_v0 = vadd.f32 (!%p979_p7), %v1412_v34, %v705_v51  ;;  %v729_v5 = vadd.f32 (!%p979_p7), %v1412_v34, %v706_v52 }
 0x175   : > { %vm738_vm0 = vcmp.ge.f32.partialorder %v722_v43, 0.0  ;;  %vm739_vm1 = vcmp.ge.f32.partialorder %v723_v45, 0.0  ;;  %v754_v53 = vmul.f32 0.2, %v722_v43  ;;  %v755_v54 = vmul.f32 0.2, %v723_v45 }
 0x176   : > { %vm740_vm2 = vcmp.ge.f32.partialorder %v724_v49, 0.0  ;;  %vm741_vm3 = vcmp.ge.f32.partialorder %v725_v50, 0.0  ;;  %v756_v39 = vmul.f32 0.2, %v724_v49  ;;  %v757_v56 = vmul.f32 0.2, %v725_v50 }
 0x177   : > { %v770_v57 = vsel %vm738_vm0, %v722_v43, %v754_v53  ;;  %v771_v58 = vsel %vm739_vm1, %v723_v45, %v755_v54  ;;  %vm742_vm4 = vcmp.ge.f32.partialorder %v726_v59, 0.0  ;;  %vm743_vm5 = vcmp.ge.f32.partialorder %v727_v60, 0.0 }
 0x178   : > { %v1023_v44 = vpack.c.bf16 %v771_v58, %v770_v57  ;;  %v772_v61 = vsel %vm740_vm2, %v724_v49, %v756_v39  ;;  %v773_v63 = vsel %vm741_vm3, %v725_v50, %v757_v56  ;;  %v758_v4 = vmul.f32 0.2, %v726_v59 }
 0x179   : > { %v1028_v55 = vpack.c.bf16 %v773_v63, %v772_v61  ;;  %v759_v62 = vmul.f32 0.2, %v727_v60  ;;  %vm744_vm6 = vcmp.ge.f32.partialorder %v728_v0, 0.0  ;;  %v760_v6 = vmul.f32 0.2, %v728_v0 }
 0x17a   : > { %1024 = vst [vmem:[%s1481_s4] sm:$0xff] %v1023_v44   ;;  %v774_v8 = vsel %vm742_vm4, %v726_v59, %v758_v4  ;;  %vm745_vm7 = vcmp.ge.f32.partialorder %v729_v5, 0.0  ;;  %v761_v15 = vmul.f32 0.2, %v729_v5  ;;  %v730_v18 = vadd.f32 %v1412_v34, %v707_v9 }
 0x17b   : > { %1060 = vst [vmem:[%s1481_s4 + $0x8] sm:$0xff] %v1028_v55   ;;  %v775_v14 = vsel %vm743_vm5, %v727_v60, %v759_v62  ;;  %v776_v16 = vsel %vm744_vm6, %v728_v0, %v760_v6  ;;  %v731_v19 = vadd.f32 %v1412_v34, %v708_v10  ;;  %v732_v22 = vadd.f32 %v1412_v34, %v709_v11 }
 0x17c   : > { %v1033_v17 = vpack.c.bf16 %v775_v14, %v774_v8  ;;  %v777_v21 = vsel %vm745_vm7, %v729_v5, %v761_v15  ;;  %vm746_vm8 = vcmp.ge.f32.partialorder %v730_v18, 0.0  ;;  %v762_v27 = vmul.f32 0.2, %v730_v18 }
 0x17d   : > { %v1038_v26 = vpack.c.bf16 %v777_v21, %v776_v16  ;;  %vm747_vm9 = vcmp.ge.f32.partialorder %v731_v19, 0.0  ;;  %v763_v28 = vmul.f32 0.2, %v731_v19  ;;  %v733_v29 = vadd.f32 %v1412_v34, %v710_v20 }
 0x17e   : > { %1061 = vst [vmem:[%s1481_s4 + $0x10] sm:$0xff] %v1033_v17   ;;  %vm748_vm10 = vcmp.ge.f32.partialorder %v732_v22, 0.0  ;;  %v764_v30 = vmul.f32 0.2, %v732_v22  ;;  %v778_v32 = vsel %vm746_vm8, %v730_v18, %v762_v27  ;;  %v734_v33 = vadd.f32 %v1412_v34, %v711_v23 }
 0x17f   : > { %1062 = vst [vmem:[%s1481_s4 + $0x18] sm:$0xff] %v1038_v26   ;;  %v735_v35 = vadd.f32 %v1412_v34, %v712_v24  ;;  %v713_v37 = vmul.f32 %v1408_v31, %v690_v25  ;;  %v779_v38 = vsel %vm747_vm9, %v731_v19, %v763_v28  ;;  %vm749_vm11 = vcmp.ge.f32.partialorder %v733_v29, 0.0 }
 0x180   : > { %v765_v40 = vmul.f32 0.2, %v733_v29  ;;  %v780_v41 = vsel %vm748_vm10, %v732_v22, %v764_v30  ;;  %v1043_v42 = vpack.c.bf16 %v779_v38, %v778_v32  ;;  %vm750_vm12 = vcmp.ge.f32.partialorder %v734_v33, 0.0 }
 0x181   : > { %vm751_vm13 = vcmp.ge.f32.partialorder %v735_v35, 0.0  ;;  %v766_v43 = vmul.f32 0.2, %v734_v33  ;;  %v767_v46 = vmul.f32 0.2, %v735_v35  ;;  %v714_v47 = vmul.f32 %v1408_v31, %v691_v36 }
 0x182   : > { %v781_v45 = vsel %vm749_vm11, %v733_v29, %v765_v40  ;;  %v736_v48 = vadd.f32 %v1412_v34, %v713_v37  ;;  %1063 = vst [vmem:[%s1481_s4 + $0x20] sm:$0xff] %v1043_v42  }
 0x183   : > { %v1048_v49 = vpack.c.bf16 %v781_v45, %v780_v41  ;;  %v782_v50 = vsel %vm750_vm12, %v734_v33, %v766_v43  ;;  %v783_v51 = vsel %vm751_vm13, %v735_v35, %v767_v46  ;;  %v737_v52 = vadd.f32 %v1412_v34, %v714_v47 }
 0x184   : > { %vm752_vm14 = vcmp.ge.f32.partialorder %v736_v48, 0.0  ;;  %v768_v53 = vmul.f32 0.2, %v736_v48  ;;  %v1053_v54 = vpack.c.bf16 %v783_v51, %v782_v50 }
 0x185   : > { %1064 = vst [vmem:[%s1481_s4 + $0x28] sm:$0xff] %v1048_v49   ;;  %vm753_vm15 = vcmp.ge.f32.partialorder %v737_v52, 0.0  ;;  %v769_v31 = vmul.f32 0.2, %v737_v52 }
 0x186   : > { %v784_v39 = vsel %vm752_vm14, %v736_v48, %v768_v53  ;;  %1065 = vst [vmem:[%s1481_s4 + $0x30] sm:$0xff] %v1053_v54  }
 0x187   : > { %v785_v56 = vsel %vm753_vm15, %v737_v52, %v769_v31 }
 0x188   : > { %v1058_v57 = vpack.c.bf16 %v785_v56, %v784_v39 }
 0x18a   : > { %1066 = vst [vmem:[%s1481_s4 + $0x38] sm:$0xff] %v1058_v57  }
 0x18b PF: > { %s14_s17 = sadd.s32 1, %s1236_s17   ;;  %s1482_s15 = smov %s1232_s16 }
 0x18c   : > { %p11_p8 = scmp.ge.s32.totalorder %s14_s17, 4   ;;  %s1483_s16 = smov %s1485_s18 }
 0x18e   :  { %13 = sbr.rel (!%p11_p8) target bundleno = 2 (0x2), region = 84 }

// kernel: discriminator_forward.7
= control target key start
LH: loop header
LB: loop body
LE: loop exit
PB: predicated region body
PF: predicated region fallthrough
CT: control target
= control target key end

     0   :  { %s1093_s15 = smov 0   ;;  %s1095_s16 = smov 0   ;;  %s1258_s0 = inlined_call_operand.vmem [shape: bf16[32,512], index: 0, kind: input, shape index: {}]   ;;  %s1259_s1 = inlined_call_operand.vmem [shape: bf16[512,128], index: 1, kind: input, shape index: {}]   ;;  %s1260_s2 = inlined_call_operand.vmem [shape: f32[1,128], index: 2, kind: input, shape index: {}]   ;;  %s1261_s3 = inlined_call_operand.vmem [shape: f32[1,128], index: 3, kind: input, shape index: {}]   ;;  %s1262_s4 = inlined_call_operand.vmem [shape: bf16[32,128], index: 4, kind: output, shape index: {}]  }
   0x1   :  { %s1097_s17 = smov 0  }
   0x2 LB: > { %s26_s18 = sadd.s32 1, %s1061_s16  ;;  %p844_p0 = scmp.ge.s32.totalorder %s1065_s17, 1  ;;  %s1065_s17 = sphi %s1097_s17, %s14_s17   ;;  %s1061_s16 = sphi %s1095_s16, %s1264_s16   ;;  %s1057_s15 = sphi %s1093_s15, %s1263_s15  }
   0x3   : > { %p28_p1 = scmp.ge.s32.totalorder %s26_s18, 2  ;;  %p186_p2 = scmp.lt.s32.totalorder %s1065_s17, 3 }
   0x5   : > { %s1266_s18 = smov (%p28_p1, %s26_s18), 0  ;;  %p187_p3 = pnand %p844_p0, %p186_p2 }
   0x6   : > { %p236_p4 = scmp.eq.s32.totalorder (!%p187_p3), %s1057_s15, 0 }
   0x7   : > { %190 = sbr.rel (%p187_p3) target bundleno = 352 (0x160), region = 36 }
   0xe   : > { %241 = sbr.rel (!%p236_p4) target bundleno = 21 (0x15), region = 40  ;;  %v1067_v0 = vmov (%p236_p4), 0.0  }
   0xf   : > { %242 = vst [vmem:[#allocation3] sm:$0x1] (%p236_p4), %v1067_v0  ;;  %243 = vst [vmem:[#allocation4] sm:$0x1] (%p236_p4), %v1067_v0 }
  0x15 PF: > { %p846_p5 = scmp.ne.s32.totalorder %s1057_s15, 0 }
  0x16   : > { %v997_v1 = vld [vmem:[%s1259_s1 + $0x40] sm:$0xff] (!%p846_p5)   ;;  %v1001_v5 = vld [vmem:[%s1259_s1 + $0x48] sm:$0xff] (!%p846_p5)   ;;  %v1005_v9 = vld [vmem:[%s1259_s1 + $0x50] sm:$0xff] (!%p846_p5)  }
  0x17   : > { %246 = sbr.rel (%p846_p5) target bundleno = 303 (0x12f), region = 44  ;;  %v998_v2 = vld [vmem:[%s1259_s1 + $0xc0] sm:$0xff] (!%p846_p5)   ;;  %916 = vmatprep.subr.bf16.mxu0 (!%p846_p5), %v997_v1  ;;  %v1002_v6 = vld [vmem:[%s1259_s1 + $0xc8] sm:$0xff] (!%p846_p5)   ;;  %v1006_v10 = vld [vmem:[%s1259_s1 + $0xd0] sm:$0xff] (!%p846_p5)  }
  0x18   : > { %v999_v3 = vld [vmem:[%s1259_s1] sm:$0xff] (!%p846_p5)   ;;  %944 = vmatprep.subr.bf16.mxu1 (!%p846_p5), %v998_v2  ;;  %v1003_v7 = vld [vmem:[%s1259_s1 + $0x8] sm:$0xff] (!%p846_p5)   ;;  %v1007_v11 = vld [vmem:[%s1259_s1 + $0x10] sm:$0xff] (!%p846_p5)  }
  0x19   : > { %v1000_v4 = vld [vmem:[%s1259_s1 + $0x80] sm:$0xff] (!%p846_p5)   ;;  %917 = vmatpush3.bf16.msra.mxu0 (!%p846_p5), %v999_v3  ;;  %v1004_v8 = vld [vmem:[%s1259_s1 + $0x88] sm:$0xff] (!%p846_p5)   ;;  %v1008_v12 = vld [vmem:[%s1259_s1 + $0x90] sm:$0xff] (!%p846_p5)  }
  0x1a   : > { %945 = vmatpush3.bf16.msra.mxu1 (!%p846_p5), %v1000_v4  ;;  %918 = vmatprep.subr.bf16.mxu0 (!%p846_p5), %v1001_v5  ;;  %v1009_v13 = vld [vmem:[%s1259_s1 + $0x58] sm:$0xff] (!%p846_p5)   ;;  %v1013_v17 = vld [vmem:[%s1259_s1 + $0x60] sm:$0xff] (!%p846_p5)   ;;  %v1017_v21 = vld [vmem:[%s1259_s1 + $0x68] sm:$0xff] (!%p846_p5)  }
  0x1b   : > { %946 = vmatprep.subr.bf16.mxu1 (!%p846_p5), %v1002_v6  ;;  %v1010_v14 = vld [vmem:[%s1259_s1 + $0xd8] sm:$0xff] (!%p846_p5)   ;;  %v1014_v18 = vld [vmem:[%s1259_s1 + $0xe0] sm:$0xff] (!%p846_p5)   ;;  %v1018_v22 = vld [vmem:[%s1259_s1 + $0xe8] sm:$0xff] (!%p846_p5)  }
  0x1c   : > { %v1011_v15 = vld [vmem:[%s1259_s1 + $0x18] sm:$0xff] (!%p846_p5)   ;;  %v1015_v19 = vld [vmem:[%s1259_s1 + $0x20] sm:$0xff] (!%p846_p5)   ;;  %v1019_v23 = vld [vmem:[%s1259_s1 + $0x28] sm:$0xff] (!%p846_p5)  }
  0x1d   : > { %919 = vmatpush3.bf16.msra.mxu0 (!%p846_p5), %v1003_v7  ;;  %v1012_v16 = vld [vmem:[%s1259_s1 + $0x98] sm:$0xff] (!%p846_p5)   ;;  %v1016_v20 = vld [vmem:[%s1259_s1 + $0xa0] sm:$0xff] (!%p846_p5)   ;;  %v1020_v24 = vld [vmem:[%s1259_s1 + $0xa8] sm:$0xff] (!%p846_p5)  }
  0x1e   : > { %947 = vmatpush3.bf16.msra.mxu1 %v1004_v8  ;;  %920 = vmatprep.subr.bf16.mxu0 %v1005_v9  ;;  %v1021_v25 = vld [vmem:[%s1259_s1 + $0x70] sm:$0xff]   ;;  %v1025_v29 = vld [vmem:[%s1259_s1 + $0x78] sm:$0xff]  }
  0x1f   : > { %948 = vmatprep.subr.bf16.mxu1 %v1006_v10  ;;  %v1022_v26 = vld [vmem:[%s1259_s1 + $0xf0] sm:$0xff]   ;;  %v1026_v30 = vld [vmem:[%s1259_s1 + $0xf8] sm:$0xff]  }
  0x20   : > { %v1023_v27 = vld [vmem:[%s1259_s1 + $0x30] sm:$0xff]   ;;  %v1027_v31 = vld [vmem:[%s1259_s1 + $0x38] sm:$0xff]  }
  0x21   : > { %921 = vmatpush3.bf16.msra.mxu0 %v1007_v11  ;;  %v1024_v28 = vld [vmem:[%s1259_s1 + $0xb0] sm:$0xff]   ;;  %v1028_v32 = vld [vmem:[%s1259_s1 + $0xb8] sm:$0xff]  }
  0x22   : > { %949 = vmatpush3.bf16.msra.mxu1 %v1008_v12  ;;  %922 = vmatprep.subr.bf16.mxu0 %v1009_v13  ;;  %v1029_v33 = vld [vmem:[%s1258_s0] ss:$16 sps:$4 sm:$0xff]   ;;  %v1031_v34 = vld [vmem:[%s1258_s0 + $0x4] ss:$16 sps:$4 sm:$0xff]   ;;  %v1032_v35 = vld [vmem:[%s1258_s0 + $0x8] ss:$16 sps:$4 sm:$0xff]  }
  0x23   : > { %950 = vmatprep.subr.bf16.mxu1 %v1010_v14  ;;  %v1034_v36 = vld [vmem:[%s1258_s0 + $0xc] ss:$16 sps:$4 sm:$0xff]   ;;  %583 = vmatprep.mubr.bf16.mxu0 %v1031_v34  ;;  %v1035_v37 = vld [vmem:[%s1258_s0 + $0x24] ss:$16 sps:$4 sm:$0xff]   ;;  %v1039_v39 = vld [vmem:[%s1258_s0 + $0x20] ss:$16 sps:$4 sm:$0xff]  }
  0x24   : > { %632 = vmatprep.mubr.bf16.mxu1 %v1034_v36  ;;  %v1037_v38 = vld [vmem:[%s1258_s0 + $0x2c] ss:$16 sps:$4 sm:$0xff]   ;;  %v1040_v40 = vld [vmem:[%s1258_s0 + $0x28] ss:$16 sps:$4 sm:$0xff]  }
  0x25   : > { %923 = vmatpush3.bf16.msra.mxu0 %v1011_v15 }
  0x26   : > { %951 = vmatpush3.bf16.msra.mxu1 %v1012_v16  ;;  %924 = vmatprep.subr.bf16.mxu0 %v1013_v17 }
  0x27   : > { %952 = vmatprep.subr.bf16.mxu1 %v1014_v18 }
  0x29   : > { %925 = vmatpush3.bf16.msra.mxu0 %v1015_v19 }
  0x2a   : > { %953 = vmatpush3.bf16.msra.mxu1 %v1016_v20  ;;  %926 = vmatprep.subr.bf16.mxu0 %v1017_v21 }
  0x2b   : > { %954 = vmatprep.subr.bf16.mxu1 %v1018_v22 }
  0x2d   : > { %927 = vmatpush3.bf16.msra.mxu0 %v1019_v23 }
  0x2e   : > { %955 = vmatpush3.bf16.msra.mxu1 %v1020_v24  ;;  %928 = vmatprep.subr.bf16.mxu0 %v1021_v25  ;;  %v655_v24 = vld [vmem:[#allocation3] sm:$0x1] }
  0x2f   : > { %956 = vmatprep.subr.bf16.mxu1 %v1022_v26 }
  0x31   : > { %929 = vmatpush3.bf16.msra.mxu0 %v1023_v27  ;;  %v667_v27 = vld [vmem:[#allocation4] sm:$0x1] }
  0x32   : > { %957 = vmatpush3.bf16.msra.mxu1 %v1024_v28  ;;  %930 = vmatprep.subr.bf16.mxu0 %v1025_v29 }
  0x33   : > { %958 = vmatprep.subr.bf16.mxu1 %v1026_v30 }
  0x35   : > { %931 = vmatpush3.bf16.msra.mxu0 %v1027_v31 }
  0x36   : > { %959 = vmatpush3.bf16.msra.mxu1 %v1028_v32 }
  0x38   : > { %584 = vmatmul.mubr.bf16.vlgmr.msra.gmra.mrb[0].mxu0 %v1029_v33 }
  0x39   : > { %633 = vmatmul.mubr.bf16.vlgmr.msra.gmra.mrb[0].mxu1 %v1032_v35  ;;  %591 = vmatprep.mubr.bf16.mxu0 %v1035_v37 }
  0x3a   : > { %640 = vmatprep.mubr.bf16.mxu1 %v1037_v38 }
  0x40   : > { %592 = vmatmul.mubr.bf16.gmra.mrb[4].mxu0 %v1039_v39 }
  0x41   : > { %641 = vmatmul.mubr.bf16.gmra.mrb[4].mxu1 %v1040_v40 }
 0x10b   : > { %v932_v41 = vpop.f32.mrb[0].mxu0 }
 0x10c   : > { %v960_v42 = vpop.f32.mrb[0].mxu1  ;;  %v933_v43 = vpop.f32.mrb[1].mxu0 }
 0x10d   : > { %v934_v44 = vadd.f32 %v933_v43, %v932_v41  ;;  %v961_v45 = vpop.f32.mrb[1].mxu1  ;;  %v935_v46 = vpop.f32.mrb[2].mxu0 }
 0x10e   : > { %v962_v47 = vadd.f32 %v961_v45, %v960_v42  ;;  %v963_v48 = vpop.f32.mrb[2].mxu1  ;;  %v936_v49 = vpop.f32.mrb[3].mxu0 }
 0x10f   : > { %v937_v50 = vadd.f32 %v936_v49, %v935_v46  ;;  %v964_v51 = vpop.f32.mrb[3].mxu1 }
 0x110   : > { %v635_v52 = vadd.f32 %v962_v47, %v934_v44  ;;  %v965_v53 = vadd.f32 %v964_v51, %v963_v48 }
 0x112   : > { %651 = vst [vmem:[#allocation2] sm:$0xff] %v635_v52  ;;  %v638_v54 = vadd.f32 %v965_v53, %v937_v50  ;;  %v668_v56 = vmul.f32 %v635_v52, %v635_v52 }
 0x113   : > { %v938_v55 = vpop.f32.mrb[4].mxu0 }
 0x114   : > { %652 = vst [vmem:[#allocation2 + $0x8] sm:$0xff] %v638_v54  ;;  %v656_v57 = vadd.f32 %v638_v54, %v635_v52  ;;  %v669_v58 = vmul.f32 %v638_v54, %v638_v54  ;;  %v966_v59 = vpop.f32.mrb[4].mxu1  ;;  %v939_v60 = vpop.f32.mrb[5].mxu0 }
 0x115   : > { %v940_v61 = vadd.f32 %v939_v60, %v938_v55  ;;  %v967_v62 = vpop.f32.mrb[5].mxu1  ;;  %v941_v63 = vpop.f32.mrb[6].mxu0 }
 0x116   : > { %v672_v0 = vadd.f32 %v669_v58, %v668_v56  ;;  %v968_v1 = vadd.f32 %v967_v62, %v966_v59  ;;  %v969_v2 = vpop.f32.mrb[6].mxu1  ;;  %v942_v3 = vpop.f32.mrb[7].mxu0 }
 0x117   : > { %v943_v4 = vadd.f32 %v942_v3, %v941_v63  ;;  %v970_v5 = vpop.f32.mrb[7].mxu1 }
 0x118   : > { %v643_v6 = vadd.f32 %v968_v1, %v940_v61  ;;  %v971_v7 = vadd.f32 %v970_v5, %v969_v2 }
 0x11a   : > { %653 = vst [vmem:[#allocation2 + $0x10] sm:$0xff] %v643_v6  ;;  %v657_v8 = vadd.f32 %v656_v57, %v643_v6  ;;  %v670_v9 = vmul.f32 %v643_v6, %v643_v6  ;;  %v646_v10 = vadd.f32 %v971_v7, %v943_v4 }
 0x11c   : > { %v673_v11 = vadd.f32 %v672_v0, %v670_v9  ;;  %654 = vst [vmem:[#allocation2 + $0x18] sm:$0xff] %v646_v10  ;;  %v658_v12 = vadd.f32 %v657_v8, %v646_v10  ;;  %v671_v13 = vmul.f32 %v646_v10, %v646_v10 }
 0x11e   : > { %v659_v14 = vrot.slane %v658_v12, 4  ;;  %v674_v15 = vadd.f32 %v673_v11, %v671_v13 }
 0x120   : > { %v660_v16 = vadd.f32 %v659_v14, %v658_v12  ;;  %v675_v17 = vrot.slane %v674_v15, 4 }
 0x122   : > { %v661_v18 = vrot.slane %v660_v16, 2  ;;  %v676_v19 = vadd.f32 %v675_v17, %v674_v15 }
 0x124   : > { %v662_v20 = vadd.f32 %v661_v18, %v660_v16  ;;  %v677_v21 = vrot.slane %v676_v19, 2 }
 0x126   : > { %v663_v22 = vrot.slane %v662_v20, 1  ;;  %v678_v23 = vadd.f32 %v677_v21, %v676_v19 }
 0x128   : > { %v664_v25 = vadd.f32 %v663_v22, %v662_v20  ;;  %v679_v26 = vrot.slane %v678_v23, 1 }
 0x12a   : > { %v665_v28 = vadd.f32 %v664_v25, %v655_v24  ;;  %v680_v29 = vadd.f32 %v679_v26, %v678_v23 }
 0x12c   : > { %666 = vst [vmem:[#allocation3] sm:$0x1] %v665_v28  ;;  %v681_v30 = vadd.f32 %v680_v29, %v667_v27 }
 0x12e   : > { %682 = vst [vmem:[#allocation4] sm:$0x1] %v681_v30 }
 0x12f PF: > { %p683_p6 = scmp.eq.s32.totalorder %s1057_s15, 1 }
 0x130   : > { %v695_v39 = vld [vmem:[%s1260_s2] sm:$0x1] (%p683_p6) }
 0x131   : > { %687 = sbr.rel (!%p683_p6) target bundleno = 336 (0x150), region = 48  ;;  %v700_v42 = vld [vmem:[%s1261_s3] sm:$0x1] (%p683_p6) }
 0x133   : > { %v688_v31 = vld [vmem:[#allocation3] sm:$0x1] (%p683_p6) }
 0x134   : > { %v689_v33 = vmul.f32 (%p683_p6), 0.03125, %v688_v31 }
 0x135   : > { %v690_v32 = vld [vmem:[#allocation4] sm:$0x1] (%p683_p6) }
 0x136   : > { %v691_v34 = vmul.f32 (%p683_p6), 0.03125, %v690_v32  ;;  %v692_v35 = vmul.f32 (%p683_p6), %v689_v33, %v689_v33 }
 0x138   : > { %v693_v36 = vsub.f32 %v691_v34, %v692_v35 }
 0x13a   : > { %v694_v37 = vmax.f32 %v693_v36, 0.0 }
 0x13c   : > { %v696_v38 = vadd.f32 1e-05, %v694_v37 }
 0x13e   : > { %1041 = vrsqrt.f32 %v696_v38 }
 0x148   : > { %v1042_v40 = vpop.eup %1041 }
 0x149   : > { %v698_v41 = vmul.f32 %v1042_v40, %v695_v39 }
 0x14b   : > { %699 = vst [vmem:[#allocation5] sm:$0x1] %v698_v41  ;;  %v701_v43 = vmul.f32 %v698_v41, %v689_v33 }
 0x14d   : > { %v702_v44 = vsub.f32 %v700_v42, %v701_v43 }
 0x14f   : > { %703 = vst [vmem:[#allocation6] sm:$0x1] %v702_v44 }
 0x150 PF: > { %p888_p7 = scmp.ne.s32.totalorder %s1057_s15, 1 }
 0x151   : > { %v709_v45 = vld [vmem:[#allocation2] sm:$0xff] (!%p888_p7)  ;;  %v710_v46 = vld [vmem:[#allocation2 + $0x8] sm:$0xff] (!%p888_p7)  ;;  %v711_v51 = vld [vmem:[#allocation2 + $0x10] sm:$0xff] (!%p888_p7) }
 0x152   : > { %706 = sbr.rel (%p888_p7) target bundleno = 352 (0x160), region = 52  ;;  %v889_v47 = vld [vmem:[#allocation5] ss:$0 sm:$0xff] (!%p888_p7)  ;;  %v712_v52 = vld [vmem:[#allocation2 + $0x18] sm:$0xff] (!%p888_p7) }
 0x153   : > { %v720_v48 = vmul.f32 (!%p888_p7), %v889_v47, %v709_v45  ;;  %v721_v49 = vmul.f32 (!%p888_p7), %v889_v47, %v710_v46  ;;  %v722_v53 = vmul.f32 (!%p888_p7), %v889_v47, %v711_v51  ;;  %v723_v54 = vmul.f32 (!%p888_p7), %v889_v47, %v712_v52 }
 0x156   : > { %v890_v50 = vld [vmem:[#allocation6] ss:$0 sm:$0xff] (!%p888_p7) }
 0x157   : > { %v731_v55 = vadd.f32 (!%p888_p7), %v890_v50, %v720_v48  ;;  %v732_v56 = vadd.f32 (!%p888_p7), %v890_v50, %v721_v49  ;;  %v733_v57 = vadd.f32 (!%p888_p7), %v890_v50, %v722_v53  ;;  %v734_v58 = vadd.f32 (!%p888_p7), %v890_v50, %v723_v54 }
 0x159   : > { %vm735_vm0 = vcmp.ge.f32.partialorder %v731_v55, 0.0  ;;  %vm736_vm1 = vcmp.ge.f32.partialorder %v732_v56, 0.0  ;;  %v739_v59 = vmul.f32 0.2, %v731_v55  ;;  %v740_v60 = vmul.f32 0.2, %v732_v56 }
 0x15a   : > { %vm737_vm2 = vcmp.ge.f32.partialorder %v733_v57, 0.0  ;;  %vm738_vm3 = vcmp.ge.f32.partialorder %v734_v58, 0.0  ;;  %v741_v61 = vmul.f32 0.2, %v733_v57  ;;  %v742_v62 = vmul.f32 0.2, %v734_v58 }
 0x15b   : > { %v743_v63 = vsel %vm735_vm0, %v731_v55, %v739_v59  ;;  %v744_v0 = vsel %vm736_vm1, %v732_v56, %v740_v60 }
 0x15c   : > { %v908_v1 = vpack.c.bf16 %v744_v0, %v743_v63  ;;  %v745_v2 = vsel %vm737_vm2, %v733_v57, %v741_v61  ;;  %v746_v3 = vsel %vm738_vm3, %v734_v58, %v742_v62 }
 0x15d   : > { %v913_v4 = vpack.c.bf16 %v746_v3, %v745_v2 }
 0x15e   : > { %909 = vst [vmem:[%s1262_s4] sm:$0xff] %v908_v1  }
 0x15f   : > { %915 = vst [vmem:[%s1262_s4 + $0x8] sm:$0xff] %v913_v4  }
 0x160 PF: > { %s14_s17 = sadd.s32 1, %s1065_s17   ;;  %s1263_s15 = smov %s1061_s16 }
 0x161   : > { %p11_p8 = scmp.ge.s32.totalorder %s14_s17, 4   ;;  %s1264_s16 = smov %s1266_s18 }
 0x163   :  { %13 = sbr.rel (!%p11_p8) target bundleno = 2 (0x2), region = 84 }

</bundles_post_ra>
